<compile_context>
chip_gen: v7x
topology: tpu7x:2x2x1
jax: 0.10.0
libtpu: 0.0.40
codegen_flags: <defaults>
</compile_context>

<pallas_src>
import jax
import jax.numpy as jnp
from jax import lax
from jax.experimental import pallas as pl
from jax.experimental.pallas import tpu as pltpu

L_IN = 64                 # conv1: 63 -> pool2: 31 -> conv2: 30 -> pool4: 7
T1, P1, T2, P2 = 63, 31, 30, 7
P1_USED = 29              # pool-1 pages 0..28 are the only ones conv2/pool4 consume
C1, C2 = 16, 32           # conv channel counts
NB = 128                  # samples per lane-group (lane width)
OUT_PAD = 8               # output rows padded to one sublane tile; row 0 is real
K_MAX = 8                 # lane-groups per grid step


def mymodel_kernel(x_ref, w1_ref, b1_ref, w2_ref, b2_ref, wl_ref, bl_ref,
                   out_ref, xt_ref, p1_ref):
    # x_ref:  (K, NB, 64)   natural batch-major layout (no wrapper transpose)
    # w1_ref: (2, 16, 1)    [tap, c_out, 1]
    # b1_ref: (16, 1)
    # w2_ref: (32, 32)      [c_out, c_in*2]  (tap0 cols 0:16, tap1 cols 16:32)
    # b2_ref: (32, 1)
    # wl_ref: (7, 8, 32)    wl_ref[t, 0, c] == W_linear[0, c*7 + t], rows 1..7 zero
    # bl_ref: (1, 1)
    # out_ref:(K, 8, NB)    row 0 of dim-1 is the model output
    # xt_ref: (64, NB)      scratch: transposed input of current group (time, batch)
    # p1_ref: (29*16, NB)   scratch: pool-1 output, page tp at rows [16tp, 16tp+16)
    K = x_ref.shape[0]
    nb = xt_ref.shape[1]

    # ---- hoisted, loop-invariant broadcasts / constants ----------------------
    w1a = jnp.broadcast_to(w1_ref[0], (C1, nb))        # conv1 tap 0 weights
    w1b = jnp.broadcast_to(w1_ref[1], (C1, nb))        # conv1 tap 1 weights
    b1b = jnp.broadcast_to(b1_ref[...], (C1, nb))
    b2b = jnp.broadcast_to(b2_ref[...], (C2, nb))
    blb = jnp.broadcast_to(bl_ref[...], (OUT_PAD, nb))  # linear bias (row 0 real)
    w2 = w2_ref[...]                                     # (32, 32)

    rows = lax.broadcasted_iota(jnp.int32, (L_IN, L_IN), 0)
    cols = lax.broadcasted_iota(jnp.int32, (L_IN, L_IN), 1)
    eye = jnp.where(rows == cols, 1.0, 0.0)              # (64, 64) f32 identity
    nt_dims = (((1,), (1,)), ((), ()))                    # A @ B^T dimension numbers

    @pl.loop(0, K)
    def _group(k):
        # ---- (NB,64) -> (64,NB) transpose on the idle MXU: eye @ x_k^T --------
        xg = x_ref[k]                                     # (NB, 64)
        xt_ref[...] = lax.dot_general(eye, xg, nt_dims,
                                      preferred_element_type=jnp.float32)

        # ---- stage 1: Conv1d(1,16,2) + ReLU + MaxPool1d(2), fused -------------
        # p1[tp,c,n] = relu(max_j(w1[c,0]*x[2tp+j,n] + w1[c,1]*x[2tp+j+1,n]) + b1[c])
        for tp in range(P1_USED):
            x0 = jnp.broadcast_to(xt_ref[pl.ds(2 * tp, 1), :], (C1, nb))
            x1 = jnp.broadcast_to(xt_ref[pl.ds(2 * tp + 1, 1), :], (C1, nb))
            x2 = jnp.broadcast_to(xt_ref[pl.ds(2 * tp + 2, 1), :], (C1, nb))
            z = jnp.maximum(x0 * w1a + x1 * w1b, x1 * w1a + x2 * w1b)
            p1_ref[pl.ds(C1 * tp, C1), :] = jnp.maximum(z + b1b, 0.0)

        # ---- stage 2: Conv1d(16,32,2)+ReLU+MaxPool1d(4)+Flatten+Linear --------
        # Each conv2 position reads its 2 consecutive p1 pages directly from the
        # scratch ref (no lane-concat copies); the linear layer runs on the MXU.
        acc = blb                                         # (8, nb), row 0 = bias
        for to in range(P2):
            zm = None
            for j in range(4):
                t2 = 4 * to + j
                rhs = p1_ref[pl.ds(C1 * t2, 2 * C1), :]   # (32, nb)
                zj = jnp.dot(w2, rhs, preferred_element_type=jnp.float32)
                zm = zj if zm is None else jnp.maximum(zm, zj)
            m = jnp.maximum(zm + b2b, 0.0)                # pooled conv2 output
            acc = acc + jnp.dot(wl_ref[to], m,
                                preferred_element_type=jnp.float32)
        out_ref[k] = acc


def mymodel_forward(x, params, nb=NB, k_max=K_MAX):
    """x: (N, 1, 64) float32, params in original PyTorch layouts."""
    w1, b1, w2, b2, wl, bl = params
    N = x.shape[0]

    def cdiv(a, b):
        return -(-a // b)

    n_groups = cdiv(N, nb)
    # prefer >=2 grid steps (pipelining overlap / v7x megacore), then pack up to
    # k_max lane-groups per step to amortize the fixed per-step cost.
    G = max(cdiv(n_groups, k_max), min(n_groups, 2))
    K = cdiv(n_groups, G)
    Np = G * K * nb

    # --- glue: pad + free reshape only (no HBM relayout pass) -----------------
    x2 = x.reshape(N, L_IN).astype(jnp.float32)
    if Np != N:
        x2 = jnp.pad(x2, ((0, Np - N), (0, 0)))
    xk = x2.reshape(G, K, nb, L_IN)                      # (G, K, 128, 64)

    w1k = jnp.transpose(w1[:, 0, :], (1, 0))[:, :, None]        # (2, 16, 1)
    b1k = b1.reshape(C1, 1)
    w2k = jnp.concatenate([w2[:, :, 0], w2[:, :, 1]], axis=1)   # (32, 32)
    b2k = b2.reshape(C2, 1)
    wlk = jnp.zeros((P2, OUT_PAD, C2), jnp.float32).at[:, 0, :].set(
        jnp.transpose(wl.reshape(C2, P2), (1, 0)))              # (7, 8, 32)
    blk = bl.reshape(1, 1)

    out = pl.pallas_call(
        mymodel_kernel,
        out_shape=jax.ShapeDtypeStruct((G, K, OUT_PAD, nb), jnp.float32),
        grid=(G,),
        in_specs=[
            pl.BlockSpec((None, K, nb, L_IN), lambda g: (g, 0, 0, 0)),  # x block
            pl.BlockSpec((2, C1, 1), lambda g: (0, 0, 0)),              # conv1 w
            pl.BlockSpec((C1, 1), lambda g: (0, 0)),                    # conv1 b
            pl.BlockSpec((C2, 2 * C1), lambda g: (0, 0)),               # conv2 w
            pl.BlockSpec((C2, 1), lambda g: (0, 0)),                    # conv2 b
            pl.BlockSpec((P2, OUT_PAD, C2), lambda g: (0, 0, 0)),       # linear w
            pl.BlockSpec((1, 1), lambda g: (0, 0)),                     # linear b
        ],
        out_specs=pl.BlockSpec((None, K, OUT_PAD, nb), lambda g: (g, 0, 0, 0)),
        scratch_shapes=[pltpu.VMEM((L_IN, nb), jnp.float32),        # transposed x
                        pltpu.VMEM((P1_USED * C1, nb), jnp.float32)],  # pool-1 out
        compiler_params=pltpu.CompilerParams(
            dimension_semantics=("parallel",)),
    )(xk, w1k, b1k, w2k, b2k, wlk, blk)

    return out[:, :, 0, :].reshape(Np, 1)[:N]


def ref_forward(x, params):
    """Pure-JAX reference following PyTorch NCL semantics exactly."""
    w1, b1, w2, b2, wl, bl = params

    def conv1d(h, w, b):
        Kk = w.shape[2]
        Lo = h.shape[2] - Kk + 1
        acc = sum(jnp.einsum('ncl,oc->nol', h[:, :, k:k + Lo], w[:, :, k])
                  for k in range(Kk))
        return acc + b[None, :, None]

    def maxpool1d(h, k):
        n, c, l = h.shape
        lo = l // k
        return jnp.max(h[:, :, :lo * k].reshape(n, c, lo, k), axis=-1)

    h = jax.nn.relu(conv1d(x, w1, b1))
    h = maxpool1d(h, 2)
    h = jax.nn.relu(conv1d(h, w2, b2))
    h = maxpool1d(h, 4)
    h = h.reshape(h.shape[0], -1)                 # (N, 224), torch Flatten order
    return h @ wl.T + bl[None, :]


if __name__ == "__main__":
    key = jax.random.PRNGKey(0)
    ks = jax.random.split(key, 7)
    # deterministic synthetic parameters (shapes from the nn.Module __init__)
    w1 = jax.random.normal(ks[0], (16, 1, 2), jnp.float32) * 0.5
    b1 = jax.random.normal(ks[1], (16,), jnp.float32) * 0.1
    w2 = jax.random.normal(ks[2], (32, 16, 2), jnp.float32) * 0.2
    b2 = jax.random.normal(ks[3], (32,), jnp.float32) * 0.1
    wl = jax.random.normal(ks[4], (1, 224), jnp.float32) * 0.1
    bl = jax.random.normal(ks[5], (1,), jnp.float32) * 0.1
    params = (w1, b1, w2, b2, wl, bl)

    # primary test: N=400 -> 4 lane-groups -> G=2 grid steps, K=2 groups/step,
    # with padding (400 -> 512).
    N = 400
    x = jax.random.normal(ks[6], (N, 1, L_IN), jnp.float32)
    y = mymodel_forward(x, params)
    jax.block_until_ready(y)
    y_ref = ref_forward(x, params)
    assert y.shape == (N, 1), y.shape
    assert jnp.allclose(y, y_ref, atol=5e-4, rtol=5e-4), (y[:4], y_ref[:4])

    # secondary test: tiny batch -> single grid step, single group.
    N2 = 40
    x2 = jax.random.normal(jax.random.PRNGKey(1), (N2, 1, L_IN), jnp.float32)
    y2 = mymodel_forward(x2, params)
    jax.block_until_ready(y2)
    y2_ref = ref_forward(x2, params)
    assert y2.shape == (N2, 1), y2.shape
    assert jnp.allclose(y2, y2_ref, atol=5e-4, rtol=5e-4), (y2[:4], y2_ref[:4])

    print("KERNEL_OK")
</pallas_src>

<mosaic_0001>
module attributes {stable_mosaic.version = 11 : i64} {
  func.func @mymodel_kernel(%arg0: i32, %arg1: memref<1x2x128x64xf32, #tpu.memory_space<vmem>>, %arg2: memref<2x16x1xf32, #tpu.memory_space<vmem>>, %arg3: memref<16x1xf32, #tpu.memory_space<vmem>>, %arg4: memref<32x32xf32, #tpu.memory_space<vmem>>, %arg5: memref<32x1xf32, #tpu.memory_space<vmem>>, %arg6: memref<7x8x32xf32, #tpu.memory_space<vmem>>, %arg7: memref<1x1xf32, #tpu.memory_space<vmem>>, %arg8: memref<1x2x8x128xf32, #tpu.memory_space<vmem>>, %arg9: memref<64x128xf32, #tpu.memory_space<vmem>>, %arg10: memref<464x128xf32, #tpu.memory_space<vmem>>) attributes {dimension_semantics = [#tpu.dimension_semantics<parallel>], iteration_bounds = array<i64: 2>, scalar_prefetch = 0 : i64, scratch_operands = 2 : i64, tpu.core_type = #tpu.core_type<tc>, window_params = [{transform_indices = @transform_0, window_bounds = array<i64: 1, 2, 128, 64>}, {pipeline_mode = #tpu.pipeline_mode<synchronous>, transform_indices = @transform_1, window_bounds = array<i64: 2, 16, 1>}, {pipeline_mode = #tpu.pipeline_mode<synchronous>, transform_indices = @transform_2, window_bounds = array<i64: 16, 1>}, {pipeline_mode = #tpu.pipeline_mode<synchronous>, transform_indices = @transform_3, window_bounds = array<i64: 32, 32>}, {pipeline_mode = #tpu.pipeline_mode<synchronous>, transform_indices = @transform_4, window_bounds = array<i64: 32, 1>}, {pipeline_mode = #tpu.pipeline_mode<synchronous>, transform_indices = @transform_5, window_bounds = array<i64: 7, 8, 32>}, {pipeline_mode = #tpu.pipeline_mode<synchronous>, transform_indices = @transform_6, window_bounds = array<i64: 1, 1>}, {transform_indices = @transform_7, window_bounds = array<i64: 1, 2, 8, 128>}]} {
    %c0 = arith.constant 0 : index
    %c0_0 = arith.constant 0 : index
    %c0_1 = arith.constant 0 : index
    %0 = vector.load %arg2[%c0, %c0_0, %c0_1] : memref<2x16x1xf32, #tpu.memory_space<vmem>>, vector<1x16x1xf32>
    %1 = vector.shape_cast %0 : vector<1x16x1xf32> to vector<16x1xf32>
    %2 = vector.shape_cast %1 : vector<16x1xf32> to vector<16x1xf32>
    %3 = vector.broadcast %2 : vector<16x1xf32> to vector<16x128xf32>
    %c1 = arith.constant 1 : index
    %c0_2 = arith.constant 0 : index
    %c0_3 = arith.constant 0 : index
    %4 = vector.load %arg2[%c1, %c0_2, %c0_3] : memref<2x16x1xf32, #tpu.memory_space<vmem>>, vector<1x16x1xf32>
    %5 = vector.shape_cast %4 : vector<1x16x1xf32> to vector<16x1xf32>
    %6 = vector.shape_cast %5 : vector<16x1xf32> to vector<16x1xf32>
    %7 = vector.broadcast %6 : vector<16x1xf32> to vector<16x128xf32>
    %c0_4 = arith.constant 0 : index
    %c0_5 = arith.constant 0 : index
    %8 = vector.load %arg3[%c0_4, %c0_5] : memref<16x1xf32, #tpu.memory_space<vmem>>, vector<16x1xf32>
    %9 = vector.shape_cast %8 : vector<16x1xf32> to vector<16x1xf32>
    %10 = vector.broadcast %9 : vector<16x1xf32> to vector<16x128xf32>
    %c0_6 = arith.constant 0 : index
    %c0_7 = arith.constant 0 : index
    %11 = vector.load %arg5[%c0_6, %c0_7] : memref<32x1xf32, #tpu.memory_space<vmem>>, vector<32x1xf32>
    %12 = vector.shape_cast %11 : vector<32x1xf32> to vector<32x1xf32>
    %13 = vector.broadcast %12 : vector<32x1xf32> to vector<32x128xf32>
    %c0_8 = arith.constant 0 : index
    %c0_9 = arith.constant 0 : index
    %14 = vector.load %arg7[%c0_8, %c0_9] : memref<1x1xf32, #tpu.memory_space<vmem>>, vector<1x1xf32>
    %15 = vector.shape_cast %14 : vector<1x1xf32> to vector<1x1xf32>
    %16 = vector.broadcast %15 : vector<1x1xf32> to vector<8x128xf32>
    %c0_10 = arith.constant 0 : index
    %c0_11 = arith.constant 0 : index
    %17 = vector.load %arg4[%c0_10, %c0_11] : memref<32x32xf32, #tpu.memory_space<vmem>>, vector<32x32xf32>
    %18 = tpu.iota {dimensions = array<i32: 0>} : vector<64x64xi32>
    %19 = tpu.iota {dimensions = array<i32: 1>} : vector<64x64xi32>
    %20 = arith.cmpi eq, %18, %19 : vector<64x64xi32>
    %cst = arith.constant 1.000000e+00 : f32
    %cst_12 = arith.constant 0.000000e+00 : f32
    %21 = vector.broadcast %cst : f32 to vector<64x64xf32>
    %22 = vector.broadcast %cst_12 : f32 to vector<64x64xf32>
    %23 = arith.select %20, %21, %22 : vector<64x64xi1>, vector<64x64xf32>
    %c0_i32 = arith.constant 0 : i32
    %c2_i32 = arith.constant 2 : i32
    %24 = arith.addi %c0_i32, %c2_i32 : i32
    %c1_i32 = arith.constant 1 : i32
    scf.for %arg11 = %c0_i32 to %24 step %c1_i32  : i32 {
      %c1_i32_14 = arith.constant 1 : i32
      %25 = arith.muli %arg11, %c1_i32_14 : i32
      %c0_i32_15 = arith.constant 0 : i32
      %26 = arith.addi %c0_i32_15, %25 : i32
      %c0_16 = arith.constant 0 : index
      %27 = arith.index_cast %26 : i32 to index
      %c0_17 = arith.constant 0 : index
      %c0_18 = arith.constant 0 : index
      %28 = vector.load %arg1[%c0_16, %27, %c0_17, %c0_18] : memref<1x2x128x64xf32, #tpu.memory_space<vmem>>, vector<1x1x128x64xf32>
      %29 = vector.shape_cast %28 : vector<1x1x128x64xf32> to vector<128x64xf32>
      %cst_19 = arith.constant dense<0.000000e+00> : vector<64x128xf32>
      %30 = tpu.matmul %23, %29, %cst_19 {dimension_numbers = #tpu.dot_dimension_numbers<[1], [1], [0], [0], [0, 0, 1, 0], [], []>} : vector<64x64xf32>, vector<128x64xf32>, vector<64x128xf32> -> vector<64x128xf32>
      %c0_20 = arith.constant 0 : index
      %c0_21 = arith.constant 0 : index
      %31 = vector.load %arg9[%c0_20, %c0_21] : memref<64x128xf32, #tpu.memory_space<vmem>>, vector<64x128xf32>
      tpu.vector_store %arg9[%c0_20, %c0_21], %30 {strides = array<i32>} : memref<64x128xf32, #tpu.memory_space<vmem>>, vector<64x128xf32>,
      %c0_22 = arith.constant 0 : index
      %c0_23 = arith.constant 0 : index
      %32 = vector.load %arg9[%c0_22, %c0_23] : memref<64x128xf32, #tpu.memory_space<vmem>>, vector<1x128xf32>
      %33 = vector.shape_cast %32 : vector<1x128xf32> to vector<1x128xf32>
      %34 = vector.broadcast %33 : vector<1x128xf32> to vector<16x128xf32>
      %c1_24 = arith.constant 1 : index
      %c0_25 = arith.constant 0 : index
      %35 = vector.load %arg9[%c1_24, %c0_25] : memref<64x128xf32, #tpu.memory_space<vmem>>, vector<1x128xf32>
      %36 = vector.shape_cast %35 : vector<1x128xf32> to vector<1x128xf32>
      %37 = vector.broadcast %36 : vector<1x128xf32> to vector<16x128xf32>
      %c2 = arith.constant 2 : index
      %c0_26 = arith.constant 0 : index
      %38 = vector.load %arg9[%c2, %c0_26] : memref<64x128xf32, #tpu.memory_space<vmem>>, vector<1x128xf32>
      %39 = vector.shape_cast %38 : vector<1x128xf32> to vector<1x128xf32>
      %40 = vector.broadcast %39 : vector<1x128xf32> to vector<16x128xf32>
      %41 = arith.mulf %34, %3 : vector<16x128xf32>
      %42 = arith.mulf %37, %7 : vector<16x128xf32>
      %43 = arith.addf %41, %42 : vector<16x128xf32>
      %44 = arith.mulf %37, %3 : vector<16x128xf32>
      %45 = arith.mulf %40, %7 : vector<16x128xf32>
      %46 = arith.addf %44, %45 : vector<16x128xf32>
      %47 = arith.maximumf %43, %46 : vector<16x128xf32>
      %48 = arith.addf %47, %10 : vector<16x128xf32>
      %cst_27 = arith.constant 0.000000e+00 : f32
      %49 = vector.broadcast %cst_27 : f32 to vector<16x128xf32>
      %50 = arith.maximumf %48, %49 : vector<16x128xf32>
      %c0_28 = arith.constant 0 : index
      %c0_29 = arith.constant 0 : index
      %51 = vector.load %arg10[%c0_28, %c0_29] : memref<464x128xf32, #tpu.memory_space<vmem>>, vector<16x128xf32>
      tpu.vector_store %arg10[%c0_28, %c0_29], %50 {strides = array<i32>} : memref<464x128xf32, #tpu.memory_space<vmem>>, vector<16x128xf32>,
      %c2_30 = arith.constant 2 : index
      %c0_31 = arith.constant 0 : index
      %52 = vector.load %arg9[%c2_30, %c0_31] : memref<64x128xf32, #tpu.memory_space<vmem>>, vector<1x128xf32>
      %53 = vector.shape_cast %52 : vector<1x128xf32> to vector<1x128xf32>
      %54 = vector.broadcast %53 : vector<1x128xf32> to vector<16x128xf32>
      %c3 = arith.constant 3 : index
      %c0_32 = arith.constant 0 : index
      %55 = vector.load %arg9[%c3, %c0_32] : memref<64x128xf32, #tpu.memory_space<vmem>>, vector<1x128xf32>
      %56 = vector.shape_cast %55 : vector<1x128xf32> to vector<1x128xf32>
      %57 = vector.broadcast %56 : vector<1x128xf32> to vector<16x128xf32>
      %c4 = arith.constant 4 : index
      %c0_33 = arith.constant 0 : index
      %58 = vector.load %arg9[%c4, %c0_33] : memref<64x128xf32, #tpu.memory_space<vmem>>, vector<1x128xf32>
      %59 = vector.shape_cast %58 : vector<1x128xf32> to vector<1x128xf32>
      %60 = vector.broadcast %59 : vector<1x128xf32> to vector<16x128xf32>
      %61 = arith.mulf %54, %3 : vector<16x128xf32>
      %62 = arith.mulf %57, %7 : vector<16x128xf32>
      %63 = arith.addf %61, %62 : vector<16x128xf32>
      %64 = arith.mulf %57, %3 : vector<16x128xf32>
      %65 = arith.mulf %60, %7 : vector<16x128xf32>
      %66 = arith.addf %64, %65 : vector<16x128xf32>
      %67 = arith.maximumf %63, %66 : vector<16x128xf32>
      %68 = arith.addf %67, %10 : vector<16x128xf32>
      %cst_34 = arith.constant 0.000000e+00 : f32
      %69 = vector.broadcast %cst_34 : f32 to vector<16x128xf32>
      %70 = arith.maximumf %68, %69 : vector<16x128xf32>
      %c16 = arith.constant 16 : index
      %c0_35 = arith.constant 0 : index
      %71 = vector.load %arg10[%c16, %c0_35] : memref<464x128xf32, #tpu.memory_space<vmem>>, vector<16x128xf32>
      tpu.vector_store %arg10[%c16, %c0_35], %70 {strides = array<i32>} : memref<464x128xf32, #tpu.memory_space<vmem>>, vector<16x128xf32>,
      %c4_36 = arith.constant 4 : index
      %c0_37 = arith.constant 0 : index
      %72 = vector.load %arg9[%c4_36, %c0_37] : memref<64x128xf32, #tpu.memory_space<vmem>>, vector<1x128xf32>
      %73 = vector.shape_cast %72 : vector<1x128xf32> to vector<1x128xf32>
      %74 = vector.broadcast %73 : vector<1x128xf32> to vector<16x128xf32>
      %c5 = arith.constant 5 : index
      %c0_38 = arith.constant 0 : index
      %75 = vector.load %arg9[%c5, %c0_38] : memref<64x128xf32, #tpu.memory_space<vmem>>, vector<1x128xf32>
      %76 = vector.shape_cast %75 : vector<1x128xf32> to vector<1x128xf32>
      %77 = vector.broadcast %76 : vector<1x128xf32> to vector<16x128xf32>
      %c6 = arith.constant 6 : index
      %c0_39 = arith.constant 0 : index
      %78 = vector.load %arg9[%c6, %c0_39] : memref<64x128xf32, #tpu.memory_space<vmem>>, vector<1x128xf32>
      %79 = vector.shape_cast %78 : vector<1x128xf32> to vector<1x128xf32>
      %80 = vector.broadcast %79 : vector<1x128xf32> to vector<16x128xf32>
      %81 = arith.mulf %74, %3 : vector<16x128xf32>
      %82 = arith.mulf %77, %7 : vector<16x128xf32>
      %83 = arith.addf %81, %82 : vector<16x128xf32>
      %84 = arith.mulf %77, %3 : vector<16x128xf32>
      %85 = arith.mulf %80, %7 : vector<16x128xf32>
      %86 = arith.addf %84, %85 : vector<16x128xf32>
      %87 = arith.maximumf %83, %86 : vector<16x128xf32>
      %88 = arith.addf %87, %10 : vector<16x128xf32>
      %cst_40 = arith.constant 0.000000e+00 : f32
      %89 = vector.broadcast %cst_40 : f32 to vector<16x128xf32>
      %90 = arith.maximumf %88, %89 : vector<16x128xf32>
      %c32 = arith.constant 32 : index
      %c0_41 = arith.constant 0 : index
      %91 = vector.load %arg10[%c32, %c0_41] : memref<464x128xf32, #tpu.memory_space<vmem>>, vector<16x128xf32>
      tpu.vector_store %arg10[%c32, %c0_41], %90 {strides = array<i32>} : memref<464x128xf32, #tpu.memory_space<vmem>>, vector<16x128xf32>,
      %c6_42 = arith.constant 6 : index
      %c0_43 = arith.constant 0 : index
      %92 = vector.load %arg9[%c6_42, %c0_43] : memref<64x128xf32, #tpu.memory_space<vmem>>, vector<1x128xf32>
      %93 = vector.shape_cast %92 : vector<1x128xf32> to vector<1x128xf32>
      %94 = vector.broadcast %93 : vector<1x128xf32> to vector<16x128xf32>
      %c7 = arith.constant 7 : index
      %c0_44 = arith.constant 0 : index
      %95 = vector.load %arg9[%c7, %c0_44] : memref<64x128xf32, #tpu.memory_space<vmem>>, vector<1x128xf32>
      %96 = vector.shape_cast %95 : vector<1x128xf32> to vector<1x128xf32>
      %97 = vector.broadcast %96 : vector<1x128xf32> to vector<16x128xf32>
      %c8 = arith.constant 8 : index
      %c0_45 = arith.constant 0 : index
      %98 = vector.load %arg9[%c8, %c0_45] : memref<64x128xf32, #tpu.memory_space<vmem>>, vector<1x128xf32>
      %99 = vector.shape_cast %98 : vector<1x128xf32> to vector<1x128xf32>
      %100 = vector.broadcast %99 : vector<1x128xf32> to vector<16x128xf32>
      %101 = arith.mulf %94, %3 : vector<16x128xf32>
      %102 = arith.mulf %97, %7 : vector<16x128xf32>
      %103 = arith.addf %101, %102 : vector<16x128xf32>
      %104 = arith.mulf %97, %3 : vector<16x128xf32>
      %105 = arith.mulf %100, %7 : vector<16x128xf32>
      %106 = arith.addf %104, %105 : vector<16x128xf32>
      %107 = arith.maximumf %103, %106 : vector<16x128xf32>
      %108 = arith.addf %107, %10 : vector<16x128xf32>
      %cst_46 = arith.constant 0.000000e+00 : f32
      %109 = vector.broadcast %cst_46 : f32 to vector<16x128xf32>
      %110 = arith.maximumf %108, %109 : vector<16x128xf32>
      %c48 = arith.constant 48 : index
      %c0_47 = arith.constant 0 : index
      %111 = vector.load %arg10[%c48, %c0_47] : memref<464x128xf32, #tpu.memory_space<vmem>>, vector<16x128xf32>
      tpu.vector_store %arg10[%c48, %c0_47], %110 {strides = array<i32>} : memref<464x128xf32, #tpu.memory_space<vmem>>, vector<16x128xf32>,
      %c8_48 = arith.constant 8 : index
      %c0_49 = arith.constant 0 : index
      %112 = vector.load %arg9[%c8_48, %c0_49] : memref<64x128xf32, #tpu.memory_space<vmem>>, vector<1x128xf32>
      %113 = vector.shape_cast %112 : vector<1x128xf32> to vector<1x128xf32>
      %114 = vector.broadcast %113 : vector<1x128xf32> to vector<16x128xf32>
      %c9 = arith.constant 9 : index
      %c0_50 = arith.constant 0 : index
      %115 = vector.load %arg9[%c9, %c0_50] : memref<64x128xf32, #tpu.memory_space<vmem>>, vector<1x128xf32>
      %116 = vector.shape_cast %115 : vector<1x128xf32> to vector<1x128xf32>
      %117 = vector.broadcast %116 : vector<1x128xf32> to vector<16x128xf32>
      %c10 = arith.constant 10 : index
      %c0_51 = arith.constant 0 : index
      %118 = vector.load %arg9[%c10, %c0_51] : memref<64x128xf32, #tpu.memory_space<vmem>>, vector<1x128xf32>
      %119 = vector.shape_cast %118 : vector<1x128xf32> to vector<1x128xf32>
      %120 = vector.broadcast %119 : vector<1x128xf32> to vector<16x128xf32>
      %121 = arith.mulf %114, %3 : vector<16x128xf32>
      %122 = arith.mulf %117, %7 : vector<16x128xf32>
      %123 = arith.addf %121, %122 : vector<16x128xf32>
      %124 = arith.mulf %117, %3 : vector<16x128xf32>
      %125 = arith.mulf %120, %7 : vector<16x128xf32>
      %126 = arith.addf %124, %125 : vector<16x128xf32>
      %127 = arith.maximumf %123, %126 : vector<16x128xf32>
      %128 = arith.addf %127, %10 : vector<16x128xf32>
      %cst_52 = arith.constant 0.000000e+00 : f32
      %129 = vector.broadcast %cst_52 : f32 to vector<16x128xf32>
      %130 = arith.maximumf %128, %129 : vector<16x128xf32>
      %c64 = arith.constant 64 : index
      %c0_53 = arith.constant 0 : index
      %131 = vector.load %arg10[%c64, %c0_53] : memref<464x128xf32, #tpu.memory_space<vmem>>, vector<16x128xf32>
      tpu.vector_store %arg10[%c64, %c0_53], %130 {strides = array<i32>} : memref<464x128xf32, #tpu.memory_space<vmem>>, vector<16x128xf32>,
      %c10_54 = arith.constant 10 : index
      %c0_55 = arith.constant 0 : index
      %132 = vector.load %arg9[%c10_54, %c0_55] : memref<64x128xf32, #tpu.memory_space<vmem>>, vector<1x128xf32>
      %133 = vector.shape_cast %132 : vector<1x128xf32> to vector<1x128xf32>
      %134 = vector.broadcast %133 : vector<1x128xf32> to vector<16x128xf32>
      %c11 = arith.constant 11 : index
      %c0_56 = arith.constant 0 : index
      %135 = vector.load %arg9[%c11, %c0_56] : memref<64x128xf32, #tpu.memory_space<vmem>>, vector<1x128xf32>
      %136 = vector.shape_cast %135 : vector<1x128xf32> to vector<1x128xf32>
      %137 = vector.broadcast %136 : vector<1x128xf32> to vector<16x128xf32>
      %c12 = arith.constant 12 : index
      %c0_57 = arith.constant 0 : index
      %138 = vector.load %arg9[%c12, %c0_57] : memref<64x128xf32, #tpu.memory_space<vmem>>, vector<1x128xf32>
      %139 = vector.shape_cast %138 : vector<1x128xf32> to vector<1x128xf32>
      %140 = vector.broadcast %139 : vector<1x128xf32> to vector<16x128xf32>
      %141 = arith.mulf %134, %3 : vector<16x128xf32>
      %142 = arith.mulf %137, %7 : vector<16x128xf32>
      %143 = arith.addf %141, %142 : vector<16x128xf32>
      %144 = arith.mulf %137, %3 : vector<16x128xf32>
      %145 = arith.mulf %140, %7 : vector<16x128xf32>
      %146 = arith.addf %144, %145 : vector<16x128xf32>
      %147 = arith.maximumf %143, %146 : vector<16x128xf32>
      %148 = arith.addf %147, %10 : vector<16x128xf32>
      %cst_58 = arith.constant 0.000000e+00 : f32
      %149 = vector.broadcast %cst_58 : f32 to vector<16x128xf32>
      %150 = arith.maximumf %148, %149 : vector<16x128xf32>
      %c80 = arith.constant 80 : index
      %c0_59 = arith.constant 0 : index
      %151 = vector.load %arg10[%c80, %c0_59] : memref<464x128xf32, #tpu.memory_space<vmem>>, vector<16x128xf32>
      tpu.vector_store %arg10[%c80, %c0_59], %150 {strides = array<i32>} : memref<464x128xf32, #tpu.memory_space<vmem>>, vector<16x128xf32>,
      %c12_60 = arith.constant 12 : index
      %c0_61 = arith.constant 0 : index
      %152 = vector.load %arg9[%c12_60, %c0_61] : memref<64x128xf32, #tpu.memory_space<vmem>>, vector<1x128xf32>
      %153 = vector.shape_cast %152 : vector<1x128xf32> to vector<1x128xf32>
      %154 = vector.broadcast %153 : vector<1x128xf32> to vector<16x128xf32>
      %c13 = arith.constant 13 : index
      %c0_62 = arith.constant 0 : index
      %155 = vector.load %arg9[%c13, %c0_62] : memref<64x128xf32, #tpu.memory_space<vmem>>, vector<1x128xf32>
      %156 = vector.shape_cast %155 : vector<1x128xf32> to vector<1x128xf32>
      %157 = vector.broadcast %156 : vector<1x128xf32> to vector<16x128xf32>
      %c14 = arith.constant 14 : index
      %c0_63 = arith.constant 0 : index
      %158 = vector.load %arg9[%c14, %c0_63] : memref<64x128xf32, #tpu.memory_space<vmem>>, vector<1x128xf32>
      %159 = vector.shape_cast %158 : vector<1x128xf32> to vector<1x128xf32>
      %160 = vector.broadcast %159 : vector<1x128xf32> to vector<16x128xf32>
      %161 = arith.mulf %154, %3 : vector<16x128xf32>
      %162 = arith.mulf %157, %7 : vector<16x128xf32>
      %163 = arith.addf %161, %162 : vector<16x128xf32>
      %164 = arith.mulf %157, %3 : vector<16x128xf32>
      %165 = arith.mulf %160, %7 : vector<16x128xf32>
      %166 = arith.addf %164, %165 : vector<16x128xf32>
      %167 = arith.maximumf %163, %166 : vector<16x128xf32>
      %168 = arith.addf %167, %10 : vector<16x128xf32>
      %cst_64 = arith.constant 0.000000e+00 : f32
      %169 = vector.broadcast %cst_64 : f32 to vector<16x128xf32>
      %170 = arith.maximumf %168, %169 : vector<16x128xf32>
      %c96 = arith.constant 96 : index
      %c0_65 = arith.constant 0 : index
      %171 = vector.load %arg10[%c96, %c0_65] : memref<464x128xf32, #tpu.memory_space<vmem>>, vector<16x128xf32>
      tpu.vector_store %arg10[%c96, %c0_65], %170 {strides = array<i32>} : memref<464x128xf32, #tpu.memory_space<vmem>>, vector<16x128xf32>,
      %c14_66 = arith.constant 14 : index
      %c0_67 = arith.constant 0 : index
      %172 = vector.load %arg9[%c14_66, %c0_67] : memref<64x128xf32, #tpu.memory_space<vmem>>, vector<1x128xf32>
      %173 = vector.shape_cast %172 : vector<1x128xf32> to vector<1x128xf32>
      %174 = vector.broadcast %173 : vector<1x128xf32> to vector<16x128xf32>
      %c15 = arith.constant 15 : index
      %c0_68 = arith.constant 0 : index
      %175 = vector.load %arg9[%c15, %c0_68] : memref<64x128xf32, #tpu.memory_space<vmem>>, vector<1x128xf32>
      %176 = vector.shape_cast %175 : vector<1x128xf32> to vector<1x128xf32>
      %177 = vector.broadcast %176 : vector<1x128xf32> to vector<16x128xf32>
      %c16_69 = arith.constant 16 : index
      %c0_70 = arith.constant 0 : index
      %178 = vector.load %arg9[%c16_69, %c0_70] : memref<64x128xf32, #tpu.memory_space<vmem>>, vector<1x128xf32>
      %179 = vector.shape_cast %178 : vector<1x128xf32> to vector<1x128xf32>
      %180 = vector.broadcast %179 : vector<1x128xf32> to vector<16x128xf32>
      %181 = arith.mulf %174, %3 : vector<16x128xf32>
      %182 = arith.mulf %177, %7 : vector<16x128xf32>
      %183 = arith.addf %181, %182 : vector<16x128xf32>
      %184 = arith.mulf %177, %3 : vector<16x128xf32>
      %185 = arith.mulf %180, %7 : vector<16x128xf32>
      %186 = arith.addf %184, %185 : vector<16x128xf32>
      %187 = arith.maximumf %183, %186 : vector<16x128xf32>
      %188 = arith.addf %187, %10 : vector<16x128xf32>
      %cst_71 = arith.constant 0.000000e+00 : f32
      %189 = vector.broadcast %cst_71 : f32 to vector<16x128xf32>
      %190 = arith.maximumf %188, %189 : vector<16x128xf32>
      %c112 = arith.constant 112 : index
      %c0_72 = arith.constant 0 : index
      %191 = vector.load %arg10[%c112, %c0_72] : memref<464x128xf32, #tpu.memory_space<vmem>>, vector<16x128xf32>
      tpu.vector_store %arg10[%c112, %c0_72], %190 {strides = array<i32>} : memref<464x128xf32, #tpu.memory_space<vmem>>, vector<16x128xf32>,
      %c16_73 = arith.constant 16 : index
      %c0_74 = arith.constant 0 : index
      %192 = vector.load %arg9[%c16_73, %c0_74] : memref<64x128xf32, #tpu.memory_space<vmem>>, vector<1x128xf32>
      %193 = vector.shape_cast %192 : vector<1x128xf32> to vector<1x128xf32>
      %194 = vector.broadcast %193 : vector<1x128xf32> to vector<16x128xf32>
      %c17 = arith.constant 17 : index
      %c0_75 = arith.constant 0 : index
      %195 = vector.load %arg9[%c17, %c0_75] : memref<64x128xf32, #tpu.memory_space<vmem>>, vector<1x128xf32>
      %196 = vector.shape_cast %195 : vector<1x128xf32> to vector<1x128xf32>
      %197 = vector.broadcast %196 : vector<1x128xf32> to vector<16x128xf32>
      %c18 = arith.constant 18 : index
      %c0_76 = arith.constant 0 : index
      %198 = vector.load %arg9[%c18, %c0_76] : memref<64x128xf32, #tpu.memory_space<vmem>>, vector<1x128xf32>
      %199 = vector.shape_cast %198 : vector<1x128xf32> to vector<1x128xf32>
      %200 = vector.broadcast %199 : vector<1x128xf32> to vector<16x128xf32>
      %201 = arith.mulf %194, %3 : vector<16x128xf32>
      %202 = arith.mulf %197, %7 : vector<16x128xf32>
      %203 = arith.addf %201, %202 : vector<16x128xf32>
      %204 = arith.mulf %197, %3 : vector<16x128xf32>
      %205 = arith.mulf %200, %7 : vector<16x128xf32>
      %206 = arith.addf %204, %205 : vector<16x128xf32>
      %207 = arith.maximumf %203, %206 : vector<16x128xf32>
      %208 = arith.addf %207, %10 : vector<16x128xf32>
      %cst_77 = arith.constant 0.000000e+00 : f32
      %209 = vector.broadcast %cst_77 : f32 to vector<16x128xf32>
      %210 = arith.maximumf %208, %209 : vector<16x128xf32>
      %c128 = arith.constant 128 : index
      %c0_78 = arith.constant 0 : index
      %211 = vector.load %arg10[%c128, %c0_78] : memref<464x128xf32, #tpu.memory_space<vmem>>, vector<16x128xf32>
      tpu.vector_store %arg10[%c128, %c0_78], %210 {strides = array<i32>} : memref<464x128xf32, #tpu.memory_space<vmem>>, vector<16x128xf32>,
      %c18_79 = arith.constant 18 : index
      %c0_80 = arith.constant 0 : index
      %212 = vector.load %arg9[%c18_79, %c0_80] : memref<64x128xf32, #tpu.memory_space<vmem>>, vector<1x128xf32>
      %213 = vector.shape_cast %212 : vector<1x128xf32> to vector<1x128xf32>
      %214 = vector.broadcast %213 : vector<1x128xf32> to vector<16x128xf32>
      %c19 = arith.constant 19 : index
      %c0_81 = arith.constant 0 : index
      %215 = vector.load %arg9[%c19, %c0_81] : memref<64x128xf32, #tpu.memory_space<vmem>>, vector<1x128xf32>
      %216 = vector.shape_cast %215 : vector<1x128xf32> to vector<1x128xf32>
      %217 = vector.broadcast %216 : vector<1x128xf32> to vector<16x128xf32>
      %c20 = arith.constant 20 : index
      %c0_82 = arith.constant 0 : index
      %218 = vector.load %arg9[%c20, %c0_82] : memref<64x128xf32, #tpu.memory_space<vmem>>, vector<1x128xf32>
      %219 = vector.shape_cast %218 : vector<1x128xf32> to vector<1x128xf32>
      %220 = vector.broadcast %219 : vector<1x128xf32> to vector<16x128xf32>
      %221 = arith.mulf %214, %3 : vector<16x128xf32>
      %222 = arith.mulf %217, %7 : vector<16x128xf32>
      %223 = arith.addf %221, %222 : vector<16x128xf32>
      %224 = arith.mulf %217, %3 : vector<16x128xf32>
      %225 = arith.mulf %220, %7 : vector<16x128xf32>
      %226 = arith.addf %224, %225 : vector<16x128xf32>
      %227 = arith.maximumf %223, %226 : vector<16x128xf32>
      %228 = arith.addf %227, %10 : vector<16x128xf32>
      %cst_83 = arith.constant 0.000000e+00 : f32
      %229 = vector.broadcast %cst_83 : f32 to vector<16x128xf32>
      %230 = arith.maximumf %228, %229 : vector<16x128xf32>
      %c144 = arith.constant 144 : index
      %c0_84 = arith.constant 0 : index
      %231 = vector.load %arg10[%c144, %c0_84] : memref<464x128xf32, #tpu.memory_space<vmem>>, vector<16x128xf32>
      tpu.vector_store %arg10[%c144, %c0_84], %230 {strides = array<i32>} : memref<464x128xf32, #tpu.memory_space<vmem>>, vector<16x128xf32>,
      %c20_85 = arith.constant 20 : index
      %c0_86 = arith.constant 0 : index
      %232 = vector.load %arg9[%c20_85, %c0_86] : memref<64x128xf32, #tpu.memory_space<vmem>>, vector<1x128xf32>
      %233 = vector.shape_cast %232 : vector<1x128xf32> to vector<1x128xf32>
      %234 = vector.broadcast %233 : vector<1x128xf32> to vector<16x128xf32>
      %c21 = arith.constant 21 : index
      %c0_87 = arith.constant 0 : index
      %235 = vector.load %arg9[%c21, %c0_87] : memref<64x128xf32, #tpu.memory_space<vmem>>, vector<1x128xf32>
      %236 = vector.shape_cast %235 : vector<1x128xf32> to vector<1x128xf32>
      %237 = vector.broadcast %236 : vector<1x128xf32> to vector<16x128xf32>
      %c22 = arith.constant 22 : index
      %c0_88 = arith.constant 0 : index
      %238 = vector.load %arg9[%c22, %c0_88] : memref<64x128xf32, #tpu.memory_space<vmem>>, vector<1x128xf32>
      %239 = vector.shape_cast %238 : vector<1x128xf32> to vector<1x128xf32>
      %240 = vector.broadcast %239 : vector<1x128xf32> to vector<16x128xf32>
      %241 = arith.mulf %234, %3 : vector<16x128xf32>
      %242 = arith.mulf %237, %7 : vector<16x128xf32>
      %243 = arith.addf %241, %242 : vector<16x128xf32>
      %244 = arith.mulf %237, %3 : vector<16x128xf32>
      %245 = arith.mulf %240, %7 : vector<16x128xf32>
      %246 = arith.addf %244, %245 : vector<16x128xf32>
      %247 = arith.maximumf %243, %246 : vector<16x128xf32>
      %248 = arith.addf %247, %10 : vector<16x128xf32>
      %cst_89 = arith.constant 0.000000e+00 : f32
      %249 = vector.broadcast %cst_89 : f32 to vector<16x128xf32>
      %250 = arith.maximumf %248, %249 : vector<16x128xf32>
      %c160 = arith.constant 160 : index
      %c0_90 = arith.constant 0 : index
      %251 = vector.load %arg10[%c160, %c0_90] : memref<464x128xf32, #tpu.memory_space<vmem>>, vector<16x128xf32>
      tpu.vector_store %arg10[%c160, %c0_90], %250 {strides = array<i32>} : memref<464x128xf32, #tpu.memory_space<vmem>>, vector<16x128xf32>,
      %c22_91 = arith.constant 22 : index
      %c0_92 = arith.constant 0 : index
      %252 = vector.load %arg9[%c22_91, %c0_92] : memref<64x128xf32, #tpu.memory_space<vmem>>, vector<1x128xf32>
      %253 = vector.shape_cast %252 : vector<1x128xf32> to vector<1x128xf32>
      %254 = vector.broadcast %253 : vector<1x128xf32> to vector<16x128xf32>
      %c23 = arith.constant 23 : index
      %c0_93 = arith.constant 0 : index
      %255 = vector.load %arg9[%c23, %c0_93] : memref<64x128xf32, #tpu.memory_space<vmem>>, vector<1x128xf32>
      %256 = vector.shape_cast %255 : vector<1x128xf32> to vector<1x128xf32>
      %257 = vector.broadcast %256 : vector<1x128xf32> to vector<16x128xf32>
      %c24 = arith.constant 24 : index
      %c0_94 = arith.constant 0 : index
      %258 = vector.load %arg9[%c24, %c0_94] : memref<64x128xf32, #tpu.memory_space<vmem>>, vector<1x128xf32>
      %259 = vector.shape_cast %258 : vector<1x128xf32> to vector<1x128xf32>
      %260 = vector.broadcast %259 : vector<1x128xf32> to vector<16x128xf32>
      %261 = arith.mulf %254, %3 : vector<16x128xf32>
      %262 = arith.mulf %257, %7 : vector<16x128xf32>
      %263 = arith.addf %261, %262 : vector<16x128xf32>
      %264 = arith.mulf %257, %3 : vector<16x128xf32>
      %265 = arith.mulf %260, %7 : vector<16x128xf32>
      %266 = arith.addf %264, %265 : vector<16x128xf32>
      %267 = arith.maximumf %263, %266 : vector<16x128xf32>
      %268 = arith.addf %267, %10 : vector<16x128xf32>
      %cst_95 = arith.constant 0.000000e+00 : f32
      %269 = vector.broadcast %cst_95 : f32 to vector<16x128xf32>
      %270 = arith.maximumf %268, %269 : vector<16x128xf32>
      %c176 = arith.constant 176 : index
      %c0_96 = arith.constant 0 : index
      %271 = vector.load %arg10[%c176, %c0_96] : memref<464x128xf32, #tpu.memory_space<vmem>>, vector<16x128xf32>
      tpu.vector_store %arg10[%c176, %c0_96], %270 {strides = array<i32>} : memref<464x128xf32, #tpu.memory_space<vmem>>, vector<16x128xf32>,
      %c24_97 = arith.constant 24 : index
      %c0_98 = arith.constant 0 : index
      %272 = vector.load %arg9[%c24_97, %c0_98] : memref<64x128xf32, #tpu.memory_space<vmem>>, vector<1x128xf32>
      %273 = vector.shape_cast %272 : vector<1x128xf32> to vector<1x128xf32>
      %274 = vector.broadcast %273 : vector<1x128xf32> to vector<16x128xf32>
      %c25 = arith.constant 25 : index
      %c0_99 = arith.constant 0 : index
      %275 = vector.load %arg9[%c25, %c0_99] : memref<64x128xf32, #tpu.memory_space<vmem>>, vector<1x128xf32>
      %276 = vector.shape_cast %275 : vector<1x128xf32> to vector<1x128xf32>
      %277 = vector.broadcast %276 : vector<1x128xf32> to vector<16x128xf32>
      %c26 = arith.constant 26 : index
      %c0_100 = arith.constant 0 : index
      %278 = vector.load %arg9[%c26, %c0_100] : memref<64x128xf32, #tpu.memory_space<vmem>>, vector<1x128xf32>
      %279 = vector.shape_cast %278 : vector<1x128xf32> to vector<1x128xf32>
      %280 = vector.broadcast %279 : vector<1x128xf32> to vector<16x128xf32>
      %281 = arith.mulf %274, %3 : vector<16x128xf32>
      %282 = arith.mulf %277, %7 : vector<16x128xf32>
      %283 = arith.addf %281, %282 : vector<16x128xf32>
      %284 = arith.mulf %277, %3 : vector<16x128xf32>
      %285 = arith.mulf %280, %7 : vector<16x128xf32>
      %286 = arith.addf %284, %285 : vector<16x128xf32>
      %287 = arith.maximumf %283, %286 : vector<16x128xf32>
      %288 = arith.addf %287, %10 : vector<16x128xf32>
      %cst_101 = arith.constant 0.000000e+00 : f32
      %289 = vector.broadcast %cst_101 : f32 to vector<16x128xf32>
      %290 = arith.maximumf %288, %289 : vector<16x128xf32>
      %c192 = arith.constant 192 : index
      %c0_102 = arith.constant 0 : index
      %291 = vector.load %arg10[%c192, %c0_102] : memref<464x128xf32, #tpu.memory_space<vmem>>, vector<16x128xf32>
      tpu.vector_store %arg10[%c192, %c0_102], %290 {strides = array<i32>} : memref<464x128xf32, #tpu.memory_space<vmem>>, vector<16x128xf32>,
      %c26_103 = arith.constant 26 : index
      %c0_104 = arith.constant 0 : index
      %292 = vector.load %arg9[%c26_103, %c0_104] : memref<64x128xf32, #tpu.memory_space<vmem>>, vector<1x128xf32>
      %293 = vector.shape_cast %292 : vector<1x128xf32> to vector<1x128xf32>
      %294 = vector.broadcast %293 : vector<1x128xf32> to vector<16x128xf32>
      %c27 = arith.constant 27 : index
      %c0_105 = arith.constant 0 : index
      %295 = vector.load %arg9[%c27, %c0_105] : memref<64x128xf32, #tpu.memory_space<vmem>>, vector<1x128xf32>
      %296 = vector.shape_cast %295 : vector<1x128xf32> to vector<1x128xf32>
      %297 = vector.broadcast %296 : vector<1x128xf32> to vector<16x128xf32>
      %c28 = arith.constant 28 : index
      %c0_106 = arith.constant 0 : index
      %298 = vector.load %arg9[%c28, %c0_106] : memref<64x128xf32, #tpu.memory_space<vmem>>, vector<1x128xf32>
      %299 = vector.shape_cast %298 : vector<1x128xf32> to vector<1x128xf32>
      %300 = vector.broadcast %299 : vector<1x128xf32> to vector<16x128xf32>
      %301 = arith.mulf %294, %3 : vector<16x128xf32>
      %302 = arith.mulf %297, %7 : vector<16x128xf32>
      %303 = arith.addf %301, %302 : vector<16x128xf32>
      %304 = arith.mulf %297, %3 : vector<16x128xf32>
      %305 = arith.mulf %300, %7 : vector<16x128xf32>
      %306 = arith.addf %304, %305 : vector<16x128xf32>
      %307 = arith.maximumf %303, %306 : vector<16x128xf32>
      %308 = arith.addf %307, %10 : vector<16x128xf32>
      %cst_107 = arith.constant 0.000000e+00 : f32
      %309 = vector.broadcast %cst_107 : f32 to vector<16x128xf32>
      %310 = arith.maximumf %308, %309 : vector<16x128xf32>
      %c208 = arith.constant 208 : index
      %c0_108 = arith.constant 0 : index
      %311 = vector.load %arg10[%c208, %c0_108] : memref<464x128xf32, #tpu.memory_space<vmem>>, vector<16x128xf32>
      tpu.vector_store %arg10[%c208, %c0_108], %310 {strides = array<i32>} : memref<464x128xf32, #tpu.memory_space<vmem>>, vector<16x128xf32>,
      %c28_109 = arith.constant 28 : index
      %c0_110 = arith.constant 0 : index
      %312 = vector.load %arg9[%c28_109, %c0_110] : memref<64x128xf32, #tpu.memory_space<vmem>>, vector<1x128xf32>
      %313 = vector.shape_cast %312 : vector<1x128xf32> to vector<1x128xf32>
      %314 = vector.broadcast %313 : vector<1x128xf32> to vector<16x128xf32>
      %c29 = arith.constant 29 : index
      %c0_111 = arith.constant 0 : index
      %315 = vector.load %arg9[%c29, %c0_111] : memref<64x128xf32, #tpu.memory_space<vmem>>, vector<1x128xf32>
      %316 = vector.shape_cast %315 : vector<1x128xf32> to vector<1x128xf32>
      %317 = vector.broadcast %316 : vector<1x128xf32> to vector<16x128xf32>
      %c30 = arith.constant 30 : index
      %c0_112 = arith.constant 0 : index
      %318 = vector.load %arg9[%c30, %c0_112] : memref<64x128xf32, #tpu.memory_space<vmem>>, vector<1x128xf32>
      %319 = vector.shape_cast %318 : vector<1x128xf32> to vector<1x128xf32>
      %320 = vector.broadcast %319 : vector<1x128xf32> to vector<16x128xf32>
      %321 = arith.mulf %314, %3 : vector<16x128xf32>
      %322 = arith.mulf %317, %7 : vector<16x128xf32>
      %323 = arith.addf %321, %322 : vector<16x128xf32>
      %324 = arith.mulf %317, %3 : vector<16x128xf32>
      %325 = arith.mulf %320, %7 : vector<16x128xf32>
      %326 = arith.addf %324, %325 : vector<16x128xf32>
      %327 = arith.maximumf %323, %326 : vector<16x128xf32>
      %328 = arith.addf %327, %10 : vector<16x128xf32>
      %cst_113 = arith.constant 0.000000e+00 : f32
      %329 = vector.broadcast %cst_113 : f32 to vector<16x128xf32>
      %330 = arith.maximumf %328, %329 : vector<16x128xf32>
      %c224 = arith.constant 224 : index
      %c0_114 = arith.constant 0 : index
      %331 = vector.load %arg10[%c224, %c0_114] : memref<464x128xf32, #tpu.memory_space<vmem>>, vector<16x128xf32>
      tpu.vector_store %arg10[%c224, %c0_114], %330 {strides = array<i32>} : memref<464x128xf32, #tpu.memory_space<vmem>>, vector<16x128xf32>,
      %c30_115 = arith.constant 30 : index
      %c0_116 = arith.constant 0 : index
      %332 = vector.load %arg9[%c30_115, %c0_116] : memref<64x128xf32, #tpu.memory_space<vmem>>, vector<1x128xf32>
      %333 = vector.shape_cast %332 : vector<1x128xf32> to vector<1x128xf32>
      %334 = vector.broadcast %333 : vector<1x128xf32> to vector<16x128xf32>
      %c31 = arith.constant 31 : index
      %c0_117 = arith.constant 0 : index
      %335 = vector.load %arg9[%c31, %c0_117] : memref<64x128xf32, #tpu.memory_space<vmem>>, vector<1x128xf32>
      %336 = vector.shape_cast %335 : vector<1x128xf32> to vector<1x128xf32>
      %337 = vector.broadcast %336 : vector<1x128xf32> to vector<16x128xf32>
      %c32_118 = arith.constant 32 : index
      %c0_119 = arith.constant 0 : index
      %338 = vector.load %arg9[%c32_118, %c0_119] : memref<64x128xf32, #tpu.memory_space<vmem>>, vector<1x128xf32>
      %339 = vector.shape_cast %338 : vector<1x128xf32> to vector<1x128xf32>
      %340 = vector.broadcast %339 : vector<1x128xf32> to vector<16x128xf32>
      %341 = arith.mulf %334, %3 : vector<16x128xf32>
      %342 = arith.mulf %337, %7 : vector<16x128xf32>
      %343 = arith.addf %341, %342 : vector<16x128xf32>
      %344 = arith.mulf %337, %3 : vector<16x128xf32>
      %345 = arith.mulf %340, %7 : vector<16x128xf32>
      %346 = arith.addf %344, %345 : vector<16x128xf32>
      %347 = arith.maximumf %343, %346 : vector<16x128xf32>
      %348 = arith.addf %347, %10 : vector<16x128xf32>
      %cst_120 = arith.constant 0.000000e+00 : f32
      %349 = vector.broadcast %cst_120 : f32 to vector<16x128xf32>
      %350 = arith.maximumf %348, %349 : vector<16x128xf32>
      %c240 = arith.constant 240 : index
      %c0_121 = arith.constant 0 : index
      %351 = vector.load %arg10[%c240, %c0_121] : memref<464x128xf32, #tpu.memory_space<vmem>>, vector<16x128xf32>
      tpu.vector_store %arg10[%c240, %c0_121], %350 {strides = array<i32>} : memref<464x128xf32, #tpu.memory_space<vmem>>, vector<16x128xf32>,
      %c32_122 = arith.constant 32 : index
      %c0_123 = arith.constant 0 : index
      %352 = vector.load %arg9[%c32_122, %c0_123] : memref<64x128xf32, #tpu.memory_space<vmem>>, vector<1x128xf32>
      %353 = vector.shape_cast %352 : vector<1x128xf32> to vector<1x128xf32>
      %354 = vector.broadcast %353 : vector<1x128xf32> to vector<16x128xf32>
      %c33 = arith.constant 33 : index
      %c0_124 = arith.constant 0 : index
      %355 = vector.load %arg9[%c33, %c0_124] : memref<64x128xf32, #tpu.memory_space<vmem>>, vector<1x128xf32>
      %356 = vector.shape_cast %355 : vector<1x128xf32> to vector<1x128xf32>
      %357 = vector.broadcast %356 : vector<1x128xf32> to vector<16x128xf32>
      %c34 = arith.constant 34 : index
      %c0_125 = arith.constant 0 : index
      %358 = vector.load %arg9[%c34, %c0_125] : memref<64x128xf32, #tpu.memory_space<vmem>>, vector<1x128xf32>
      %359 = vector.shape_cast %358 : vector<1x128xf32> to vector<1x128xf32>
      %360 = vector.broadcast %359 : vector<1x128xf32> to vector<16x128xf32>
      %361 = arith.mulf %354, %3 : vector<16x128xf32>
      %362 = arith.mulf %357, %7 : vector<16x128xf32>
      %363 = arith.addf %361, %362 : vector<16x128xf32>
      %364 = arith.mulf %357, %3 : vector<16x128xf32>
      %365 = arith.mulf %360, %7 : vector<16x128xf32>
      %366 = arith.addf %364, %365 : vector<16x128xf32>
      %367 = arith.maximumf %363, %366 : vector<16x128xf32>
      %368 = arith.addf %367, %10 : vector<16x128xf32>
      %cst_126 = arith.constant 0.000000e+00 : f32
      %369 = vector.broadcast %cst_126 : f32 to vector<16x128xf32>
      %370 = arith.maximumf %368, %369 : vector<16x128xf32>
      %c256 = arith.constant 256 : index
      %c0_127 = arith.constant 0 : index
      %371 = vector.load %arg10[%c256, %c0_127] : memref<464x128xf32, #tpu.memory_space<vmem>>, vector<16x128xf32>
      tpu.vector_store %arg10[%c256, %c0_127], %370 {strides = array<i32>} : memref<464x128xf32, #tpu.memory_space<vmem>>, vector<16x128xf32>,
      %c34_128 = arith.constant 34 : index
      %c0_129 = arith.constant 0 : index
      %372 = vector.load %arg9[%c34_128, %c0_129] : memref<64x128xf32, #tpu.memory_space<vmem>>, vector<1x128xf32>
      %373 = vector.shape_cast %372 : vector<1x128xf32> to vector<1x128xf32>
      %374 = vector.broadcast %373 : vector<1x128xf32> to vector<16x128xf32>
      %c35 = arith.constant 35 : index
      %c0_130 = arith.constant 0 : index
      %375 = vector.load %arg9[%c35, %c0_130] : memref<64x128xf32, #tpu.memory_space<vmem>>, vector<1x128xf32>
      %376 = vector.shape_cast %375 : vector<1x128xf32> to vector<1x128xf32>
      %377 = vector.broadcast %376 : vector<1x128xf32> to vector<16x128xf32>
      %c36 = arith.constant 36 : index
      %c0_131 = arith.constant 0 : index
      %378 = vector.load %arg9[%c36, %c0_131] : memref<64x128xf32, #tpu.memory_space<vmem>>, vector<1x128xf32>
      %379 = vector.shape_cast %378 : vector<1x128xf32> to vector<1x128xf32>
      %380 = vector.broadcast %379 : vector<1x128xf32> to vector<16x128xf32>
      %381 = arith.mulf %374, %3 : vector<16x128xf32>
      %382 = arith.mulf %377, %7 : vector<16x128xf32>
      %383 = arith.addf %381, %382 : vector<16x128xf32>
      %384 = arith.mulf %377, %3 : vector<16x128xf32>
      %385 = arith.mulf %380, %7 : vector<16x128xf32>
      %386 = arith.addf %384, %385 : vector<16x128xf32>
      %387 = arith.maximumf %383, %386 : vector<16x128xf32>
      %388 = arith.addf %387, %10 : vector<16x128xf32>
      %cst_132 = arith.constant 0.000000e+00 : f32
      %389 = vector.broadcast %cst_132 : f32 to vector<16x128xf32>
      %390 = arith.maximumf %388, %389 : vector<16x128xf32>
      %c272 = arith.constant 272 : index
      %c0_133 = arith.constant 0 : index
      %391 = vector.load %arg10[%c272, %c0_133] : memref<464x128xf32, #tpu.memory_space<vmem>>, vector<16x128xf32>
      tpu.vector_store %arg10[%c272, %c0_133], %390 {strides = array<i32>} : memref<464x128xf32, #tpu.memory_space<vmem>>, vector<16x128xf32>,
      %c36_134 = arith.constant 36 : index
      %c0_135 = arith.constant 0 : index
      %392 = vector.load %arg9[%c36_134, %c0_135] : memref<64x128xf32, #tpu.memory_space<vmem>>, vector<1x128xf32>
      %393 = vector.shape_cast %392 : vector<1x128xf32> to vector<1x128xf32>
      %394 = vector.broadcast %393 : vector<1x128xf32> to vector<16x128xf32>
      %c37 = arith.constant 37 : index
      %c0_136 = arith.constant 0 : index
      %395 = vector.load %arg9[%c37, %c0_136] : memref<64x128xf32, #tpu.memory_space<vmem>>, vector<1x128xf32>
      %396 = vector.shape_cast %395 : vector<1x128xf32> to vector<1x128xf32>
      %397 = vector.broadcast %396 : vector<1x128xf32> to vector<16x128xf32>
      %c38 = arith.constant 38 : index
      %c0_137 = arith.constant 0 : index
      %398 = vector.load %arg9[%c38, %c0_137] : memref<64x128xf32, #tpu.memory_space<vmem>>, vector<1x128xf32>
      %399 = vector.shape_cast %398 : vector<1x128xf32> to vector<1x128xf32>
      %400 = vector.broadcast %399 : vector<1x128xf32> to vector<16x128xf32>
      %401 = arith.mulf %394, %3 : vector<16x128xf32>
      %402 = arith.mulf %397, %7 : vector<16x128xf32>
      %403 = arith.addf %401, %402 : vector<16x128xf32>
      %404 = arith.mulf %397, %3 : vector<16x128xf32>
      %405 = arith.mulf %400, %7 : vector<16x128xf32>
      %406 = arith.addf %404, %405 : vector<16x128xf32>
      %407 = arith.maximumf %403, %406 : vector<16x128xf32>
      %408 = arith.addf %407, %10 : vector<16x128xf32>
      %cst_138 = arith.constant 0.000000e+00 : f32
      %409 = vector.broadcast %cst_138 : f32 to vector<16x128xf32>
      %410 = arith.maximumf %408, %409 : vector<16x128xf32>
      %c288 = arith.constant 288 : index
      %c0_139 = arith.constant 0 : index
      %411 = vector.load %arg10[%c288, %c0_139] : memref<464x128xf32, #tpu.memory_space<vmem>>, vector<16x128xf32>
      tpu.vector_store %arg10[%c288, %c0_139], %410 {strides = array<i32>} : memref<464x128xf32, #tpu.memory_space<vmem>>, vector<16x128xf32>,
      %c38_140 = arith.constant 38 : index
      %c0_141 = arith.constant 0 : index
      %412 = vector.load %arg9[%c38_140, %c0_141] : memref<64x128xf32, #tpu.memory_space<vmem>>, vector<1x128xf32>
      %413 = vector.shape_cast %412 : vector<1x128xf32> to vector<1x128xf32>
      %414 = vector.broadcast %413 : vector<1x128xf32> to vector<16x128xf32>
      %c39 = arith.constant 39 : index
      %c0_142 = arith.constant 0 : index
      %415 = vector.load %arg9[%c39, %c0_142] : memref<64x128xf32, #tpu.memory_space<vmem>>, vector<1x128xf32>
      %416 = vector.shape_cast %415 : vector<1x128xf32> to vector<1x128xf32>
      %417 = vector.broadcast %416 : vector<1x128xf32> to vector<16x128xf32>
      %c40 = arith.constant 40 : index
      %c0_143 = arith.constant 0 : index
      %418 = vector.load %arg9[%c40, %c0_143] : memref<64x128xf32, #tpu.memory_space<vmem>>, vector<1x128xf32>
      %419 = vector.shape_cast %418 : vector<1x128xf32> to vector<1x128xf32>
      %420 = vector.broadcast %419 : vector<1x128xf32> to vector<16x128xf32>
      %421 = arith.mulf %414, %3 : vector<16x128xf32>
      %422 = arith.mulf %417, %7 : vector<16x128xf32>
      %423 = arith.addf %421, %422 : vector<16x128xf32>
      %424 = arith.mulf %417, %3 : vector<16x128xf32>
      %425 = arith.mulf %420, %7 : vector<16x128xf32>
      %426 = arith.addf %424, %425 : vector<16x128xf32>
      %427 = arith.maximumf %423, %426 : vector<16x128xf32>
      %428 = arith.addf %427, %10 : vector<16x128xf32>
      %cst_144 = arith.constant 0.000000e+00 : f32
      %429 = vector.broadcast %cst_144 : f32 to vector<16x128xf32>
      %430 = arith.maximumf %428, %429 : vector<16x128xf32>
      %c304 = arith.constant 304 : index
      %c0_145 = arith.constant 0 : index
      %431 = vector.load %arg10[%c304, %c0_145] : memref<464x128xf32, #tpu.memory_space<vmem>>, vector<16x128xf32>
      tpu.vector_store %arg10[%c304, %c0_145], %430 {strides = array<i32>} : memref<464x128xf32, #tpu.memory_space<vmem>>, vector<16x128xf32>,
      %c40_146 = arith.constant 40 : index
      %c0_147 = arith.constant 0 : index
      %432 = vector.load %arg9[%c40_146, %c0_147] : memref<64x128xf32, #tpu.memory_space<vmem>>, vector<1x128xf32>
      %433 = vector.shape_cast %432 : vector<1x128xf32> to vector<1x128xf32>
      %434 = vector.broadcast %433 : vector<1x128xf32> to vector<16x128xf32>
      %c41 = arith.constant 41 : index
      %c0_148 = arith.constant 0 : index
      %435 = vector.load %arg9[%c41, %c0_148] : memref<64x128xf32, #tpu.memory_space<vmem>>, vector<1x128xf32>
      %436 = vector.shape_cast %435 : vector<1x128xf32> to vector<1x128xf32>
      %437 = vector.broadcast %436 : vector<1x128xf32> to vector<16x128xf32>
      %c42 = arith.constant 42 : index
      %c0_149 = arith.constant 0 : index
      %438 = vector.load %arg9[%c42, %c0_149] : memref<64x128xf32, #tpu.memory_space<vmem>>, vector<1x128xf32>
      %439 = vector.shape_cast %438 : vector<1x128xf32> to vector<1x128xf32>
      %440 = vector.broadcast %439 : vector<1x128xf32> to vector<16x128xf32>
      %441 = arith.mulf %434, %3 : vector<16x128xf32>
      %442 = arith.mulf %437, %7 : vector<16x128xf32>
      %443 = arith.addf %441, %442 : vector<16x128xf32>
      %444 = arith.mulf %437, %3 : vector<16x128xf32>
      %445 = arith.mulf %440, %7 : vector<16x128xf32>
      %446 = arith.addf %444, %445 : vector<16x128xf32>
      %447 = arith.maximumf %443, %446 : vector<16x128xf32>
      %448 = arith.addf %447, %10 : vector<16x128xf32>
      %cst_150 = arith.constant 0.000000e+00 : f32
      %449 = vector.broadcast %cst_150 : f32 to vector<16x128xf32>
      %450 = arith.maximumf %448, %449 : vector<16x128xf32>
      %c320 = arith.constant 320 : index
      %c0_151 = arith.constant 0 : index
      %451 = vector.load %arg10[%c320, %c0_151] : memref<464x128xf32, #tpu.memory_space<vmem>>, vector<16x128xf32>
      tpu.vector_store %arg10[%c320, %c0_151], %450 {strides = array<i32>} : memref<464x128xf32, #tpu.memory_space<vmem>>, vector<16x128xf32>,
      %c42_152 = arith.constant 42 : index
      %c0_153 = arith.constant 0 : index
      %452 = vector.load %arg9[%c42_152, %c0_153] : memref<64x128xf32, #tpu.memory_space<vmem>>, vector<1x128xf32>
      %453 = vector.shape_cast %452 : vector<1x128xf32> to vector<1x128xf32>
      %454 = vector.broadcast %453 : vector<1x128xf32> to vector<16x128xf32>
      %c43 = arith.constant 43 : index
      %c0_154 = arith.constant 0 : index
      %455 = vector.load %arg9[%c43, %c0_154] : memref<64x128xf32, #tpu.memory_space<vmem>>, vector<1x128xf32>
      %456 = vector.shape_cast %455 : vector<1x128xf32> to vector<1x128xf32>
      %457 = vector.broadcast %456 : vector<1x128xf32> to vector<16x128xf32>
      %c44 = arith.constant 44 : index
      %c0_155 = arith.constant 0 : index
      %458 = vector.load %arg9[%c44, %c0_155] : memref<64x128xf32, #tpu.memory_space<vmem>>, vector<1x128xf32>
      %459 = vector.shape_cast %458 : vector<1x128xf32> to vector<1x128xf32>
      %460 = vector.broadcast %459 : vector<1x128xf32> to vector<16x128xf32>
      %461 = arith.mulf %454, %3 : vector<16x128xf32>
      %462 = arith.mulf %457, %7 : vector<16x128xf32>
      %463 = arith.addf %461, %462 : vector<16x128xf32>
      %464 = arith.mulf %457, %3 : vector<16x128xf32>
      %465 = arith.mulf %460, %7 : vector<16x128xf32>
      %466 = arith.addf %464, %465 : vector<16x128xf32>
      %467 = arith.maximumf %463, %466 : vector<16x128xf32>
      %468 = arith.addf %467, %10 : vector<16x128xf32>
      %cst_156 = arith.constant 0.000000e+00 : f32
      %469 = vector.broadcast %cst_156 : f32 to vector<16x128xf32>
      %470 = arith.maximumf %468, %469 : vector<16x128xf32>
      %c336 = arith.constant 336 : index
      %c0_157 = arith.constant 0 : index
      %471 = vector.load %arg10[%c336, %c0_157] : memref<464x128xf32, #tpu.memory_space<vmem>>, vector<16x128xf32>
      tpu.vector_store %arg10[%c336, %c0_157], %470 {strides = array<i32>} : memref<464x128xf32, #tpu.memory_space<vmem>>, vector<16x128xf32>,
      %c44_158 = arith.constant 44 : index
      %c0_159 = arith.constant 0 : index
      %472 = vector.load %arg9[%c44_158, %c0_159] : memref<64x128xf32, #tpu.memory_space<vmem>>, vector<1x128xf32>
      %473 = vector.shape_cast %472 : vector<1x128xf32> to vector<1x128xf32>
      %474 = vector.broadcast %473 : vector<1x128xf32> to vector<16x128xf32>
      %c45 = arith.constant 45 : index
      %c0_160 = arith.constant 0 : index
      %475 = vector.load %arg9[%c45, %c0_160] : memref<64x128xf32, #tpu.memory_space<vmem>>, vector<1x128xf32>
      %476 = vector.shape_cast %475 : vector<1x128xf32> to vector<1x128xf32>
      %477 = vector.broadcast %476 : vector<1x128xf32> to vector<16x128xf32>
      %c46 = arith.constant 46 : index
      %c0_161 = arith.constant 0 : index
      %478 = vector.load %arg9[%c46, %c0_161] : memref<64x128xf32, #tpu.memory_space<vmem>>, vector<1x128xf32>
      %479 = vector.shape_cast %478 : vector<1x128xf32> to vector<1x128xf32>
      %480 = vector.broadcast %479 : vector<1x128xf32> to vector<16x128xf32>
      %481 = arith.mulf %474, %3 : vector<16x128xf32>
      %482 = arith.mulf %477, %7 : vector<16x128xf32>
      %483 = arith.addf %481, %482 : vector<16x128xf32>
      %484 = arith.mulf %477, %3 : vector<16x128xf32>
      %485 = arith.mulf %480, %7 : vector<16x128xf32>
      %486 = arith.addf %484, %485 : vector<16x128xf32>
      %487 = arith.maximumf %483, %486 : vector<16x128xf32>
      %488 = arith.addf %487, %10 : vector<16x128xf32>
      %cst_162 = arith.constant 0.000000e+00 : f32
      %489 = vector.broadcast %cst_162 : f32 to vector<16x128xf32>
      %490 = arith.maximumf %488, %489 : vector<16x128xf32>
      %c352 = arith.constant 352 : index
      %c0_163 = arith.constant 0 : index
      %491 = vector.load %arg10[%c352, %c0_163] : memref<464x128xf32, #tpu.memory_space<vmem>>, vector<16x128xf32>
      tpu.vector_store %arg10[%c352, %c0_163], %490 {strides = array<i32>} : memref<464x128xf32, #tpu.memory_space<vmem>>, vector<16x128xf32>,
      %c46_164 = arith.constant 46 : index
      %c0_165 = arith.constant 0 : index
      %492 = vector.load %arg9[%c46_164, %c0_165] : memref<64x128xf32, #tpu.memory_space<vmem>>, vector<1x128xf32>
      %493 = vector.shape_cast %492 : vector<1x128xf32> to vector<1x128xf32>
      %494 = vector.broadcast %493 : vector<1x128xf32> to vector<16x128xf32>
      %c47 = arith.constant 47 : index
      %c0_166 = arith.constant 0 : index
      %495 = vector.load %arg9[%c47, %c0_166] : memref<64x128xf32, #tpu.memory_space<vmem>>, vector<1x128xf32>
      %496 = vector.shape_cast %495 : vector<1x128xf32> to vector<1x128xf32>
      %497 = vector.broadcast %496 : vector<1x128xf32> to vector<16x128xf32>
      %c48_167 = arith.constant 48 : index
      %c0_168 = arith.constant 0 : index
      %498 = vector.load %arg9[%c48_167, %c0_168] : memref<64x128xf32, #tpu.memory_space<vmem>>, vector<1x128xf32>
      %499 = vector.shape_cast %498 : vector<1x128xf32> to vector<1x128xf32>
      %500 = vector.broadcast %499 : vector<1x128xf32> to vector<16x128xf32>
      %501 = arith.mulf %494, %3 : vector<16x128xf32>
      %502 = arith.mulf %497, %7 : vector<16x128xf32>
      %503 = arith.addf %501, %502 : vector<16x128xf32>
      %504 = arith.mulf %497, %3 : vector<16x128xf32>
      %505 = arith.mulf %500, %7 : vector<16x128xf32>
      %506 = arith.addf %504, %505 : vector<16x128xf32>
      %507 = arith.maximumf %503, %506 : vector<16x128xf32>
      %508 = arith.addf %507, %10 : vector<16x128xf32>
      %cst_169 = arith.constant 0.000000e+00 : f32
      %509 = vector.broadcast %cst_169 : f32 to vector<16x128xf32>
      %510 = arith.maximumf %508, %509 : vector<16x128xf32>
      %c368 = arith.constant 368 : index
      %c0_170 = arith.constant 0 : index
      %511 = vector.load %arg10[%c368, %c0_170] : memref<464x128xf32, #tpu.memory_space<vmem>>, vector<16x128xf32>
      tpu.vector_store %arg10[%c368, %c0_170], %510 {strides = array<i32>} : memref<464x128xf32, #tpu.memory_space<vmem>>, vector<16x128xf32>,
      %c48_171 = arith.constant 48 : index
      %c0_172 = arith.constant 0 : index
      %512 = vector.load %arg9[%c48_171, %c0_172] : memref<64x128xf32, #tpu.memory_space<vmem>>, vector<1x128xf32>
      %513 = vector.shape_cast %512 : vector<1x128xf32> to vector<1x128xf32>
      %514 = vector.broadcast %513 : vector<1x128xf32> to vector<16x128xf32>
      %c49 = arith.constant 49 : index
      %c0_173 = arith.constant 0 : index
      %515 = vector.load %arg9[%c49, %c0_173] : memref<64x128xf32, #tpu.memory_space<vmem>>, vector<1x128xf32>
      %516 = vector.shape_cast %515 : vector<1x128xf32> to vector<1x128xf32>
      %517 = vector.broadcast %516 : vector<1x128xf32> to vector<16x128xf32>
      %c50 = arith.constant 50 : index
      %c0_174 = arith.constant 0 : index
      %518 = vector.load %arg9[%c50, %c0_174] : memref<64x128xf32, #tpu.memory_space<vmem>>, vector<1x128xf32>
      %519 = vector.shape_cast %518 : vector<1x128xf32> to vector<1x128xf32>
      %520 = vector.broadcast %519 : vector<1x128xf32> to vector<16x128xf32>
      %521 = arith.mulf %514, %3 : vector<16x128xf32>
      %522 = arith.mulf %517, %7 : vector<16x128xf32>
      %523 = arith.addf %521, %522 : vector<16x128xf32>
      %524 = arith.mulf %517, %3 : vector<16x128xf32>
      %525 = arith.mulf %520, %7 : vector<16x128xf32>
      %526 = arith.addf %524, %525 : vector<16x128xf32>
      %527 = arith.maximumf %523, %526 : vector<16x128xf32>
      %528 = arith.addf %527, %10 : vector<16x128xf32>
      %cst_175 = arith.constant 0.000000e+00 : f32
      %529 = vector.broadcast %cst_175 : f32 to vector<16x128xf32>
      %530 = arith.maximumf %528, %529 : vector<16x128xf32>
      %c384 = arith.constant 384 : index
      %c0_176 = arith.constant 0 : index
      %531 = vector.load %arg10[%c384, %c0_176] : memref<464x128xf32, #tpu.memory_space<vmem>>, vector<16x128xf32>
      tpu.vector_store %arg10[%c384, %c0_176], %530 {strides = array<i32>} : memref<464x128xf32, #tpu.memory_space<vmem>>, vector<16x128xf32>,
      %c50_177 = arith.constant 50 : index
      %c0_178 = arith.constant 0 : index
      %532 = vector.load %arg9[%c50_177, %c0_178] : memref<64x128xf32, #tpu.memory_space<vmem>>, vector<1x128xf32>
      %533 = vector.shape_cast %532 : vector<1x128xf32> to vector<1x128xf32>
      %534 = vector.broadcast %533 : vector<1x128xf32> to vector<16x128xf32>
      %c51 = arith.constant 51 : index
      %c0_179 = arith.constant 0 : index
      %535 = vector.load %arg9[%c51, %c0_179] : memref<64x128xf32, #tpu.memory_space<vmem>>, vector<1x128xf32>
      %536 = vector.shape_cast %535 : vector<1x128xf32> to vector<1x128xf32>
      %537 = vector.broadcast %536 : vector<1x128xf32> to vector<16x128xf32>
      %c52 = arith.constant 52 : index
      %c0_180 = arith.constant 0 : index
      %538 = vector.load %arg9[%c52, %c0_180] : memref<64x128xf32, #tpu.memory_space<vmem>>, vector<1x128xf32>
      %539 = vector.shape_cast %538 : vector<1x128xf32> to vector<1x128xf32>
      %540 = vector.broadcast %539 : vector<1x128xf32> to vector<16x128xf32>
      %541 = arith.mulf %534, %3 : vector<16x128xf32>
      %542 = arith.mulf %537, %7 : vector<16x128xf32>
      %543 = arith.addf %541, %542 : vector<16x128xf32>
      %544 = arith.mulf %537, %3 : vector<16x128xf32>
      %545 = arith.mulf %540, %7 : vector<16x128xf32>
      %546 = arith.addf %544, %545 : vector<16x128xf32>
      %547 = arith.maximumf %543, %546 : vector<16x128xf32>
      %548 = arith.addf %547, %10 : vector<16x128xf32>
      %cst_181 = arith.constant 0.000000e+00 : f32
      %549 = vector.broadcast %cst_181 : f32 to vector<16x128xf32>
      %550 = arith.maximumf %548, %549 : vector<16x128xf32>
      %c400 = arith.constant 400 : index
      %c0_182 = arith.constant 0 : index
      %551 = vector.load %arg10[%c400, %c0_182] : memref<464x128xf32, #tpu.memory_space<vmem>>, vector<16x128xf32>
      tpu.vector_store %arg10[%c400, %c0_182], %550 {strides = array<i32>} : memref<464x128xf32, #tpu.memory_space<vmem>>, vector<16x128xf32>,
      %c52_183 = arith.constant 52 : index
      %c0_184 = arith.constant 0 : index
      %552 = vector.load %arg9[%c52_183, %c0_184] : memref<64x128xf32, #tpu.memory_space<vmem>>, vector<1x128xf32>
      %553 = vector.shape_cast %552 : vector<1x128xf32> to vector<1x128xf32>
      %554 = vector.broadcast %553 : vector<1x128xf32> to vector<16x128xf32>
      %c53 = arith.constant 53 : index
      %c0_185 = arith.constant 0 : index
      %555 = vector.load %arg9[%c53, %c0_185] : memref<64x128xf32, #tpu.memory_space<vmem>>, vector<1x128xf32>
      %556 = vector.shape_cast %555 : vector<1x128xf32> to vector<1x128xf32>
      %557 = vector.broadcast %556 : vector<1x128xf32> to vector<16x128xf32>
      %c54 = arith.constant 54 : index
      %c0_186 = arith.constant 0 : index
      %558 = vector.load %arg9[%c54, %c0_186] : memref<64x128xf32, #tpu.memory_space<vmem>>, vector<1x128xf32>
      %559 = vector.shape_cast %558 : vector<1x128xf32> to vector<1x128xf32>
      %560 = vector.broadcast %559 : vector<1x128xf32> to vector<16x128xf32>
      %561 = arith.mulf %554, %3 : vector<16x128xf32>
      %562 = arith.mulf %557, %7 : vector<16x128xf32>
      %563 = arith.addf %561, %562 : vector<16x128xf32>
      %564 = arith.mulf %557, %3 : vector<16x128xf32>
      %565 = arith.mulf %560, %7 : vector<16x128xf32>
      %566 = arith.addf %564, %565 : vector<16x128xf32>
      %567 = arith.maximumf %563, %566 : vector<16x128xf32>
      %568 = arith.addf %567, %10 : vector<16x128xf32>
      %cst_187 = arith.constant 0.000000e+00 : f32
      %569 = vector.broadcast %cst_187 : f32 to vector<16x128xf32>
      %570 = arith.maximumf %568, %569 : vector<16x128xf32>
      %c416 = arith.constant 416 : index
      %c0_188 = arith.constant 0 : index
      %571 = vector.load %arg10[%c416, %c0_188] : memref<464x128xf32, #tpu.memory_space<vmem>>, vector<16x128xf32>
      tpu.vector_store %arg10[%c416, %c0_188], %570 {strides = array<i32>} : memref<464x128xf32, #tpu.memory_space<vmem>>, vector<16x128xf32>,
      %c54_189 = arith.constant 54 : index
      %c0_190 = arith.constant 0 : index
      %572 = vector.load %arg9[%c54_189, %c0_190] : memref<64x128xf32, #tpu.memory_space<vmem>>, vector<1x128xf32>
      %573 = vector.shape_cast %572 : vector<1x128xf32> to vector<1x128xf32>
      %574 = vector.broadcast %573 : vector<1x128xf32> to vector<16x128xf32>
      %c55 = arith.constant 55 : index
      %c0_191 = arith.constant 0 : index
      %575 = vector.load %arg9[%c55, %c0_191] : memref<64x128xf32, #tpu.memory_space<vmem>>, vector<1x128xf32>
      %576 = vector.shape_cast %575 : vector<1x128xf32> to vector<1x128xf32>
      %577 = vector.broadcast %576 : vector<1x128xf32> to vector<16x128xf32>
      %c56 = arith.constant 56 : index
      %c0_192 = arith.constant 0 : index
      %578 = vector.load %arg9[%c56, %c0_192] : memref<64x128xf32, #tpu.memory_space<vmem>>, vector<1x128xf32>
      %579 = vector.shape_cast %578 : vector<1x128xf32> to vector<1x128xf32>
      %580 = vector.broadcast %579 : vector<1x128xf32> to vector<16x128xf32>
      %581 = arith.mulf %574, %3 : vector<16x128xf32>
      %582 = arith.mulf %577, %7 : vector<16x128xf32>
      %583 = arith.addf %581, %582 : vector<16x128xf32>
      %584 = arith.mulf %577, %3 : vector<16x128xf32>
      %585 = arith.mulf %580, %7 : vector<16x128xf32>
      %586 = arith.addf %584, %585 : vector<16x128xf32>
      %587 = arith.maximumf %583, %586 : vector<16x128xf32>
      %588 = arith.addf %587, %10 : vector<16x128xf32>
      %cst_193 = arith.constant 0.000000e+00 : f32
      %589 = vector.broadcast %cst_193 : f32 to vector<16x128xf32>
      %590 = arith.maximumf %588, %589 : vector<16x128xf32>
      %c432 = arith.constant 432 : index
      %c0_194 = arith.constant 0 : index
      %591 = vector.load %arg10[%c432, %c0_194] : memref<464x128xf32, #tpu.memory_space<vmem>>, vector<16x128xf32>
      tpu.vector_store %arg10[%c432, %c0_194], %590 {strides = array<i32>} : memref<464x128xf32, #tpu.memory_space<vmem>>, vector<16x128xf32>,
      %c56_195 = arith.constant 56 : index
      %c0_196 = arith.constant 0 : index
      %592 = vector.load %arg9[%c56_195, %c0_196] : memref<64x128xf32, #tpu.memory_space<vmem>>, vector<1x128xf32>
      %593 = vector.shape_cast %592 : vector<1x128xf32> to vector<1x128xf32>
      %594 = vector.broadcast %593 : vector<1x128xf32> to vector<16x128xf32>
      %c57 = arith.constant 57 : index
      %c0_197 = arith.constant 0 : index
      %595 = vector.load %arg9[%c57, %c0_197] : memref<64x128xf32, #tpu.memory_space<vmem>>, vector<1x128xf32>
      %596 = vector.shape_cast %595 : vector<1x128xf32> to vector<1x128xf32>
      %597 = vector.broadcast %596 : vector<1x128xf32> to vector<16x128xf32>
      %c58 = arith.constant 58 : index
      %c0_198 = arith.constant 0 : index
      %598 = vector.load %arg9[%c58, %c0_198] : memref<64x128xf32, #tpu.memory_space<vmem>>, vector<1x128xf32>
      %599 = vector.shape_cast %598 : vector<1x128xf32> to vector<1x128xf32>
      %600 = vector.broadcast %599 : vector<1x128xf32> to vector<16x128xf32>
      %601 = arith.mulf %594, %3 : vector<16x128xf32>
      %602 = arith.mulf %597, %7 : vector<16x128xf32>
      %603 = arith.addf %601, %602 : vector<16x128xf32>
      %604 = arith.mulf %597, %3 : vector<16x128xf32>
      %605 = arith.mulf %600, %7 : vector<16x128xf32>
      %606 = arith.addf %604, %605 : vector<16x128xf32>
      %607 = arith.maximumf %603, %606 : vector<16x128xf32>
      %608 = arith.addf %607, %10 : vector<16x128xf32>
      %cst_199 = arith.constant 0.000000e+00 : f32
      %609 = vector.broadcast %cst_199 : f32 to vector<16x128xf32>
      %610 = arith.maximumf %608, %609 : vector<16x128xf32>
      %c448 = arith.constant 448 : index
      %c0_200 = arith.constant 0 : index
      %611 = vector.load %arg10[%c448, %c0_200] : memref<464x128xf32, #tpu.memory_space<vmem>>, vector<16x128xf32>
      tpu.vector_store %arg10[%c448, %c0_200], %610 {strides = array<i32>} : memref<464x128xf32, #tpu.memory_space<vmem>>, vector<16x128xf32>,
      %c0_201 = arith.constant 0 : index
      %c0_202 = arith.constant 0 : index
      %612 = vector.load %arg10[%c0_201, %c0_202] : memref<464x128xf32, #tpu.memory_space<vmem>>, vector<32x128xf32>
      %cst_203 = arith.constant dense<0.000000e+00> : vector<32x128xf32>
      %613 = tpu.matmul %17, %612, %cst_203 {dimension_numbers = #tpu.dot_dimension_numbers<[1], [0], [0], [1], [0, 0, 1, 1], [], []>} : vector<32x32xf32>, vector<32x128xf32>, vector<32x128xf32> -> vector<32x128xf32>
      %c16_204 = arith.constant 16 : index
      %c0_205 = arith.constant 0 : index
      %614 = vector.load %arg10[%c16_204, %c0_205] : memref<464x128xf32, #tpu.memory_space<vmem>>, vector<32x128xf32>
      %cst_206 = arith.constant dense<0.000000e+00> : vector<32x128xf32>
      %615 = tpu.matmul %17, %614, %cst_206 {dimension_numbers = #tpu.dot_dimension_numbers<[1], [0], [0], [1], [0, 0, 1, 1], [], []>} : vector<32x32xf32>, vector<32x128xf32>, vector<32x128xf32> -> vector<32x128xf32>
      %616 = arith.maximumf %613, %615 : vector<32x128xf32>
      %c32_207 = arith.constant 32 : index
      %c0_208 = arith.constant 0 : index
      %617 = vector.load %arg10[%c32_207, %c0_208] : memref<464x128xf32, #tpu.memory_space<vmem>>, vector<32x128xf32>
      %cst_209 = arith.constant dense<0.000000e+00> : vector<32x128xf32>
      %618 = tpu.matmul %17, %617, %cst_209 {dimension_numbers = #tpu.dot_dimension_numbers<[1], [0], [0], [1], [0, 0, 1, 1], [], []>} : vector<32x32xf32>, vector<32x128xf32>, vector<32x128xf32> -> vector<32x128xf32>
      %619 = arith.maximumf %616, %618 : vector<32x128xf32>
      %c48_210 = arith.constant 48 : index
      %c0_211 = arith.constant 0 : index
      %620 = vector.load %arg10[%c48_210, %c0_211] : memref<464x128xf32, #tpu.memory_space<vmem>>, vector<32x128xf32>
      %cst_212 = arith.constant dense<0.000000e+00> : vector<32x128xf32>
      %621 = tpu.matmul %17, %620, %cst_212 {dimension_numbers = #tpu.dot_dimension_numbers<[1], [0], [0], [1], [0, 0, 1, 1], [], []>} : vector<32x32xf32>, vector<32x128xf32>, vector<32x128xf32> -> vector<32x128xf32>
      %622 = arith.maximumf %619, %621 : vector<32x128xf32>
      %623 = arith.addf %622, %13 : vector<32x128xf32>
      %cst_213 = arith.constant 0.000000e+00 : f32
      %624 = vector.broadcast %cst_213 : f32 to vector<32x128xf32>
      %625 = arith.maximumf %623, %624 : vector<32x128xf32>
      %c0_214 = arith.constant 0 : index
      %c0_215 = arith.constant 0 : index
      %c0_216 = arith.constant 0 : index
      %626 = vector.load %arg6[%c0_214, %c0_215, %c0_216] : memref<7x8x32xf32, #tpu.memory_space<vmem>>, vector<1x8x32xf32>
      %627 = vector.shape_cast %626 : vector<1x8x32xf32> to vector<8x32xf32>
      %cst_217 = arith.constant dense<0.000000e+00> : vector<8x128xf32>
      %628 = tpu.matmul %627, %625, %cst_217 {dimension_numbers = #tpu.dot_dimension_numbers<[1], [0], [0], [1], [0, 0, 1, 1], [], []>} : vector<8x32xf32>, vector<32x128xf32>, vector<8x128xf32> -> vector<8x128xf32>
      %629 = arith.addf %16, %628 : vector<8x128xf32>
      %c64_218 = arith.constant 64 : index
      %c0_219 = arith.constant 0 : index
      %630 = vector.load %arg10[%c64_218, %c0_219] : memref<464x128xf32, #tpu.memory_space<vmem>>, vector<32x128xf32>
      %cst_220 = arith.constant dense<0.000000e+00> : vector<32x128xf32>
      %631 = tpu.matmul %17, %630, %cst_220 {dimension_numbers = #tpu.dot_dimension_numbers<[1], [0], [0], [1], [0, 0, 1, 1], [], []>} : vector<32x32xf32>, vector<32x128xf32>, vector<32x128xf32> -> vector<32x128xf32>
      %c80_221 = arith.constant 80 : index
      %c0_222 = arith.constant 0 : index
      %632 = vector.load %arg10[%c80_221, %c0_222] : memref<464x128xf32, #tpu.memory_space<vmem>>, vector<32x128xf32>
      %cst_223 = arith.constant dense<0.000000e+00> : vector<32x128xf32>
      %633 = tpu.matmul %17, %632, %cst_223 {dimension_numbers = #tpu.dot_dimension_numbers<[1], [0], [0], [1], [0, 0, 1, 1], [], []>} : vector<32x32xf32>, vector<32x128xf32>, vector<32x128xf32> -> vector<32x128xf32>
      %634 = arith.maximumf %631, %633 : vector<32x128xf32>
      %c96_224 = arith.constant 96 : index
      %c0_225 = arith.constant 0 : index
      %635 = vector.load %arg10[%c96_224, %c0_225] : memref<464x128xf32, #tpu.memory_space<vmem>>, vector<32x128xf32>
      %cst_226 = arith.constant dense<0.000000e+00> : vector<32x128xf32>
      %636 = tpu.matmul %17, %635, %cst_226 {dimension_numbers = #tpu.dot_dimension_numbers<[1], [0], [0], [1], [0, 0, 1, 1], [], []>} : vector<32x32xf32>, vector<32x128xf32>, vector<32x128xf32> -> vector<32x128xf32>
      %637 = arith.maximumf %634, %636 : vector<32x128xf32>
      %c112_227 = arith.constant 112 : index
      %c0_228 = arith.constant 0 : index
      %638 = vector.load %arg10[%c112_227, %c0_228] : memref<464x128xf32, #tpu.memory_space<vmem>>, vector<32x128xf32>
      %cst_229 = arith.constant dense<0.000000e+00> : vector<32x128xf32>
      %639 = tpu.matmul %17, %638, %cst_229 {dimension_numbers = #tpu.dot_dimension_numbers<[1], [0], [0], [1], [0, 0, 1, 1], [], []>} : vector<32x32xf32>, vector<32x128xf32>, vector<32x128xf32> -> vector<32x128xf32>
      %640 = arith.maximumf %637, %639 : vector<32x128xf32>
      %641 = arith.addf %640, %13 : vector<32x128xf32>
      %cst_230 = arith.constant 0.000000e+00 : f32
      %642 = vector.broadcast %cst_230 : f32 to vector<32x128xf32>
      %643 = arith.maximumf %641, %642 : vector<32x128xf32>
      %c1_231 = arith.constant 1 : index
      %c0_232 = arith.constant 0 : index
      %c0_233 = arith.constant 0 : index
      %644 = vector.load %arg6[%c1_231, %c0_232, %c0_233] : memref<7x8x32xf32, #tpu.memory_space<vmem>>, vector<1x8x32xf32>
      %645 = vector.shape_cast %644 : vector<1x8x32xf32> to vector<8x32xf32>
      %cst_234 = arith.constant dense<0.000000e+00> : vector<8x128xf32>
      %646 = tpu.matmul %645, %643, %cst_234 {dimension_numbers = #tpu.dot_dimension_numbers<[1], [0], [0], [1], [0, 0, 1, 1], [], []>} : vector<8x32xf32>, vector<32x128xf32>, vector<8x128xf32> -> vector<8x128xf32>
      %647 = arith.addf %629, %646 : vector<8x128xf32>
      %c128_235 = arith.constant 128 : index
      %c0_236 = arith.constant 0 : index
      %648 = vector.load %arg10[%c128_235, %c0_236] : memref<464x128xf32, #tpu.memory_space<vmem>>, vector<32x128xf32>
      %cst_237 = arith.constant dense<0.000000e+00> : vector<32x128xf32>
      %649 = tpu.matmul %17, %648, %cst_237 {dimension_numbers = #tpu.dot_dimension_numbers<[1], [0], [0], [1], [0, 0, 1, 1], [], []>} : vector<32x32xf32>, vector<32x128xf32>, vector<32x128xf32> -> vector<32x128xf32>
      %c144_238 = arith.constant 144 : index
      %c0_239 = arith.constant 0 : index
      %650 = vector.load %arg10[%c144_238, %c0_239] : memref<464x128xf32, #tpu.memory_space<vmem>>, vector<32x128xf32>
      %cst_240 = arith.constant dense<0.000000e+00> : vector<32x128xf32>
      %651 = tpu.matmul %17, %650, %cst_240 {dimension_numbers = #tpu.dot_dimension_numbers<[1], [0], [0], [1], [0, 0, 1, 1], [], []>} : vector<32x32xf32>, vector<32x128xf32>, vector<32x128xf32> -> vector<32x128xf32>
      %652 = arith.maximumf %649, %651 : vector<32x128xf32>
      %c160_241 = arith.constant 160 : index
      %c0_242 = arith.constant 0 : index
      %653 = vector.load %arg10[%c160_241, %c0_242] : memref<464x128xf32, #tpu.memory_space<vmem>>, vector<32x128xf32>
      %cst_243 = arith.constant dense<0.000000e+00> : vector<32x128xf32>
      %654 = tpu.matmul %17, %653, %cst_243 {dimension_numbers = #tpu.dot_dimension_numbers<[1], [0], [0], [1], [0, 0, 1, 1], [], []>} : vector<32x32xf32>, vector<32x128xf32>, vector<32x128xf32> -> vector<32x128xf32>
      %655 = arith.maximumf %652, %654 : vector<32x128xf32>
      %c176_244 = arith.constant 176 : index
      %c0_245 = arith.constant 0 : index
      %656 = vector.load %arg10[%c176_244, %c0_245] : memref<464x128xf32, #tpu.memory_space<vmem>>, vector<32x128xf32>
      %cst_246 = arith.constant dense<0.000000e+00> : vector<32x128xf32>
      %657 = tpu.matmul %17, %656, %cst_246 {dimension_numbers = #tpu.dot_dimension_numbers<[1], [0], [0], [1], [0, 0, 1, 1], [], []>} : vector<32x32xf32>, vector<32x128xf32>, vector<32x128xf32> -> vector<32x128xf32>
      %658 = arith.maximumf %655, %657 : vector<32x128xf32>
      %659 = arith.addf %658, %13 : vector<32x128xf32>
      %cst_247 = arith.constant 0.000000e+00 : f32
      %660 = vector.broadcast %cst_247 : f32 to vector<32x128xf32>
      %661 = arith.maximumf %659, %660 : vector<32x128xf32>
      %c2_248 = arith.constant 2 : index
      %c0_249 = arith.constant 0 : index
      %c0_250 = arith.constant 0 : index
      %662 = vector.load %arg6[%c2_248, %c0_249, %c0_250] : memref<7x8x32xf32, #tpu.memory_space<vmem>>, vector<1x8x32xf32>
      %663 = vector.shape_cast %662 : vector<1x8x32xf32> to vector<8x32xf32>
      %cst_251 = arith.constant dense<0.000000e+00> : vector<8x128xf32>
      %664 = tpu.matmul %663, %661, %cst_251 {dimension_numbers = #tpu.dot_dimension_numbers<[1], [0], [0], [1], [0, 0, 1, 1], [], []>} : vector<8x32xf32>, vector<32x128xf32>, vector<8x128xf32> -> vector<8x128xf32>
      %665 = arith.addf %647, %664 : vector<8x128xf32>
      %c192_252 = arith.constant 192 : index
      %c0_253 = arith.constant 0 : index
      %666 = vector.load %arg10[%c192_252, %c0_253] : memref<464x128xf32, #tpu.memory_space<vmem>>, vector<32x128xf32>
      %cst_254 = arith.constant dense<0.000000e+00> : vector<32x128xf32>
      %667 = tpu.matmul %17, %666, %cst_254 {dimension_numbers = #tpu.dot_dimension_numbers<[1], [0], [0], [1], [0, 0, 1, 1], [], []>} : vector<32x32xf32>, vector<32x128xf32>, vector<32x128xf32> -> vector<32x128xf32>
      %c208_255 = arith.constant 208 : index
      %c0_256 = arith.constant 0 : index
      %668 = vector.load %arg10[%c208_255, %c0_256] : memref<464x128xf32, #tpu.memory_space<vmem>>, vector<32x128xf32>
      %cst_257 = arith.constant dense<0.000000e+00> : vector<32x128xf32>
      %669 = tpu.matmul %17, %668, %cst_257 {dimension_numbers = #tpu.dot_dimension_numbers<[1], [0], [0], [1], [0, 0, 1, 1], [], []>} : vector<32x32xf32>, vector<32x128xf32>, vector<32x128xf32> -> vector<32x128xf32>
      %670 = arith.maximumf %667, %669 : vector<32x128xf32>
      %c224_258 = arith.constant 224 : index
      %c0_259 = arith.constant 0 : index
      %671 = vector.load %arg10[%c224_258, %c0_259] : memref<464x128xf32, #tpu.memory_space<vmem>>, vector<32x128xf32>
      %cst_260 = arith.constant dense<0.000000e+00> : vector<32x128xf32>
      %672 = tpu.matmul %17, %671, %cst_260 {dimension_numbers = #tpu.dot_dimension_numbers<[1], [0], [0], [1], [0, 0, 1, 1], [], []>} : vector<32x32xf32>, vector<32x128xf32>, vector<32x128xf32> -> vector<32x128xf32>
      %673 = arith.maximumf %670, %672 : vector<32x128xf32>
      %c240_261 = arith.constant 240 : index
      %c0_262 = arith.constant 0 : index
      %674 = vector.load %arg10[%c240_261, %c0_262] : memref<464x128xf32, #tpu.memory_space<vmem>>, vector<32x128xf32>
      %cst_263 = arith.constant dense<0.000000e+00> : vector<32x128xf32>
      %675 = tpu.matmul %17, %674, %cst_263 {dimension_numbers = #tpu.dot_dimension_numbers<[1], [0], [0], [1], [0, 0, 1, 1], [], []>} : vector<32x32xf32>, vector<32x128xf32>, vector<32x128xf32> -> vector<32x128xf32>
      %676 = arith.maximumf %673, %675 : vector<32x128xf32>
      %677 = arith.addf %676, %13 : vector<32x128xf32>
      %cst_264 = arith.constant 0.000000e+00 : f32
      %678 = vector.broadcast %cst_264 : f32 to vector<32x128xf32>
      %679 = arith.maximumf %677, %678 : vector<32x128xf32>
      %c3_265 = arith.constant 3 : index
      %c0_266 = arith.constant 0 : index
      %c0_267 = arith.constant 0 : index
      %680 = vector.load %arg6[%c3_265, %c0_266, %c0_267] : memref<7x8x32xf32, #tpu.memory_space<vmem>>, vector<1x8x32xf32>
      %681 = vector.shape_cast %680 : vector<1x8x32xf32> to vector<8x32xf32>
      %cst_268 = arith.constant dense<0.000000e+00> : vector<8x128xf32>
      %682 = tpu.matmul %681, %679, %cst_268 {dimension_numbers = #tpu.dot_dimension_numbers<[1], [0], [0], [1], [0, 0, 1, 1], [], []>} : vector<8x32xf32>, vector<32x128xf32>, vector<8x128xf32> -> vector<8x128xf32>
      %683 = arith.addf %665, %682 : vector<8x128xf32>
      %c256_269 = arith.constant 256 : index
      %c0_270 = arith.constant 0 : index
      %684 = vector.load %arg10[%c256_269, %c0_270] : memref<464x128xf32, #tpu.memory_space<vmem>>, vector<32x128xf32>
      %cst_271 = arith.constant dense<0.000000e+00> : vector<32x128xf32>
      %685 = tpu.matmul %17, %684, %cst_271 {dimension_numbers = #tpu.dot_dimension_numbers<[1], [0], [0], [1], [0, 0, 1, 1], [], []>} : vector<32x32xf32>, vector<32x128xf32>, vector<32x128xf32> -> vector<32x128xf32>
      %c272_272 = arith.constant 272 : index
      %c0_273 = arith.constant 0 : index
      %686 = vector.load %arg10[%c272_272, %c0_273] : memref<464x128xf32, #tpu.memory_space<vmem>>, vector<32x128xf32>
      %cst_274 = arith.constant dense<0.000000e+00> : vector<32x128xf32>
      %687 = tpu.matmul %17, %686, %cst_274 {dimension_numbers = #tpu.dot_dimension_numbers<[1], [0], [0], [1], [0, 0, 1, 1], [], []>} : vector<32x32xf32>, vector<32x128xf32>, vector<32x128xf32> -> vector<32x128xf32>
      %688 = arith.maximumf %685, %687 : vector<32x128xf32>
      %c288_275 = arith.constant 288 : index
      %c0_276 = arith.constant 0 : index
      %689 = vector.load %arg10[%c288_275, %c0_276] : memref<464x128xf32, #tpu.memory_space<vmem>>, vector<32x128xf32>
      %cst_277 = arith.constant dense<0.000000e+00> : vector<32x128xf32>
      %690 = tpu.matmul %17, %689, %cst_277 {dimension_numbers = #tpu.dot_dimension_numbers<[1], [0], [0], [1], [0, 0, 1, 1], [], []>} : vector<32x32xf32>, vector<32x128xf32>, vector<32x128xf32> -> vector<32x128xf32>
      %691 = arith.maximumf %688, %690 : vector<32x128xf32>
      %c304_278 = arith.constant 304 : index
      %c0_279 = arith.constant 0 : index
      %692 = vector.load %arg10[%c304_278, %c0_279] : memref<464x128xf32, #tpu.memory_space<vmem>>, vector<32x128xf32>
      %cst_280 = arith.constant dense<0.000000e+00> : vector<32x128xf32>
      %693 = tpu.matmul %17, %692, %cst_280 {dimension_numbers = #tpu.dot_dimension_numbers<[1], [0], [0], [1], [0, 0, 1, 1], [], []>} : vector<32x32xf32>, vector<32x128xf32>, vector<32x128xf32> -> vector<32x128xf32>
      %694 = arith.maximumf %691, %693 : vector<32x128xf32>
      %695 = arith.addf %694, %13 : vector<32x128xf32>
      %cst_281 = arith.constant 0.000000e+00 : f32
      %696 = vector.broadcast %cst_281 : f32 to vector<32x128xf32>
      %697 = arith.maximumf %695, %696 : vector<32x128xf32>
      %c4_282 = arith.constant 4 : index
      %c0_283 = arith.constant 0 : index
      %c0_284 = arith.constant 0 : index
      %698 = vector.load %arg6[%c4_282, %c0_283, %c0_284] : memref<7x8x32xf32, #tpu.memory_space<vmem>>, vector<1x8x32xf32>
      %699 = vector.shape_cast %698 : vector<1x8x32xf32> to vector<8x32xf32>
      %cst_285 = arith.constant dense<0.000000e+00> : vector<8x128xf32>
      %700 = tpu.matmul %699, %697, %cst_285 {dimension_numbers = #tpu.dot_dimension_numbers<[1], [0], [0], [1], [0, 0, 1, 1], [], []>} : vector<8x32xf32>, vector<32x128xf32>, vector<8x128xf32> -> vector<8x128xf32>
      %701 = arith.addf %683, %700 : vector<8x128xf32>
      %c320_286 = arith.constant 320 : index
      %c0_287 = arith.constant 0 : index
      %702 = vector.load %arg10[%c320_286, %c0_287] : memref<464x128xf32, #tpu.memory_space<vmem>>, vector<32x128xf32>
      %cst_288 = arith.constant dense<0.000000e+00> : vector<32x128xf32>
      %703 = tpu.matmul %17, %702, %cst_288 {dimension_numbers = #tpu.dot_dimension_numbers<[1], [0], [0], [1], [0, 0, 1, 1], [], []>} : vector<32x32xf32>, vector<32x128xf32>, vector<32x128xf32> -> vector<32x128xf32>
      %c336_289 = arith.constant 336 : index
      %c0_290 = arith.constant 0 : index
      %704 = vector.load %arg10[%c336_289, %c0_290] : memref<464x128xf32, #tpu.memory_space<vmem>>, vector<32x128xf32>
      %cst_291 = arith.constant dense<0.000000e+00> : vector<32x128xf32>
      %705 = tpu.matmul %17, %704, %cst_291 {dimension_numbers = #tpu.dot_dimension_numbers<[1], [0], [0], [1], [0, 0, 1, 1], [], []>} : vector<32x32xf32>, vector<32x128xf32>, vector<32x128xf32> -> vector<32x128xf32>
      %706 = arith.maximumf %703, %705 : vector<32x128xf32>
      %c352_292 = arith.constant 352 : index
      %c0_293 = arith.constant 0 : index
      %707 = vector.load %arg10[%c352_292, %c0_293] : memref<464x128xf32, #tpu.memory_space<vmem>>, vector<32x128xf32>
      %cst_294 = arith.constant dense<0.000000e+00> : vector<32x128xf32>
      %708 = tpu.matmul %17, %707, %cst_294 {dimension_numbers = #tpu.dot_dimension_numbers<[1], [0], [0], [1], [0, 0, 1, 1], [], []>} : vector<32x32xf32>, vector<32x128xf32>, vector<32x128xf32> -> vector<32x128xf32>
      %709 = arith.maximumf %706, %708 : vector<32x128xf32>
      %c368_295 = arith.constant 368 : index
      %c0_296 = arith.constant 0 : index
      %710 = vector.load %arg10[%c368_295, %c0_296] : memref<464x128xf32, #tpu.memory_space<vmem>>, vector<32x128xf32>
      %cst_297 = arith.constant dense<0.000000e+00> : vector<32x128xf32>
      %711 = tpu.matmul %17, %710, %cst_297 {dimension_numbers = #tpu.dot_dimension_numbers<[1], [0], [0], [1], [0, 0, 1, 1], [], []>} : vector<32x32xf32>, vector<32x128xf32>, vector<32x128xf32> -> vector<32x128xf32>
      %712 = arith.maximumf %709, %711 : vector<32x128xf32>
      %713 = arith.addf %712, %13 : vector<32x128xf32>
      %cst_298 = arith.constant 0.000000e+00 : f32
      %714 = vector.broadcast %cst_298 : f32 to vector<32x128xf32>
      %715 = arith.maximumf %713, %714 : vector<32x128xf32>
      %c5_299 = arith.constant 5 : index
      %c0_300 = arith.constant 0 : index
      %c0_301 = arith.constant 0 : index
      %716 = vector.load %arg6[%c5_299, %c0_300, %c0_301] : memref<7x8x32xf32, #tpu.memory_space<vmem>>, vector<1x8x32xf32>
      %717 = vector.shape_cast %716 : vector<1x8x32xf32> to vector<8x32xf32>
      %cst_302 = arith.constant dense<0.000000e+00> : vector<8x128xf32>
      %718 = tpu.matmul %717, %715, %cst_302 {dimension_numbers = #tpu.dot_dimension_numbers<[1], [0], [0], [1], [0, 0, 1, 1], [], []>} : vector<8x32xf32>, vector<32x128xf32>, vector<8x128xf32> -> vector<8x128xf32>
      %719 = arith.addf %701, %718 : vector<8x128xf32>
      %c384_303 = arith.constant 384 : index
      %c0_304 = arith.constant 0 : index
      %720 = vector.load %arg10[%c384_303, %c0_304] : memref<464x128xf32, #tpu.memory_space<vmem>>, vector<32x128xf32>
      %cst_305 = arith.constant dense<0.000000e+00> : vector<32x128xf32>
      %721 = tpu.matmul %17, %720, %cst_305 {dimension_numbers = #tpu.dot_dimension_numbers<[1], [0], [0], [1], [0, 0, 1, 1], [], []>} : vector<32x32xf32>, vector<32x128xf32>, vector<32x128xf32> -> vector<32x128xf32>
      %c400_306 = arith.constant 400 : index
      %c0_307 = arith.constant 0 : index
      %722 = vector.load %arg10[%c400_306, %c0_307] : memref<464x128xf32, #tpu.memory_space<vmem>>, vector<32x128xf32>
      %cst_308 = arith.constant dense<0.000000e+00> : vector<32x128xf32>
      %723 = tpu.matmul %17, %722, %cst_308 {dimension_numbers = #tpu.dot_dimension_numbers<[1], [0], [0], [1], [0, 0, 1, 1], [], []>} : vector<32x32xf32>, vector<32x128xf32>, vector<32x128xf32> -> vector<32x128xf32>
      %724 = arith.maximumf %721, %723 : vector<32x128xf32>
      %c416_309 = arith.constant 416 : index
      %c0_310 = arith.constant 0 : index
      %725 = vector.load %arg10[%c416_309, %c0_310] : memref<464x128xf32, #tpu.memory_space<vmem>>, vector<32x128xf32>
      %cst_311 = arith.constant dense<0.000000e+00> : vector<32x128xf32>
      %726 = tpu.matmul %17, %725, %cst_311 {dimension_numbers = #tpu.dot_dimension_numbers<[1], [0], [0], [1], [0, 0, 1, 1], [], []>} : vector<32x32xf32>, vector<32x128xf32>, vector<32x128xf32> -> vector<32x128xf32>
      %727 = arith.maximumf %724, %726 : vector<32x128xf32>
      %c432_312 = arith.constant 432 : index
      %c0_313 = arith.constant 0 : index
      %728 = vector.load %arg10[%c432_312, %c0_313] : memref<464x128xf32, #tpu.memory_space<vmem>>, vector<32x128xf32>
      %cst_314 = arith.constant dense<0.000000e+00> : vector<32x128xf32>
      %729 = tpu.matmul %17, %728, %cst_314 {dimension_numbers = #tpu.dot_dimension_numbers<[1], [0], [0], [1], [0, 0, 1, 1], [], []>} : vector<32x32xf32>, vector<32x128xf32>, vector<32x128xf32> -> vector<32x128xf32>
      %730 = arith.maximumf %727, %729 : vector<32x128xf32>
      %731 = arith.addf %730, %13 : vector<32x128xf32>
      %cst_315 = arith.constant 0.000000e+00 : f32
      %732 = vector.broadcast %cst_315 : f32 to vector<32x128xf32>
      %733 = arith.maximumf %731, %732 : vector<32x128xf32>
      %c6_316 = arith.constant 6 : index
      %c0_317 = arith.constant 0 : index
      %c0_318 = arith.constant 0 : index
      %734 = vector.load %arg6[%c6_316, %c0_317, %c0_318] : memref<7x8x32xf32, #tpu.memory_space<vmem>>, vector<1x8x32xf32>
      %735 = vector.shape_cast %734 : vector<1x8x32xf32> to vector<8x32xf32>
      %cst_319 = arith.constant dense<0.000000e+00> : vector<8x128xf32>
      %736 = tpu.matmul %735, %733, %cst_319 {dimension_numbers = #tpu.dot_dimension_numbers<[1], [0], [0], [1], [0, 0, 1, 1], [], []>} : vector<8x32xf32>, vector<32x128xf32>, vector<8x128xf32> -> vector<8x128xf32>
      %737 = arith.addf %719, %736 : vector<8x128xf32>
      %c0_320 = arith.constant 0 : index
      %738 = arith.index_cast %26 : i32 to index
      %c0_321 = arith.constant 0 : index
      %c0_322 = arith.constant 0 : index
      %739 = vector.load %arg8[%c0_320, %738, %c0_321, %c0_322] : memref<1x2x8x128xf32, #tpu.memory_space<vmem>>, vector<1x1x8x128xf32>
      %740 = vector.shape_cast %739 : vector<1x1x8x128xf32> to vector<8x128xf32>
      %741 = vector.shape_cast %737 : vector<8x128xf32> to vector<1x1x8x128xf32>
      tpu.vector_store %arg8[%c0_320, %738, %c0_321, %c0_322], %741 {strides = array<i32>} : memref<1x2x8x128xf32, #tpu.memory_space<vmem>>, vector<1x1x8x128xf32>,
    }
    %c2_i32_13 = arith.constant 2 : i32
    return
  }
  func.func @transform_0(%arg0: i32) -> (i32, i32, i32, i32) {
    %c0_i32 = arith.constant 0 : i32
    %c0_i32_0 = arith.constant 0 : i32
    %c0_i32_1 = arith.constant 0 : i32
    %c0_i32_2 = arith.constant 0 : i32
    return %arg0, %c0_i32, %c0_i32_0, %c0_i32_1 : i32, i32, i32, i32
  }
  func.func @transform_1(%arg0: i32) -> (i32, i32, i32) {
    %c0_i32 = arith.constant 0 : i32
    %c0_i32_0 = arith.constant 0 : i32
    %c0_i32_1 = arith.constant 0 : i32
    %c0_i32_2 = arith.constant 0 : i32
    return %c0_i32, %c0_i32_0, %c0_i32_1 : i32, i32, i32
  }
  func.func @transform_2(%arg0: i32) -> (i32, i32) {
    %c0_i32 = arith.constant 0 : i32
    %c0_i32_0 = arith.constant 0 : i32
    %c0_i32_1 = arith.constant 0 : i32
    return %c0_i32, %c0_i32_0 : i32, i32
  }
  func.func @transform_3(%arg0: i32) -> (i32, i32) {
    %c0_i32 = arith.constant 0 : i32
    %c0_i32_0 = arith.constant 0 : i32
    %c0_i32_1 = arith.constant 0 : i32
    return %c0_i32, %c0_i32_0 : i32, i32
  }
  func.func @transform_4(%arg0: i32) -> (i32, i32) {
    %c0_i32 = arith.constant 0 : i32
    %c0_i32_0 = arith.constant 0 : i32
    %c0_i32_1 = arith.constant 0 : i32
    return %c0_i32, %c0_i32_0 : i32, i32
  }
  func.func @transform_5(%arg0: i32) -> (i32, i32, i32) {
    %c0_i32 = arith.constant 0 : i32
    %c0_i32_0 = arith.constant 0 : i32
    %c0_i32_1 = arith.constant 0 : i32
    %c0_i32_2 = arith.constant 0 : i32
    return %c0_i32, %c0_i32_0, %c0_i32_1 : i32, i32, i32
  }
  func.func @transform_6(%arg0: i32) -> (i32, i32) {
    %c0_i32 = arith.constant 0 : i32
    %c0_i32_0 = arith.constant 0 : i32
    %c0_i32_1 = arith.constant 0 : i32
    return %c0_i32, %c0_i32_0 : i32, i32
  }
  func.func @transform_7(%arg0: i32) -> (i32, i32, i32, i32) {
    %c0_i32 = arith.constant 0 : i32
    %c0_i32_0 = arith.constant 0 : i32
    %c0_i32_1 = arith.constant 0 : i32
    %c0_i32_2 = arith.constant 0 : i32
    return %arg0, %c0_i32, %c0_i32_0, %c0_i32_1 : i32, i32, i32, i32
  }
}

</mosaic_0001>

<bundles_post_ra>
// kernel: tpu_custom_call.1
= control target key start
LH: loop header
LB: loop body
LE: loop exit
PB: predicated region body
PF: predicated region fallthrough
CT: control target
= control target key end

     0   :  { %s7538_s0 = inlined_call_operand.vmem [shape: f32[2,2,128,64], index: 0, kind: input, shape index: {}]   ;;  %s7539_s1 = inlined_call_operand.vmem [shape: f32[2,16,1], index: 1, kind: input, shape index: {}]   ;;  %s7540_s2 = inlined_call_operand.vmem [shape: f32[16,1], index: 2, kind: input, shape index: {}]   ;;  %s7541_s3 = inlined_call_operand.vmem [shape: f32[32,32], index: 3, kind: input, shape index: {}]   ;;  %s7542_s4 = inlined_call_operand.vmem [shape: f32[32,1], index: 4, kind: input, shape index: {}]   ;;  %s7543_s5 = inlined_call_operand.vmem [shape: f32[7,8,32], index: 5, kind: input, shape index: {}]   ;;  %s7544_s6 = inlined_call_operand.<no memory space> [shape: f32[1,1], index: 6, kind: input, shape index: {}]   ;;  %s7545_s7 = inlined_call_operand.hbm [shape: f32[2,2,8,128], index: 7, kind: output, shape index: {}]  }
   0x1   :  { %v12_v0 = vstv %s7544_s6 }
   0x2   :  { %13 = vst [vmem:[#allocation4] sm:$0x1] %v12_v0 }
   0x3   :  { %14 = vsyncpa [#allocation6], 0 }
   0x4   :  { %16 = vsyncpa [#allocation6 + $0x1], 0  ;;  %s6427_s26 = smov 0   ;;  %s6429_s27 = smov 0  }
   0x5   :  { %s6431_s28 = smov 0   ;;  %s6433_s29 = smov 0  }
   0x6 LB: > { %s6448_s6 = sadd.s32 4294967295, %s6370_s29   ;;  %s4870_s30 = sadd.s32 4294967294, %s6370_s29   ;;  %s6370_s29 = sphi %s6433_s29, %s7575_s29   ;;  %s6366_s28 = sphi %s6431_s28, %s7574_s28   ;;  %s6362_s27 = sphi %s6429_s27, %s7573_s27   ;;  %s6358_s26 = sphi %s6427_s26, %s7572_s26  }
   0x7   : > { %s6452_s8 = sadd.s32 1, %s6370_s29   ;;  %s181_s9 = sadd.s32 1, %s6366_s28 }
   0x8   : > { %s178_s10 = ssub.s32 %s6370_s29, %s6452_s8  ;;  %p191_p0 = scmp.ne.s32.totalorder %s6366_s28, %s6362_s27 }
   0x9   : > { %p179_p1 = scmp.eq.s32.totalorder %s178_s10, 0  ;;  %p192_p2 = scmp.eq.s32.totalorder %s6448_s6, 1 }
   0xa   : > { %p197_p3 = scmp.ne.s32.totalorder %s6362_s27, %s6358_s26  ;;  %p198_p4 = scmp.eq.s32.totalorder %s4870_s30, 1 }
   0xb   : > { %s6463_s11 = scalar_select %p179_p1, %s6366_s28, %s181_s9  }
   0xc   : > { %p6465_p5 = por %p192_p2, %p191_p0  ;;  %p6469_p6 = por %p198_p4, %p197_p3 }
   0xd   : > { %p4873_p7 = scmp.ge.s32.totalorder %s6370_s29, 1  ;;  %p242_p8 = scmp.lt.s32.totalorder %s6370_s29, 3 }
   0xf   : > { %p243_p9 = pnand %p4873_p7, %p242_p8 }
  0x11   : > { %246 = sbr.rel (%p243_p9) target bundleno = 2428 (0x97c), region = 48 }
  0x18   : > { %v4877_v1 = vld [vmem:[%s7539_s1 + $0x10] sm:$0xff]  ;;  %v279_v2 = vld [vmem:[%s7539_s1] sm:$0xff]  ;;  %v6376_v3 = vmov 0   ;;  %v4878_v4 = vld [vmem:[%s7539_s1 + $0x18] sm:$0xff]  ;;  %v354_v10 = vlaneseq  ;;  %p274_p10 = scmp.lt.s32.totalorder %s6448_s6, 1  ;;  %s271_s20 = sand.u32 1, %s6362_s27  }
  0x19   : > { %6303 = vset.pattern.permute.xlu1 %v6376_v3  ;;  %6302 = vset.pattern.permute.xlu0 %v6376_v3  ;;  %v280_v5 = vld [vmem:[%s7539_s1 + $0x8] sm:$0xff]  ;;  %v304_v7 = vld [vmem:[%s7540_s2] sm:$0xff]  ;;  %v319_v11 = vld [vmem:[%s7542_s4 + $0x18] sm:$0xff]  ;;  %s6510_s21 = sshll.u32 %s271_s20, 4  ;;  %v6377_v27 = vmov 0.0  }
  0x1a   : > { %296 = vperm.xlu1 %6303, %v4877_v1   ;;  %283 = vperm.xlu0 %6302, %v279_v2   ;;  %v305_v6 = vld [vmem:[%s7540_s2 + $0x8] sm:$0xff]  ;;  %v316_v9 = vld [vmem:[%s7542_s4] sm:$0xff]  ;;  %v318_v12 = vld [vmem:[%s7542_s4 + $0x10] sm:$0xff]  ;;  %v355_v13 = vshrl.u32 %v354_v10, 7  ;;  %s275_s19 = scalar_select %p274_p10, %s6448_s6, 1  ;;  %v364_v22 = vand.u32 127, %v354_v10 }
  0x1b   : > { %v317_v8 = vld [vmem:[%s7542_s4 + $0x8] sm:$0xff]  ;;  %v4879_v14 = vld [vmem:[#allocation4] ss:$0 sm:$0xff]  ;;  %v6530_v25 = vld [vmem:[%s7541_s3 + $0x10] sm:$0xff] }
  0x1c   : > { %v356_v15 = vadd.s32 8, %v355_v13  ;;  %v357_v16 = vadd.s32 16, %v355_v13  ;;  %v358_v17 = vadd.s32 24, %v355_v13  ;;  %v359_v18 = vadd.s32 32, %v355_v13  ;;  %s5123_s22 = sshll.u32 %s275_s19, 8  ;;  %v6520_v23 = vld [vmem:[%s7541_s3] sm:$0xff] }
  0x1d   : > { %v360_v19 = vadd.s32 40, %v355_v13  ;;  %v361_v20 = vadd.s32 48, %v355_v13  ;;  %v362_v21 = vadd.s32 56, %v355_v13  ;;  %s6515_s25 = scalar_lea.vmem %s7538_s0, %s5123_s22  ;;  %v6525_v24 = vld [vmem:[%s7541_s3 + $0x8] sm:$0xff]  ;;  %vm365_vm0 = vcmp.eq.s32.totalorder %v355_v13, %v364_v22  ;;  %v6535_v26 = vld [vmem:[%s7541_s3 + $0x18] sm:$0xff]  ;;  %s273_s19 = scalar_lea.vmem [#allocation5], %s6510_s21 }
  0x1e   : > { %301 = vperm.xlu1 %6303, %v4878_v4   ;;  %288 = vperm.xlu0 %6302, %v280_v5   ;;  %vm366_vm1 = vcmp.eq.s32.totalorder %v356_v15, %v364_v22  ;;  %vm367_vm2 = vcmp.eq.s32.totalorder %v357_v16, %v364_v22  ;;  %vm368_vm3 = vcmp.eq.s32.totalorder %v358_v17, %v364_v22  ;;  %v6537_v28 = vsel %vm365_vm0, 1.0, %v6377_v27  ;;  %s6576_s22 = smov 0  }
  0x1f   : > { %vm369_vm4 = vcmp.eq.s32.totalorder %v359_v18, %v364_v22  ;;  %vm370_vm5 = vcmp.eq.s32.totalorder %v360_v19, %v364_v22  ;;  %vm371_vm6 = vcmp.eq.s32.totalorder %v361_v20, %v364_v22  ;;  %vm372_vm7 = vcmp.eq.s32.totalorder %v362_v21, %v364_v22  ;;  %7552 = vst [vmem:[#allocation8_spill] sm:$0xff] %v6537_v28 }
  0x20   : > { %v6539_v29 = vsel %vm366_vm1, 1.0, %v6377_v27  ;;  %v6541_v30 = vsel %vm367_vm2, 1.0, %v6377_v27  ;;  %v6543_v31 = vsel %vm368_vm3, 1.0, %v6377_v27  ;;  %v6545_v32 = vsel %vm369_vm4, 1.0, %v6377_v27 }
  0x21   : > { %7553 = vst [vmem:[#allocation9_spill] sm:$0xff] %v6539_v29  ;;  %7554 = vst [vmem:[#allocation10_spill] sm:$0xff] %v6541_v30  ;;  %v6547_v33 = vsel %vm370_vm5, 1.0, %v6377_v27  ;;  %v6549_v34 = vsel %vm371_vm6, 1.0, %v6377_v27  ;;  %v6551_v35 = vsel %vm372_vm7, 1.0, %v6377_v27 }
  0x22   : > { %313 = vperm.xlu1 %6303, %v305_v6   ;;  %308 = vperm.xlu0 %6302, %v304_v7   ;;  %7555 = vst [vmem:[#allocation11_spill] sm:$0xff] %v6543_v31  ;;  %7556 = vst [vmem:[#allocation12_spill] sm:$0xff] %v6545_v32 }
  0x23   : > { %7557 = vst [vmem:[#allocation13_spill] sm:$0xff] %v6547_v33 }
  0x26   : > { %327 = vperm.xlu1 %6303, %v317_v8   ;;  %322 = vperm.xlu0 %6302, %v316_v9  }
  0x2a   : > { %337 = vperm.xlu1 %6303, %v319_v11   ;;  %332 = vperm.xlu0 %6302, %v318_v12  }
  0x2e   : > { %347 = vperm.xlu0 %6302, %v4879_v14  }
  0x99   : > { %v6553_v36 = vpop.permute.xlu1 %296  ;;  %v6555_v37 = vpop.permute.xlu0 %283 }
  0x9d   : > { %v6557_v38 = vpop.permute.xlu1 %301  ;;  %v6559_v39 = vpop.permute.xlu0 %288 }
  0xa1   : > { %v6561_v40 = vpop.permute.xlu1 %313  ;;  %v6563_v41 = vpop.permute.xlu0 %308 }
  0xa5   : > { %v6565_v42 = vpop.permute.xlu1 %327  ;;  %v6567_v43 = vpop.permute.xlu0 %322 }
  0xa9   : > { %v6569_v44 = vpop.permute.xlu1 %337  ;;  %v6571_v45 = vpop.permute.xlu0 %332 }
  0xad   : > { %v6573_v46 = vpop.permute.xlu0 %347 }
  0xae LB: >> { %vm405_vm8 = vcmask 523264   ;;  %v7558_v28 = vld [vmem:[#allocation8_spill] sm:$0xff]  ;;  %s4880_s23 = sshll.u32 %s6374_s22, 7  ;;  %v7561_v29 = vld [vmem:[#allocation9_spill] sm:$0xff]  ;;  %v7562_v30 = vld [vmem:[#allocation10_spill] sm:$0xff]  ;;  %vm1610_vm10 = vcmask 261120   ;;  %s6374_s22 = sphi %s6576_s22, %s386_s22  }
  0xaf   : >> { %5440 = vmatprep.mubr.msk.f32.mxu0 %vm405_vm8, %v7558_v28  ;;  %s6585_s24 = scalar_lea.vmem %s6515_s25, %s4880_s23  ;;  %vm6589_vm9 = vmpackc.low %vm405_vm8, %vm405_vm8  ;;  %v7563_v31 = vld [vmem:[#allocation11_spill] sm:$0xff]  ;;  %v7564_v32 = vld [vmem:[#allocation12_spill] sm:$0xff]  ;;  %5460 = vmatprep.mubr.msk.f32.mxu1 %vm1610_vm10, %v6520_v23  ;;  %vm6379_vm11 = vmmov 0   ;;  %s5117_s15 = sshll.u32 %s6374_s22, 3 }
  0xb0   : >> { %v389_v48 = vld [vmem:[%s6585_s24] sm:$0xff]  ;;  %v390_v49 = vld [vmem:[%s6585_s24 + $0x8] sm:$0xff]  ;;  %v391_v50 = vld [vmem:[%s6585_s24 + $0x10] sm:$0xff]  ;;  %s4783_s16 = scalar_lea.vmem %s273_s19, %s5117_s15 [#allocation5]  ;;  %s386_s22 = sadd.s32 1, %s6374_s22  }
  0xb1   : >> { %v5921_v51 = vpack.c.bf16 %v390_v49, %v389_v48  ;;  %v392_v52 = vld [vmem:[%s6585_s24 + $0x18] sm:$0xff]  ;;  %v393_v54 = vld [vmem:[%s6585_s24 + $0x20] sm:$0xff]  ;;  %v394_v55 = vld [vmem:[%s6585_s24 + $0x28] sm:$0xff]  ;;  %p383_p11 = scmp.ge.s32.totalorder %s386_s22, 2  }
  0xb2   : >> { %v5927_v53 = vpack.c.bf16 %v392_v52, %v391_v50  ;;  %v5933_v56 = vpack.c.bf16 %v394_v55, %v393_v54  ;;  %v395_v57 = vld [vmem:[%s6585_s24 + $0x30] sm:$0xff]  ;;  %v396_v58 = vld [vmem:[%s6585_s24 + $0x38] sm:$0xff]  ;;  %v397_v60 = vld [vmem:[%s6585_s24 + $0x40] sm:$0xff]  ;;  %s5124_s17 = sshll.u32 (%p383_p11), %s6448_s6, 8  ;;  %s4799_s30 = sshll.u32 (%p383_p11), %s273_s19, 4  ;;  %s7493_s30 = int_to_ptr.vmem [resolvable:$true] %s4799_s30 }
  0xb3   : >> { %5923 = vmatprep.subr.msk.bf16.mxu0 %vm6589_vm9, %v5921_v51  ;;  %v5939_v59 = vpack.c.bf16 %v396_v58, %v395_v57  ;;  %v398_v61 = vld [vmem:[%s6585_s24 + $0x48] sm:$0xff]  ;;  %v399_v63 = vld [vmem:[%s6585_s24 + $0x50] sm:$0xff]  ;;  %v400_v0 = vld [vmem:[%s6585_s24 + $0x58] sm:$0xff]  ;;  %s7497_s22 = scalar_lea.sflag (%p383_p11), [#allocation6], %s271_s20  ;;  %s6304_s25 = scalar_lea.vmem (%p383_p11), %s7493_s30, 256 }
  0xb4   : >> { %5926 = vmatpush3.bf16.xpose.msk.msra.mxu0 %vm6589_vm9, %v5921_v51  ;;  %v5945_v62 = vpack.c.bf16 %v398_v61, %v397_v60  ;;  %v5951_v1 = vpack.c.bf16 %v400_v0, %v399_v63  ;;  %v401_v2 = vld [vmem:[%s6585_s24 + $0x60] sm:$0xff]  ;;  %v402_v3 = vld [vmem:[%s6585_s24 + $0x68] sm:$0xff]  ;;  %v403_v5 = vld [vmem:[%s6585_s24 + $0x70] sm:$0xff]  ;;  %p6305_p12 = scmp.ne.s32.totalorder (%p383_p11), %s7493_s30, %s6304_s25  ;;  %s6381_s6 = smov (%p383_p11), [#allocation5]  }
  0xb5   : >> { %5929 = vmatprep.subr.msk.bf16.mxu0 %vm6589_vm9, %v5927_v53  ;;  %v5957_v4 = vpack.c.bf16 %v402_v3, %v401_v2  ;;  %v404_v6 = vld [vmem:[%s6585_s24 + $0x78] sm:$0xff]  ;;  %v7565_v33 = vld [vmem:[#allocation13_spill] sm:$0xff]  ;;  %s7489_s24 = scalar_lea.hbm (%p383_p11), %s7545_s7, %s5124_s17  ;;  %s6308_s9 = sshll.u32 (%p383_p11), %s6381_s6, 4  ;;  %s6309_s9 = int_to_ptr.vmem [resolvable:$false] %s6308_s9 }
  0xb6   : >> { %v5963_v7 = vpack.c.bf16 %v404_v6, %v403_v5  ;;  %p6306_p13 = pnand (%p383_p11), %p6305_p12, %p6465_p5  ;;  %s6310_s10 = scalar_lea.vmem (%p383_p11), %s6309_s9, 512 }
  0xb7   : > { %p6311_p1 = scmp.lt.s32.totalorder (%p383_p11), %s7493_s30, %s6309_s9  ;;  %p6312_p2 = scmp.lt.s32.totalorder (%p383_p11), %s6310_s10, %s6304_s25 }
  0xb8   : > { %p6307_p0 = pneg (%p383_p11), %p6306_p13 }
  0xb9   : > { %p6313_p3 = por (%p383_p11), %p6312_p2, %p6311_p1 }
  0xbb   : > { %p6314_p4 = pnand (%p383_p11), %p6313_p3, %p6307_p0 }
  0xbc   : >> { %5932 = vmatpush3.bf16.xpose.msk.msra.mxu0 %vm6589_vm9, %v5927_v53 }
  0xbd   : >> { %5935 = vmatprep.subr.msk.bf16.mxu0 %vm6589_vm9, %v5933_v56 }
  0xc4   : >> { %5938 = vmatpush3.bf16.xpose.msk.msra.mxu0 %vm6589_vm9, %v5933_v56 }
  0xc5   : >> { %5941 = vmatprep.subr.msk.bf16.mxu0 %vm6589_vm9, %v5939_v59 }
  0xcc   : >> { %5944 = vmatpush3.bf16.xpose.msk.msra.mxu0 %vm6589_vm9, %v5939_v59 }
  0xcd   : >> { %5947 = vmatprep.subr.msk.bf16.mxu0 %vm6589_vm9, %v5945_v62 }
  0xd4   : >> { %5950 = vmatpush3.bf16.xpose.msk.msra.mxu0 %vm6589_vm9, %v5945_v62 }
  0xd5   : >> { %5953 = vmatprep.subr.msk.bf16.mxu0 %vm6589_vm9, %v5951_v1 }
  0xdc   : >> { %5956 = vmatpush3.bf16.xpose.msk.msra.mxu0 %vm6589_vm9, %v5951_v1 }
  0xdd   : >> { %5959 = vmatprep.subr.msk.bf16.mxu0 %vm6589_vm9, %v5957_v4 }
  0xe4   : >> { %5962 = vmatpush3.bf16.xpose.msk.msra.mxu0 %vm6589_vm9, %v5957_v4 }
  0xe5   : >> { %5965 = vmatprep.subr.msk.bf16.mxu0 %vm6589_vm9, %v5963_v7 }
  0xec   : >> { %5968 = vmatpush3.bf16.xpose.msk.msra.mxu0 %vm6589_vm9, %v5963_v7 }
  0xf3   : >> { %5441 = vmatmul.mubr.msk.f32.vlgmr.msra.gmra.mrb[0].mxu0 %vm405_vm8, %v7561_v29 }
  0xf4   : >> { %5443 = vmatprep.mubr.msk.f32.mxu0 %vm405_vm8, %v7562_v30 }
  0xf7   : >> { %5444 = vmatmul.mubr.msk.f32.gmra.mrb[2].mxu0 %vm405_vm8, %v7563_v31 }
  0xf8   : >> { %5446 = vmatprep.mubr.msk.f32.mxu0 %vm405_vm8, %v7564_v32 }
  0xfb   : >> { %5447 = vmatmul.mubr.msk.f32.gmra.mrb[4].mxu0 %vm405_vm8, %v7565_v33 }
  0xfc   : >> { %5449 = vmatprep.mubr.msk.f32.mxu0 %vm405_vm8, %v6549_v34 }
  0xff   : >> { %5450 = vmatmul.mubr.msk.f32.gmra.mrb[6].mxu0 %vm405_vm8, %v6551_v35 }
 0x100   : >> { %5594 = vmatprep.mubr.msk.f32.mxu0 %vm1610_vm10, %v6520_v23 }
 0x1c6   : >> { %v5442_v8 = vpop.f32.mrb[0].mxu0 }
 0x1c7   : >> { %584 = vst [vmem:[#allocation2 + $0x8] sm:$0xff] %v5442_v8  ;;  %v544_v9 = vpop.f32.mrb[1].mxu0 }
 0x1c8   : >> { %583 = vst [vmem:[#allocation2] sm:$0xff] %v544_v9 }
 0x1ca   : >> { %v5445_v10 = vpop.f32.mrb[2].mxu0 }
 0x1cb   : >> { %586 = vst [vmem:[#allocation2 + $0x18] sm:$0xff] %v5445_v10  ;;  %v554_v11 = vpop.f32.mrb[3].mxu0 }
 0x1cc   : >> { %585 = vst [vmem:[#allocation2 + $0x10] sm:$0xff] %v554_v11 }
 0x1ce   : >> { %v6659_v12 = vld [vmem:[#allocation2 + $0x8] ss:$0 sm:$0xff] }
 0x1cf   : >> { %v4905_v13 = vld [vmem:[#allocation2] ss:$0 sm:$0xff]  ;;  %v4906_v14 = vld [vmem:[#allocation2 + $0x1] ss:$0 sm:$0xff]  ;;  %v4907_v15 = vld [vmem:[#allocation2 + $0x2] ss:$0 sm:$0xff]  ;;  %v6663_v16 = vmul.f32 %v6659_v12, %v6553_v36  ;;  %v6667_v17 = vmul.f32 %v6659_v12, %v6557_v38 }
 0x1d0   : >> { %v606_v18 = vmul.f32 %v4905_v13, %v6555_v37  ;;  %v607_v19 = vmul.f32 %v4905_v13, %v6559_v39  ;;  %v608_v20 = vmul.f32 %v4906_v14, %v6553_v36  ;;  %v609_v21 = vmul.f32 %v4906_v14, %v6557_v38  ;;  %v4909_v22 = vld [vmem:[#allocation2 + $0x3] ss:$0 sm:$0xff]  ;;  %v4910_v50 = vld [vmem:[#allocation2 + $0x4] ss:$0 sm:$0xff]  ;;  %v4912_v63 = vld [vmem:[#allocation2 + $0x5] ss:$0 sm:$0xff] }
 0x1d1   : >> { %v612_v27 = vmul.f32 %v4906_v14, %v6555_v37  ;;  %v613_v47 = vmul.f32 %v4906_v14, %v6559_v39  ;;  %v614_v48 = vmul.f32 %v4907_v15, %v6553_v36  ;;  %v615_v49 = vmul.f32 %v4907_v15, %v6557_v38  ;;  %v4913_v10 = vld [vmem:[#allocation2 + $0x6] ss:$0 sm:$0xff] }
 0x1d2   : >> { %v610_v51 = vadd.f32 %v608_v20, %v606_v18  ;;  %v611_v52 = vadd.f32 %v609_v21, %v607_v19  ;;  %v641_v53 = vmul.f32 %v4907_v15, %v6555_v37  ;;  %v642_v54 = vmul.f32 %v4907_v15, %v6559_v39  ;;  %v4915_v20 = vld [vmem:[#allocation2 + $0x7] ss:$0 sm:$0xff] }
 0x1d3   : >> { %v616_v55 = vadd.f32 %v614_v48, %v612_v27  ;;  %v617_v56 = vadd.f32 %v615_v49, %v613_v47  ;;  %v643_v57 = vmul.f32 %v4909_v22, %v6553_v36  ;;  %v644_v58 = vmul.f32 %v4909_v22, %v6557_v38 }
 0x1d4   : >> { %v647_v59 = vmul.f32 %v4909_v22, %v6555_v37  ;;  %v648_v60 = vmul.f32 %v4909_v22, %v6559_v39  ;;  %v649_v61 = vmul.f32 %v4910_v50, %v6553_v36  ;;  %v650_v62 = vmul.f32 %v4910_v50, %v6557_v38 }
 0x1d5   : >> { %v618_v0 = vmax.f32 %v610_v51, %v616_v55  ;;  %v619_v1 = vmax.f32 %v611_v52, %v617_v56  ;;  %v645_v2 = vadd.f32 %v643_v57, %v641_v53  ;;  %v646_v3 = vadd.f32 %v644_v58, %v642_v54 }
 0x1d6   : >> { %v651_v4 = vadd.f32 %v649_v61, %v647_v59  ;;  %v652_v5 = vadd.f32 %v650_v62, %v648_v60  ;;  %v676_v6 = vmul.f32 %v4910_v50, %v6555_v37  ;;  %v677_v7 = vmul.f32 %v4910_v50, %v6559_v39 }
 0x1d7   : >> { %v620_v8 = vadd.f32 %v618_v0, %v6563_v41  ;;  %v621_v9 = vadd.f32 %v619_v1, %v6561_v40  ;;  %v678_v11 = vmul.f32 %v4912_v63, %v6553_v36  ;;  %v679_v13 = vmul.f32 %v4912_v63, %v6557_v38  ;;  %v4918_v0 = vld [vmem:[#allocation2 + $0x9] ss:$0 sm:$0xff] }
 0x1d8   : >> { %v653_v14 = vmax.f32 %v645_v2, %v651_v4  ;;  %v654_v15 = vmax.f32 %v646_v3, %v652_v5  ;;  %v682_v18 = vmul.f32 %v4912_v63, %v6555_v37  ;;  %v683_v19 = vmul.f32 %v4912_v63, %v6559_v39 }
 0x1d9   : >> { %v622_v21 = vmax.f32 %v620_v8, 0.0  ;;  %v623_v22 = vmax.f32 %v621_v9, 0.0  ;;  %v680_v27 = vadd.f32 %v678_v11, %v676_v6  ;;  %v681_v47 = vadd.f32 %v679_v13, %v677_v7  ;;  %v6707_v8 = vld [vmem:[#allocation2 + $0xa] ss:$0 sm:$0xff] }
 0x1da   : >> { %v655_v48 = vadd.f32 %v653_v14, %v6563_v41  ;;  %v656_v49 = vadd.f32 %v654_v15, %v6561_v40  ;;  %v684_v50 = vmul.f32 %v4913_v10, %v6553_v36  ;;  %v685_v51 = vmul.f32 %v4913_v10, %v6557_v38 }
 0x1db   : >> { %v5969_v52 = vpack.c.bf16 %v623_v22, %v622_v21  ;;  %v711_v53 = vmul.f32 %v4913_v10, %v6555_v37  ;;  %v712_v54 = vmul.f32 %v4913_v10, %v6559_v39  ;;  %v713_v55 = vmul.f32 %v4915_v20, %v6553_v36 }
 0x1dc   : >> { %v657_v56 = vmax.f32 %v655_v48, 0.0  ;;  %v658_v57 = vmax.f32 %v656_v49, 0.0  ;;  %v686_v58 = vadd.f32 %v684_v50, %v682_v18  ;;  %v687_v59 = vadd.f32 %v685_v51, %v683_v19 }
 0x1dd   : >> { %5970 = vmatprep.subr.bf16.mxu1 %v5969_v52  ;;  %v714_v60 = vmul.f32 %v4915_v20, %v6557_v38  ;;  %v715_v61 = vadd.f32 %v713_v55, %v711_v53  ;;  %v717_v62 = vmul.f32 %v4915_v20, %v6555_v37  ;;  %v718_v63 = vmul.f32 %v4915_v20, %v6559_v39 }
 0x1de   : >> { %5972 = vmatpush3.bf16.msra.mxu1 %v5969_v52  ;;  %v5973_v1 = vpack.c.bf16 %v658_v57, %v657_v56  ;;  %v688_v2 = vmax.f32 %v680_v27, %v686_v58  ;;  %v689_v3 = vmax.f32 %v681_v47, %v687_v59  ;;  %v746_v4 = vmul.f32 %v6659_v12, %v6555_v37 }
 0x1df   : >> { %v716_v5 = vadd.f32 %v714_v60, %v712_v54  ;;  %v721_v6 = vadd.f32 %v6663_v16, %v717_v62  ;;  %v722_v7 = vadd.f32 %v6667_v17, %v718_v63  ;;  %v747_v9 = vmul.f32 %v6659_v12, %v6559_v39  ;;  %v6759_v62 = vld [vmem:[#allocation2 + $0x10] ss:$0 sm:$0xff]  ;;  %v4930_v63 = vld [vmem:[#allocation2 + $0x11] ss:$0 sm:$0xff] }
 0x1e0   : >> { %5974 = vmatprep.subr.bf16.mxu1 %v5973_v1  ;;  %v690_v10 = vadd.f32 %v688_v2, %v6563_v41  ;;  %v691_v11 = vadd.f32 %v689_v3, %v6561_v40  ;;  %v748_v13 = vmul.f32 %v4918_v0, %v6553_v36  ;;  %v749_v14 = vmul.f32 %v4918_v0, %v6557_v38 }
 0x1e1   : >> { %v723_v15 = vmax.f32 %v715_v61, %v721_v6  ;;  %v724_v18 = vmax.f32 %v716_v5, %v722_v7  ;;  %v752_v16 = vmul.f32 %v4918_v0, %v6555_v37  ;;  %v753_v17 = vmul.f32 %v4918_v0, %v6559_v39  ;;  %v4931_v0 = vld [vmem:[#allocation2 + $0x12] ss:$0 sm:$0xff] }
 0x1e2   : >> { %5976 = vmatpush3.bf16.msra.mxu1 %v5973_v1  ;;  %v692_v19 = vmax.f32 %v690_v10, 0.0  ;;  %v693_v20 = vmax.f32 %v691_v11, 0.0  ;;  %v754_v12 = vmul.f32 %v6707_v8, %v6553_v36  ;;  %v755_v21 = vmul.f32 %v6707_v8, %v6557_v38 }
 0x1e3   : >> { %5978 = vmatprep.subr.bf16.mxu1 %v5973_v1  ;;  %v725_v22 = vadd.f32 %v723_v15, %v6563_v41  ;;  %v750_v27 = vadd.f32 %v748_v13, %v746_v4  ;;  %v751_v47 = vadd.f32 %v749_v14, %v747_v9  ;;  %v726_v49 = vadd.f32 %v724_v18, %v6561_v40 }
 0x1e4   : >> { %v5981_v48 = vpack.c.bf16 %v693_v20, %v692_v19  ;;  %v756_v50 = vadd.f32 %v754_v12, %v752_v16  ;;  %v757_v51 = vadd.f32 %v755_v21, %v753_v17  ;;  %v887_v2 = vmul.f32 %v6759_v62, %v6559_v39  ;;  %v4933_v12 = vld [vmem:[#allocation2 + $0x13] ss:$0 sm:$0xff]  ;;  %v4934_v21 = vld [vmem:[#allocation2 + $0x14] ss:$0 sm:$0xff] }
 0x1e5   : >> { %5461 = vmatmul.mubr.msk.f32.vlgmr.msra.gmra.mrb[0].mxu1 %vm1610_vm10, %v6525_v24  ;;  %v727_v52 = vmax.f32 %v725_v22, 0.0  ;;  %v728_v53 = vmax.f32 %v726_v49, 0.0  ;;  %v888_v3 = vmul.f32 %v4930_v63, %v6553_v36  ;;  %v889_v4 = vmul.f32 %v4930_v63, %v6557_v38 }
 0x1e6   : >> { %5980 = vmatpush3.bf16.msra.mxu1 %v5973_v1  ;;  %5463 = vmatprep.mubr.msk.f32.mxu1 %vm1610_vm10, %v6530_v25  ;;  %v758_v54 = vmax.f32 %v750_v27, %v756_v50  ;;  %v759_v55 = vmax.f32 %v751_v47, %v757_v51  ;;  %v886_v1 = vmul.f32 %v6759_v62, %v6555_v37 }
 0x1e7   : >> { %5982 = vmatprep.subr.bf16.mxu1 %v5981_v48  ;;  %v5989_v56 = vpack.c.bf16 %v728_v53, %v727_v52  ;;  %v892_v5 = vmul.f32 %v4930_v63, %v6555_v37  ;;  %v893_v6 = vmul.f32 %v4930_v63, %v6559_v39  ;;  %v894_v7 = vmul.f32 %v4931_v0, %v6553_v36  ;;  %v5448_v63 = vpop.f32.mrb[4].mxu0 }
 0x1e8   : >> { %v760_v57 = vadd.f32 %v758_v54, %v6563_v41  ;;  %v761_v58 = vadd.f32 %v759_v55, %v6561_v40  ;;  %v895_v9 = vmul.f32 %v4931_v0, %v6557_v38  ;;  %v890_v10 = vadd.f32 %v888_v3, %v886_v1  ;;  %588 = vst [vmem:[#allocation2 + $0x28] sm:$0xff] %v5448_v63 }
 0x1e9   : >> { %5464 = vmatmul.mubr.msk.f32.gmra.mrb[2].mxu1 %vm1610_vm10, %v6535_v26  ;;  %v891_v11 = vadd.f32 %v889_v4, %v887_v2  ;;  %v896_v13 = vadd.f32 %v894_v7, %v892_v5  ;;  %v921_v22 = vmul.f32 %v4931_v0, %v6555_v37  ;;  %v922_v27 = vmul.f32 %v4931_v0, %v6559_v39  ;;  %v564_v4 = vpop.f32.mrb[5].mxu0 }
 0x1ea   : >> { %5984 = vmatpush3.bf16.msra.mxu1 %v5981_v48  ;;  %5474 = vmatprep.mubr.msk.f32.mxu1 %vm1610_vm10, %v6520_v23  ;;  %v762_v59 = vmax.f32 %v760_v57, 0.0  ;;  %v763_v60 = vmax.f32 %v761_v58, 0.0  ;;  %v897_v14 = vadd.f32 %v895_v9, %v893_v6  ;;  %v923_v47 = vmul.f32 %v4933_v12, %v6553_v36  ;;  %v4936_v58 = vld [vmem:[#allocation2 + $0x15] ss:$0 sm:$0xff]  ;;  %587 = vst [vmem:[#allocation2 + $0x20] sm:$0xff] %v564_v4 }
 0x1eb   : >> { %5986 = vmatprep.subr.bf16.mxu1 %v5981_v48  ;;  %v898_v15 = vmax.f32 %v890_v10, %v896_v13  ;;  %v927_v49 = vmul.f32 %v4933_v12, %v6555_v37  ;;  %v928_v50 = vmul.f32 %v4933_v12, %v6559_v39  ;;  %v929_v52 = vmul.f32 %v4934_v21, %v6553_v36 }
 0x1ec   : >> { %v6743_v61 = vpack.c.bf16 %v763_v60, %v762_v59  ;;  %v899_v18 = vmax.f32 %v891_v11, %v897_v14  ;;  %v930_v53 = vmul.f32 %v4934_v21, %v6557_v38  ;;  %v925_v54 = vadd.f32 %v923_v47, %v921_v22  ;;  %v4937_v59 = vld [vmem:[#allocation2 + $0x16] ss:$0 sm:$0xff] }
 0x1ed   : >> { %5475 = vmatmul.mubr.msk.f32.vlgmr.msra.gmra.mrb[4].mxu1 %vm1610_vm10, %v6525_v24  ;;  %v900_v16 = vadd.f32 %v898_v15, %v6563_v41  ;;  %v956_v60 = vmul.f32 %v4934_v21, %v6555_v37  ;;  %v7548_v0 = vmov 0.0|0.0   ;;  %v957_v1 = vmul.f32 %v4934_v21, %v6559_v39  ;;  %v4939_v15 = vld [vmem:[#allocation2 + $0x17] ss:$0 sm:$0xff]  ;;  %v4940_v21 = vld [vmem:[#allocation2 + $0x18] ss:$0 sm:$0xff] }
 0x1ee   : >> { %5988 = vmatpush3.bf16.msra.mxu1 %v5981_v48  ;;  %5477 = vmatprep.mubr.msk.f32.mxu1 %vm1610_vm10, %v6530_v25  ;;  %v901_v17 = vadd.f32 %v899_v18, %v6561_v40  ;;  %v924_v48 = vmul.f32 %v4933_v12, %v6557_v38  ;;  %v932_v57 = vadd.f32 %v930_v53, %v928_v50  ;;  %v7546_v4 = vmov 0.0  }
 0x1ef   : >> { %5990 = vmatprep.subr.bf16.mxu1 %v5989_v56  ;;  %v902_v19 = vmax.f32 %v900_v16, 0.0  ;;  %v958_v2 = vmul.f32 %v4936_v58, %v6553_v36  ;;  %v959_v3 = vmul.f32 %v4936_v58, %v6557_v38  ;;  %v962_v7 = vmul.f32 %v4936_v58, %v6555_v37 }
 0x1f0   : >> { %v903_v20 = vmax.f32 %v901_v17, 0.0  ;;  %v926_v55 = vadd.f32 %v924_v48, %v922_v27  ;;  %v963_v9 = vmul.f32 %v4936_v58, %v6559_v39  ;;  %v964_v13 = vmul.f32 %v4937_v59, %v6553_v36 }
 0x1f1   : >> { %5478 = vmatmul.mubr.msk.f32.gmra.mrb[6].mxu1 %vm1610_vm10, %v6535_v26  ;;  %v960_v10 = vadd.f32 %v958_v2, %v956_v60  ;;  %v961_v11 = vadd.f32 %v959_v3, %v957_v1  ;;  %v965_v14 = vmul.f32 %v4937_v59, %v6557_v38  ;;  %v991_v17 = vmul.f32 %v4937_v59, %v6555_v37 }
 0x1f2   : >> { %5992 = vmatpush3.bf16.msra.mxu1 %v5989_v56  ;;  %5488 = vmatprep.mubr.msk.f32.mxu1 %vm1610_vm10, %v6520_v23  ;;  %v6779_v51 = vpack.c.bf16 %v903_v20, %v902_v19  ;;  %v934_v6 = vmax.f32 %v926_v55, %v932_v57  ;;  %v992_v19 = vmul.f32 %v4937_v59, %v6559_v39  ;;  %v4942_v59 = vld [vmem:[#allocation2 + $0x19] ss:$0 sm:$0xff] }
 0x1f3   : >> { %5994 = vmatprep.subr.bf16.mxu1 %v5989_v56  ;;  %v966_v20 = vadd.f32 %v964_v13, %v962_v7  ;;  %v967_v12 = vadd.f32 %v965_v14, %v963_v9  ;;  %v993_v22 = vmul.f32 %v4939_v15, %v6553_v36  ;;  %v994_v27 = vmul.f32 %v4939_v15, %v6557_v38 }
 0x1f4   : >> { %6046 = vmatprep.subr.bf16.mxu0 %v6779_v51  ;;  %v936_v16 = vadd.f32 %v934_v6, %v6561_v40  ;;  %v998_v50 = vmul.f32 %v4939_v15, %v6559_v39  ;;  %v999_v57 = vmul.f32 %v4940_v21, %v6553_v36  ;;  %v1000_v58 = vmul.f32 %v4940_v21, %v6557_v38 }
 0x1f5   : >> { %5489 = vmatmul.mubr.msk.f32.vlgmr.msra.gmra.mrb[8].mxu1 %vm1610_vm10, %v6525_v24  ;;  %6048 = vmatpush3.bf16.msra.mxu0 %v6779_v51  ;;  %v969_v53 = vmax.f32 %v961_v11, %v967_v12  ;;  %v996_v55 = vadd.f32 %v994_v27, %v992_v19  ;;  %v1026_v1 = vmul.f32 %v4940_v21, %v6555_v37 }
 0x1f6   : >> { %5996 = vmatpush3.bf16.msra.mxu1 %v5989_v56  ;;  %5491 = vmatprep.mubr.msk.f32.mxu1 %vm1610_vm10, %v6530_v25  ;;  %v931_v56 = vadd.f32 %v929_v52, %v927_v49  ;;  %v938_v48 = vmax.f32 %v936_v16, 0.0  ;;  %v997_v49 = vmul.f32 %v4939_v15, %v6555_v37  ;;  %v968_v52 = vmax.f32 %v960_v10, %v966_v20 }
 0x1f7   : >> { %5998 = vmatprep.subr.bf16.mxu1 %v6743_v61  ;;  %v971_v63 = vadd.f32 %v969_v53, %v6561_v40  ;;  %v1002_v3 = vadd.f32 %v1000_v58, %v998_v50  ;;  %v1027_v6 = vmul.f32 %v4940_v21, %v6559_v39  ;;  %v1028_v10 = vmul.f32 %v4942_v59, %v6553_v36 }
 0x1f8   : >> { %v933_v5 = vmax.f32 %v925_v54, %v931_v56  ;;  %v995_v54 = vadd.f32 %v993_v22, %v991_v17  ;;  %v970_v60 = vadd.f32 %v968_v52, %v6563_v41  ;;  %v1001_v2 = vadd.f32 %v999_v57, %v997_v49 }
 0x1f9   : >> { %5492 = vmatmul.mubr.msk.f32.gmra.mrb[10].mxu1 %vm1610_vm10, %v6535_v26  ;;  %v973_v9 = vmax.f32 %v971_v63, 0.0  ;;  %v1029_v11 = vmul.f32 %v4942_v59, %v6557_v38  ;;  %v1004_v14 = vmax.f32 %v996_v55, %v1002_v3  ;;  %v1032_v15 = vmul.f32 %v4942_v59, %v6555_v37 }
 0x1fa   : >> { %6000 = vmatpush3.bf16.msra.mxu1 %v6743_v61  ;;  %5502 = vmatprep.mubr.msk.f32.mxu1 %vm1610_vm10, %v6520_v23  ;;  %v935_v18 = vadd.f32 %v933_v5, %v6563_v41  ;;  %v4943_v5 = vld [vmem:[#allocation2 + $0x1a] ss:$0 sm:$0xff]  ;;  %v972_v7 = vmax.f32 %v970_v60, 0.0  ;;  %v1003_v13 = vmax.f32 %v995_v54, %v1001_v2  ;;  %v1030_v17 = vadd.f32 %v1028_v10, %v1026_v1 }
 0x1fb   : >> { %6001 = vmatprep.subr.bf16.mxu1 %v7548_v0  ;;  %v1034_v19 = vmul.f32 %v4943_v5, %v6553_v36  ;;  %v1006_v12 = vadd.f32 %v1004_v14, %v6561_v40  ;;  %v1031_v21 = vadd.f32 %v1029_v11, %v1027_v6  ;;  %v1035_v22 = vmul.f32 %v4943_v5, %v6557_v38 }
 0x1fc   : >> { %v937_v47 = vmax.f32 %v935_v18, 0.0  ;;  %v1033_v18 = vmul.f32 %v4942_v59, %v6559_v39  ;;  %v6814_v16 = vpack.c.bf16 %v973_v9, %v972_v7  ;;  %v1005_v20 = vadd.f32 %v1003_v13, %v6563_v41  ;;  %v4948_v7 = vld [vmem:[#allocation2 + $0x1d] ss:$0 sm:$0xff] }
 0x1fd   : >> { %5503 = vmatmul.mubr.msk.f32.vlgmr.msra.gmra.mrb[12].mxu1 %vm1610_vm10, %v6525_v24  ;;  %v1036_v27 = vadd.f32 %v1034_v19, %v1032_v15  ;;  %v1061_v49 = vmul.f32 %v4943_v5, %v6555_v37  ;;  %v1062_v50 = vmul.f32 %v4943_v5, %v6559_v39  ;;  %v1008_v53 = vmax.f32 %v1006_v12, 0.0 }
 0x1fe   : >> { %5505 = vmatprep.mubr.msk.f32.mxu1 %vm1610_vm10, %v6530_v25  ;;  %v6049_v56 = vpack.c.bf16 %v938_v48, %v937_v47  ;;  %v4945_v47 = vld [vmem:[#allocation2 + $0x1b] ss:$0 sm:$0xff]  ;;  %v4946_v48 = vld [vmem:[#allocation2 + $0x1c] ss:$0 sm:$0xff]  ;;  %v1007_v52 = vmax.f32 %v1005_v20, 0.0  ;;  %v1037_v54 = vadd.f32 %v1035_v22, %v1033_v18  ;;  %v1099_v19 = vmul.f32 %v4948_v7, %v6557_v38 }
 0x1ff   : >> { %v1063_v55 = vmul.f32 %v4945_v47, %v6553_v36  ;;  %v1038_v57 = vmax.f32 %v1030_v17, %v1036_v27  ;;  %v1067_v58 = vmul.f32 %v4945_v47, %v6555_v37  ;;  %v1068_v59 = vmul.f32 %v4945_v47, %v6559_v39  ;;  %v4949_v18 = vld [vmem:[#allocation2 + $0x1e] ss:$0 sm:$0xff] }
 0x200   : >> { %6050 = vmatprep.subr.bf16.mxu0 %v6049_v56  ;;  %v6833_v60 = vpack.c.bf16 %v1008_v53, %v1007_v52  ;;  %v1039_v63 = vmax.f32 %v1031_v21, %v1037_v54  ;;  %v1069_v2 = vmul.f32 %v4946_v48, %v6553_v36  ;;  %v1070_v6 = vmul.f32 %v4946_v48, %v6557_v38 }
 0x201   : >> { %5506 = vmatmul.mubr.msk.f32.gmra.mrb[14].mxu1 %vm1610_vm10, %v6535_v26  ;;  %6052 = vmatpush3.bf16.msra.mxu0 %v6049_v56  ;;  %v1065_v1 = vadd.f32 %v1063_v55, %v1061_v49  ;;  %v1040_v3 = vadd.f32 %v1038_v57, %v6563_v41  ;;  %v1096_v11 = vmul.f32 %v4946_v48, %v6555_v37  ;;  %v4951_v49 = vld [vmem:[#allocation2 + $0x1f] ss:$0 sm:$0xff]  ;;  %v6858_v57 = vld [vmem:[#allocation2 + $0x20] ss:$0 sm:$0xff] }
 0x202   : >> { %5516 = vmatprep.mubr.msk.f32.mxu1 %vm6379_vm11, %v7546_v4  ;;  %6054 = vmatprep.subr.bf16.mxu0 %v6049_v56  ;;  %v1041_v9 = vadd.f32 %v1039_v63, %v6561_v40  ;;  %v1071_v10 = vadd.f32 %v1069_v2, %v1067_v58  ;;  %v1097_v13 = vmul.f32 %v4946_v48, %v6559_v39 }
 0x203   : >> { %v1042_v14 = vmax.f32 %v1040_v3, 0.0  ;;  %v1072_v15 = vadd.f32 %v1070_v6, %v1068_v59  ;;  %v1098_v17 = vmul.f32 %v4948_v7, %v6553_v36  ;;  %v1102_v21 = vmul.f32 %v4948_v7, %v6555_v37 }
 0x204   : >> { %5595 = vmatmul.mubr.msk.f32.vlgmr.msra.gmra.mrb[8].mxu0 %vm1610_vm10, %v6525_v24  ;;  %v1043_v20 = vmax.f32 %v1041_v9, 0.0  ;;  %v1073_v12 = vmax.f32 %v1065_v1, %v1071_v10  ;;  %v1103_v22 = vmul.f32 %v4948_v7, %v6559_v39  ;;  %v1101_v48 = vadd.f32 %v1099_v19, %v1097_v13 }
 0x205   : >> { %6056 = vmatpush3.bf16.msra.mxu0 %v6049_v56  ;;  %5597 = vmatprep.mubr.msk.f32.mxu0 %vm1610_vm10, %v6530_v25  ;;  %v1064_v56 = vmul.f32 %v4945_v47, %v6557_v38  ;;  %v1100_v47 = vadd.f32 %v1098_v17, %v1096_v11  ;;  %v1104_v53 = vmul.f32 %v4949_v18, %v6553_v36 }
 0x206   : >> { %6058 = vmatprep.subr.bf16.mxu0 %v6814_v16  ;;  %v1075_v52 = vadd.f32 %v1073_v12, %v6563_v41  ;;  %v1105_v54 = vmul.f32 %v4949_v18, %v6557_v38  ;;  %v1132_v58 = vmul.f32 %v4949_v18, %v6559_v39  ;;  %v1133_v59 = vmul.f32 %v4951_v49, %v6553_v36 }
 0x207   : >> { %v1066_v5 = vadd.f32 %v1064_v56, %v1062_v50  ;;  %v6073_v50 = vpack.c.bf16 %v1043_v20, %v1042_v14  ;;  %v1131_v56 = vmul.f32 %v4949_v18, %v6555_v37  ;;  %v1106_v1 = vadd.f32 %v1104_v53, %v1102_v21 }
 0x208   : >> { %5598 = vmatmul.mubr.msk.f32.gmra.mrb[10].mxu0 %vm1610_vm10, %v6535_v26  ;;  %v1077_v63 = vmax.f32 %v1075_v52, 0.0  ;;  %v1107_v2 = vadd.f32 %v1105_v54, %v1103_v22  ;;  %v1134_v3 = vmul.f32 %v4951_v49, %v6557_v38  ;;  %v1137_v6 = vmul.f32 %v4951_v49, %v6555_v37 }
 0x209   : >> { %6060 = vmatpush3.bf16.msra.mxu0 %v6814_v16  ;;  %5608 = vmatprep.mubr.msk.f32.mxu0 %vm1610_vm10, %v6520_v23  ;;  %v1074_v27 = vmax.f32 %v1066_v5, %v1072_v15  ;;  %v1138_v7 = vmul.f32 %v4951_v49, %v6559_v39  ;;  %v1108_v9 = vmax.f32 %v1100_v47, %v1106_v1 }
 0x20a   : >> { %6070 = vmatprep.subr.bf16.mxu0 %v6833_v60  ;;  %v1109_v10 = vmax.f32 %v1101_v48, %v1107_v2  ;;  %v1135_v11 = vadd.f32 %v1133_v59, %v1131_v56  ;;  %v1139_v13 = vmul.f32 %v6858_v57, %v6553_v36  ;;  %v1136_v15 = vadd.f32 %v1134_v3, %v1132_v58 }
 0x20b   : >> { %v1076_v55 = vadd.f32 %v1074_v27, %v6561_v40  ;;  %v1140_v18 = vmul.f32 %v6858_v57, %v6557_v38  ;;  %v1110_v17 = vadd.f32 %v1108_v9, %v6563_v41 }
 0x20c   : >> { %5609 = vmatmul.mubr.msk.f32.vlgmr.msra.gmra.mrb[12].mxu0 %vm1610_vm10, %v6525_v24  ;;  %v1111_v19 = vadd.f32 %v1109_v10, %v6561_v40  ;;  %v1141_v20 = vadd.f32 %v1139_v13, %v1137_v6 }
 0x20d   : >> { %6072 = vmatpush3.bf16.msra.mxu0 %v6833_v60  ;;  %5611 = vmatprep.mubr.msk.f32.mxu0 %vm1610_vm10, %v6530_v25  ;;  %v1078_v5 = vmax.f32 %v1076_v55, 0.0  ;;  %v1142_v12 = vadd.f32 %v1140_v18, %v1138_v7  ;;  %v1112_v21 = vmax.f32 %v1110_v17, 0.0  ;;  %v4922_v18 = vld [vmem:[#allocation2 + $0xc] ss:$0 sm:$0xff] }
 0x20e   : >> { %6074 = vmatprep.subr.bf16.mxu0 %v6073_v50  ;;  %v1113_v22 = vmax.f32 %v1111_v19, 0.0  ;;  %v1143_v27 = vmax.f32 %v1135_v11, %v1141_v20  ;;  %v4921_v11 = vld [vmem:[#allocation2 + $0xb] ss:$0 sm:$0xff]  ;;  %v781_v19 = vmul.f32 %v6707_v8, %v6555_v37  ;;  %v782_v20 = vmul.f32 %v6707_v8, %v6559_v39 }
 0x20f   : >> { %v6872_v14 = vpack.c.bf16 %v1078_v5, %v1077_v63  ;;  %v1144_v47 = vmax.f32 %v1136_v15, %v1142_v12  ;;  %v783_v12 = vmul.f32 %v4921_v11, %v6553_v36 }
 0x210   : >> { %5612 = vmatmul.mubr.msk.f32.gmra.mrb[14].mxu0 %vm1610_vm10, %v6535_v26  ;;  %v6885_v48 = vpack.c.bf16 %v1113_v22, %v1112_v21  ;;  %v1145_v49 = vadd.f32 %v1143_v27, %v6563_v41  ;;  %v784_v21 = vmul.f32 %v4921_v11, %v6557_v38  ;;  %v787_v27 = vmul.f32 %v4921_v11, %v6555_v37 }
 0x211   : >> { %6076 = vmatpush3.bf16.msra.mxu0 %v6073_v50  ;;  %5636 = vmatprep.mubr.msk.f32.mxu0 %vm1610_vm10, %v6520_v23 }
 0x212   : >> { %6084 = vmatprep.subr.bf16.mxu0 %v6073_v50  ;;  %v1147_v52 = vmax.f32 %v1145_v49, 0.0  ;;  %v789_v49 = vmul.f32 %v4922_v18, %v6553_v36 }
 0x214   : >> { %5637 = vmatmul.mubr.msk.f32.vlgmr.msra.gmra.mrb[16].mxu0 %vm1610_vm10, %v6525_v24  ;;  %v791_v8 = vadd.f32 %v789_v49, %v787_v27 }
 0x215   : >> { %6086 = vmatpush3.bf16.msra.mxu0 %v6073_v50  ;;  %5639 = vmatprep.mubr.msk.f32.mxu0 %vm1610_vm10, %v6530_v25  ;;  %v1146_v50 = vadd.f32 %v1144_v47, %v6561_v40  ;;  %v788_v47 = vmul.f32 %v4921_v11, %v6559_v39  ;;  %v817_v11 = vmul.f32 %v4922_v18, %v6559_v39 }
 0x216   : >> { %6088 = vmatprep.subr.bf16.mxu0 %v6872_v14 }
 0x217   : >> { %v1148_v53 = vmax.f32 %v1146_v50, 0.0  ;;  %v790_v50 = vmul.f32 %v4922_v18, %v6557_v38 }
 0x218   : >> { %5640 = vmatmul.mubr.msk.f32.gmra.mrb[18].mxu0 %vm1610_vm10, %v6535_v26 }
 0x219   : >> { %6090 = vmatpush3.bf16.msra.mxu0 %v6872_v14  ;;  %5661 = vmatprep.mubr.msk.f32.mxu0 %vm1610_vm10, %v6520_v23  ;;  %v6896_v54 = vpack.c.bf16 %v1148_v53, %v1147_v52 }
 0x21a   : >> { %6100 = vmatprep.subr.bf16.mxu0 %v6885_v48 }
 0x21c   : >> { %5662 = vmatmul.mubr.msk.f32.vlgmr.msra.gmra.mrb[20].mxu0 %vm1610_vm10, %v6525_v24 }
 0x21d   : >> { %6102 = vmatpush3.bf16.msra.mxu0 %v6885_v48  ;;  %5664 = vmatprep.mubr.msk.f32.mxu0 %vm1610_vm10, %v6530_v25 }
 0x21e   : >> { %6104 = vmatprep.subr.bf16.mxu0 %v6896_v54 }
 0x220   : >> { %5665 = vmatmul.mubr.msk.f32.gmra.mrb[22].mxu0 %vm1610_vm10, %v6535_v26 }
 0x221   : >> { %6106 = vmatpush3.bf16.msra.mxu0 %v6896_v54  ;;  %5689 = vmatprep.mubr.msk.f32.mxu0 %vm1610_vm10, %v6520_v23 }
 0x224   : >> { %5690 = vmatmul.mubr.msk.f32.vlgmr.msra.gmra.mrb[24].mxu0 %vm1610_vm10, %v6525_v24 }
 0x225   : >> { %5692 = vmatprep.mubr.msk.f32.mxu0 %vm1610_vm10, %v6530_v25 }
 0x228   : >> { %5693 = vmatmul.mubr.msk.f32.gmra.mrb[26].mxu0 %vm1610_vm10, %v6535_v26 }
 0x229   : >> { %5728 = vmatprep.mubr.msk.f32.mxu0 %vm1610_vm10, %v6520_v23 }
 0x2b8   : >> { %v5462_v55 = vpop.f32.mrb[0].mxu1 }
 0x2b9   : >> { %v1689_v56 = vpop.f32.mrb[1].mxu1 }
 0x2bc   : >> { %v5465_v58 = vpop.f32.mrb[2].mxu1 }
 0x2bd   : >> { %v1699_v59 = vpop.f32.mrb[3].mxu1 }
 0x2c0   : >> { %v5476_v63 = vpop.f32.mrb[4].mxu1 }
 0x2c1   : >> { %v1798_v1 = vmax.f32 %v5462_v55, %v5476_v63  ;;  %v1778_v2 = vpop.f32.mrb[5].mxu1  ;;  %v792_v63 = vadd.f32 %v790_v50, %v788_v47 }
 0x2c2   : >> { %v1797_v3 = vmax.f32 %v1689_v56, %v1778_v2 }
 0x2c4   : >> { %v5479_v5 = vpop.f32.mrb[6].mxu1 }
 0x2c5   : >> { %v1800_v6 = vmax.f32 %v5465_v58, %v5479_v5  ;;  %v1788_v7 = vpop.f32.mrb[7].mxu1  ;;  %v785_v58 = vadd.f32 %v783_v12, %v781_v19 }
 0x2c6   : >> { %v1799_v9 = vmax.f32 %v1699_v59, %v1788_v7  ;;  %v786_v59 = vadd.f32 %v784_v21, %v782_v20  ;;  %v4925_v7 = vld [vmem:[#allocation2 + $0xe] ss:$0 sm:$0xff] }
 0x2c7   : >> { %v793_v21 = vmax.f32 %v785_v58, %v791_v8  ;;  %v825_v49 = vmul.f32 %v4925_v7, %v6557_v38 }
 0x2c8   : >> { %v5490_v10 = vpop.f32.mrb[8].mxu1 }
 0x2c9   : >> { %v1891_v13 = vmax.f32 %v1798_v1, %v5490_v10  ;;  %v1871_v15 = vpop.f32.mrb[9].mxu1  ;;  %v4924_v1 = vld [vmem:[#allocation2 + $0xd] ss:$0 sm:$0xff]  ;;  %v816_v10 = vmul.f32 %v4922_v18, %v6555_v37  ;;  %v824_v18 = vmul.f32 %v4925_v7, %v6553_v36  ;;  %v795_v58 = vadd.f32 %v793_v21, %v6563_v41 }
 0x2ca   : >> { %v1890_v17 = vmax.f32 %v1797_v3, %v1871_v15  ;;  %v822_v19 = vmul.f32 %v4924_v1, %v6555_v37  ;;  %v860_v21 = vmul.f32 %v6759_v62, %v6557_v38 }
 0x2cc   : >> { %v5493_v22 = vpop.f32.mrb[10].mxu1 }
 0x2cd   : >> { %v1893_v52 = vmax.f32 %v1800_v6, %v5493_v22  ;;  %v1881_v53 = vpop.f32.mrb[11].mxu1  ;;  %v818_v6 = vmul.f32 %v4924_v1, %v6553_v36 }
 0x2ce   : >> { %v1892_v55 = vmax.f32 %v1799_v9, %v1881_v53  ;;  %v819_v9 = vmul.f32 %v4924_v1, %v6557_v38 }
 0x2d0   : >> { %v5504_v56 = vpop.f32.mrb[12].mxu1 }
 0x2d1   : >> { %v1984_v2 = vmax.f32 %v1891_v13, %v5504_v56  ;;  %v1964_v3 = vpop.f32.mrb[13].mxu1  ;;  %v794_v13 = vmax.f32 %v786_v59, %v792_v63  ;;  %v821_v63 = vadd.f32 %v819_v9, %v817_v11  ;;  %v1995_v11 = vld [vmem:[%s7543_s5] sm:$0xff]  ;;  %v851_v9 = vmul.f32 %v4925_v7, %v6555_v37 }
 0x2d2   : >> { %v1983_v5 = vmax.f32 %v1890_v17, %v1964_v3  ;;  %v823_v17 = vmul.f32 %v4924_v1, %v6559_v39 }
 0x2d3   : >> { %v1988_v15 = vadd.f32 %v1984_v2, %v6565_v42  ;;  %v820_v2 = vadd.f32 %v818_v6, %v816_v10  ;;  %v796_v59 = vadd.f32 %v794_v13, %v6561_v40 }
 0x2d4   : >> { %v1987_v20 = vadd.f32 %v1983_v5, %v6567_v43  ;;  %v5507_v12 = vpop.f32.mrb[14].mxu1  ;;  %v827_v1 = vadd.f32 %v825_v49, %v823_v17 }
 0x2d5   : >> { %v1992_v22 = vmax.f32 %v1988_v15, 0.0  ;;  %v1986_v27 = vmax.f32 %v1893_v52, %v5507_v12  ;;  %v1974_v47 = vpop.f32.mrb[15].mxu1  ;;  %v826_v52 = vadd.f32 %v824_v18, %v822_v19  ;;  %v798_v12 = vmax.f32 %v796_v59, 0.0 }
 0x2d6   : >> { %v1991_v50 = vmax.f32 %v1987_v20, 0.0  ;;  %v1985_v53 = vmax.f32 %v1892_v55, %v1974_v47  ;;  %v797_v55 = vmax.f32 %v795_v58, 0.0  ;;  %v829_v6 = vmax.f32 %v821_v63, %v827_v1 }
 0x2d7   : >> { %v1990_v56 = vadd.f32 %v1986_v27, %v6569_v44  ;;  %v4927_v27 = vld [vmem:[#allocation2 + $0xf] ss:$0 sm:$0xff]  ;;  %v828_v10 = vmax.f32 %v820_v2, %v826_v52  ;;  %v852_v19 = vmul.f32 %v4925_v7, %v6559_v39 }
 0x2d8   : >> { %v6002_v3 = vpack.c.bf16 %v1992_v22, %v1991_v50  ;;  %v1989_v5 = vadd.f32 %v1985_v53, %v6571_v45  ;;  %v859_v22 = vmul.f32 %v6759_v62, %v6553_v36  ;;  %v853_v13 = vmul.f32 %v4927_v27, %v6553_v36 }
 0x2d9   : >> { %v1994_v8 = vmax.f32 %v1990_v56, 0.0  ;;  %v854_v17 = vmul.f32 %v4927_v27, %v6557_v38  ;;  %v857_v47 = vmul.f32 %v4927_v27, %v6555_v37  ;;  %v858_v18 = vmul.f32 %v4927_v27, %v6559_v39  ;;  %v4957_v27 = vld [vmem:[#allocation2 + $0x23] ss:$0 sm:$0xff] }
 0x2da   : >> { %v1993_v15 = vmax.f32 %v1989_v5, 0.0  ;;  %6003 = vmatpush3.bf16.msra.mxu1 %v6002_v3  ;;  %v6011_v62 = vpack.c.bf16 %v798_v12, %v797_v55  ;;  %v830_v49 = vadd.f32 %v828_v10, %v6563_v41  ;;  %v831_v50 = vadd.f32 %v829_v6, %v6561_v40  ;;  %v4955_v55 = vld [vmem:[#allocation2 + $0x22] ss:$0 sm:$0xff] }
 0x2db   : >> { %6004 = vmatprep.subr.bf16.mxu1 %v7548_v0  ;;  %v861_v53 = vadd.f32 %v859_v22, %v857_v47  ;;  %v862_v56 = vadd.f32 %v860_v21, %v858_v18  ;;  %v855_v7 = vadd.f32 %v853_v13, %v851_v9  ;;  %v856_v2 = vadd.f32 %v854_v17, %v852_v19  ;;  %v4958_v19 = vld [vmem:[#allocation2 + $0x24] ss:$0 sm:$0xff]  ;;  %v5451_v47 = vpop.f32.mrb[6].mxu0 }
 0x2dc   : >> { %v6005_v20 = vpack.c.bf16 %v1994_v8, %v1993_v15  ;;  %v832_v3 = vmax.f32 %v830_v49, 0.0  ;;  %v833_v5 = vmax.f32 %v831_v50, 0.0  ;;  %v1167_v12 = vmul.f32 %v6858_v57, %v6559_v39  ;;  %590 = vst [vmem:[#allocation2 + $0x38] sm:$0xff] %v5451_v47  ;;  %v574_v50 = vpop.f32.mrb[7].mxu0 }
 0x2dd   : >> { %v863_v58 = vmax.f32 %v855_v7, %v861_v53  ;;  %v864_v59 = vmax.f32 %v856_v2, %v862_v56  ;;  %v1175_v9 = vmul.f32 %v4955_v55, %v6557_v38  ;;  %v1201_v13 = vmul.f32 %v4955_v55, %v6555_v37  ;;  %589 = vst [vmem:[#allocation2 + $0x30] sm:$0xff] %v574_v50 }
 0x2de   : >> { %6006 = vmatpush3.bf16.msra.mxu1 %v6005_v20  ;;  %v6019_v8 = vpack.c.bf16 %v833_v5, %v832_v3  ;;  %v4954_v20 = vld [vmem:[#allocation2 + $0x21] ss:$0 sm:$0xff]  ;;  %v1202_v17 = vmul.f32 %v4955_v55, %v6559_v39  ;;  %v1204_v49 = vmul.f32 %v4957_v27, %v6557_v38  ;;  %v1207_v7 = vmul.f32 %v4957_v27, %v6555_v37  ;;  %v4960_v3 = vld [vmem:[#allocation2 + $0x25] ss:$0 sm:$0xff] }
 0x2df   : >> { %6008 = vmatprep.subr.bf16.mxu1 %v6743_v61  ;;  %v865_v63 = vadd.f32 %v863_v58, %v6563_v41  ;;  %v1168_v10 = vmul.f32 %v4954_v20, %v6553_v36  ;;  %v1169_v6 = vmul.f32 %v4954_v20, %v6557_v38  ;;  %v1172_v22 = vmul.f32 %v4954_v20, %v6555_v37 }
 0x2e0   : >> { %v1173_v21 = vmul.f32 %v4954_v20, %v6559_v39  ;;  %v1208_v2 = vmul.f32 %v4957_v27, %v6559_v39  ;;  %v1206_v58 = vadd.f32 %v1204_v49, %v1202_v17 }
 0x2e1   : >> { %5517 = vmatmul.mubr.msk.f32.vlgmr.msra.gmra.mrb[16].mxu1 %vm1610_vm10, %v1995_v11  ;;  %v867_v52 = vmax.f32 %v865_v63, 0.0  ;;  %v1174_v11 = vmul.f32 %v4955_v55, %v6553_v36  ;;  %v1171_v18 = vadd.f32 %v1169_v6, %v1167_v12  ;;  %v7014_v63 = vpop.f32.mrb[8].mxu0  ;;  %v4961_v12 = vld [vmem:[#allocation2 + $0x26] ss:$0 sm:$0xff] }
 0x2e2   : >> { %6010 = vmatpush3.bf16.msra.mxu1 %v6743_v61  ;;  %5527 = vmatprep.mubr.msk.f32.mxu1 %vm1610_vm10, %v6520_v23  ;;  %v866_v61 = vadd.f32 %v864_v59, %v6561_v40  ;;  %v1177_v56 = vadd.f32 %v1175_v9, %v1173_v21  ;;  %v1209_v59 = vmul.f32 %v4958_v19, %v6553_v36  ;;  %v7018_v20 = vpop.f32.mrb[9].mxu0 }
 0x2e3   : >> { %6012 = vmatprep.subr.bf16.mxu1 %v6011_v62  ;;  %v1176_v53 = vadd.f32 %v1174_v11, %v1172_v22  ;;  %v7022_v6 = vpop.f32.mrb[10].mxu0  ;;  %v1242_v11 = vmul.f32 %v4960_v3, %v6555_v37  ;;  %v1243_v9 = vmul.f32 %v4960_v3, %v6559_v39 }
 0x2e4   : >> { %v868_v1 = vmax.f32 %v866_v61, 0.0  ;;  %v1211_v55 = vadd.f32 %v1209_v59, %v1207_v7 }
 0x2e6   : >> { %6014 = vmatpush3.bf16.msra.mxu1 %v6011_v62  ;;  %v6027_v15 = vpack.c.bf16 %v868_v1, %v867_v52  ;;  %v1179_v52 = vmax.f32 %v1171_v18, %v1177_v56  ;;  %v1236_v1 = vmul.f32 %v4958_v19, %v6555_v37  ;;  %v4963_v18 = vld [vmem:[#allocation2 + $0x27] ss:$0 sm:$0xff]  ;;  %v1245_v56 = vmul.f32 %v4961_v12, %v6557_v38 }
 0x2e7   : >> { %6016 = vmatprep.subr.bf16.mxu1 %v6011_v62 }
 0x2e8   : >> { %v1181_v21 = vadd.f32 %v1179_v52, %v6561_v40  ;;  %v4964_v52 = vld [vmem:[#allocation2 + $0x28] ss:$0 sm:$0xff] }
 0x2e9   : >> { %5528 = vmatmul.mubr.msk.f32.vlgmr.msra.gmra.mrb[18].mxu1 %vm1610_vm10, %v6525_v24 }
 0x2ea   : >> { %6018 = vmatpush3.bf16.msra.mxu1 %v6011_v62  ;;  %5530 = vmatprep.mubr.msk.f32.mxu1 %vm1610_vm10, %v6530_v25  ;;  %v1203_v62 = vmul.f32 %v4957_v27, %v6553_v36  ;;  %v1238_v27 = vmul.f32 %v4960_v3, %v6553_v36  ;;  %v1183_v50 = vmax.f32 %v1181_v21, 0.0 }
 0x2eb   : >> { %6020 = vmatprep.subr.bf16.mxu1 %v6019_v8 }
 0x2ec   : >> { %v1205_v5 = vadd.f32 %v1203_v62, %v1201_v13  ;;  %v1240_v47 = vadd.f32 %v1238_v27, %v1236_v1  ;;  %v1273_v1 = vmul.f32 %v4963_v18, %v6553_v36  ;;  %v1274_v27 = vmul.f32 %v4963_v18, %v6557_v38 }
 0x2ed   : >> { %5531 = vmatmul.mubr.msk.f32.gmra.mrb[20].mxu1 %vm1610_vm10, %v6535_v26 }
 0x2ee   : >> { %6022 = vmatpush3.bf16.msra.mxu1 %v6019_v8  ;;  %5541 = vmatprep.mubr.msk.f32.mxu1 %vm1610_vm10, %v6520_v23  ;;  %v1213_v13 = vmax.f32 %v1205_v5, %v1211_v55  ;;  %v1271_v5 = vmul.f32 %v4961_v12, %v6555_v37 }
 0x2ef   : >> { %6024 = vmatprep.subr.bf16.mxu1 %v6019_v8 }
 0x2f1   : >> { %5542 = vmatmul.mubr.msk.f32.vlgmr.msra.gmra.mrb[22].mxu1 %vm1610_vm10, %v6525_v24 }
 0x2f2   : >> { %6026 = vmatpush3.bf16.msra.mxu1 %v6019_v8  ;;  %5544 = vmatprep.mubr.msk.f32.mxu1 %vm1610_vm10, %v6530_v25  ;;  %v1210_v8 = vmul.f32 %v4958_v19, %v6557_v38 }
 0x2f3   : >> { %6028 = vmatprep.subr.bf16.mxu1 %v6027_v15 }
 0x2f5   : >> { %5545 = vmatmul.mubr.msk.f32.gmra.mrb[24].mxu1 %vm1610_vm10, %v6535_v26 }
 0x2f6   : >> { %6030 = vmatpush3.bf16.msra.mxu1 %v6027_v15  ;;  %5555 = vmatprep.mubr.msk.f32.mxu1 %vm1610_vm10, %v6520_v23 }
 0x2f7   : >> { %6032 = vmatprep.subr.bf16.mxu1 %v6027_v15 }
 0x2f9   : >> { %5556 = vmatmul.mubr.msk.f32.vlgmr.msra.gmra.mrb[26].mxu1 %vm1610_vm10, %v6525_v24 }
 0x2fa   : >> { %6034 = vmatpush3.bf16.msra.mxu1 %v6027_v15  ;;  %5558 = vmatprep.mubr.msk.f32.mxu1 %vm1610_vm10, %v6530_v25  ;;  %v1237_v15 = vmul.f32 %v4958_v19, %v6559_v39  ;;  %v7028_v19 = vpop.f32.mrb[11].mxu0 }
 0x2fb   : >> { %6036 = vmatprep.subr.bf16.mxu1 %v6779_v51  ;;  %v7030_v62 = vpop.f32.mrb[12].mxu0 }
 0x2fc   : >> { %v7034_v7 = vpop.f32.mrb[13].mxu0 }
 0x2fd   : >> { %5559 = vmatmul.mubr.msk.f32.gmra.mrb[28].mxu1 %vm1610_vm10, %v6535_v26 }
 0x2fe   : >> { %6038 = vmatpush3.bf16.msra.mxu1 %v6779_v51  ;;  %5569 = vmatprep.mubr.msk.f32.mxu1 %vm1610_vm10, %v6520_v23  ;;  %v1166_v51 = vmul.f32 %v6858_v57, %v6555_v37 }
 0x2ff   : >> { %6039 = vmatprep.subr.bf16.mxu1 %v7548_v0 }
 0x300   : >> { %v1170_v57 = vadd.f32 %v1168_v10, %v1166_v51  ;;  %v1212_v51 = vadd.f32 %v1210_v8, %v1208_v2  ;;  %v1239_v10 = vmul.f32 %v4960_v3, %v6557_v38  ;;  %v1215_v2 = vadd.f32 %v1213_v13, %v6563_v41 }
 0x301   : >> { %5570 = vmatmul.mubr.msk.f32.vlgmr.msra.gmra.mrb[30].mxu1 %vm1610_vm10, %v6525_v24  ;;  %v1275_v13 = vadd.f32 %v1273_v1, %v1271_v5  ;;  %v4967_v5 = vld [vmem:[#allocation2 + $0x2a] ss:$0 sm:$0xff] }
 0x302   : >> { %5572 = vmatprep.mubr.msk.f32.mxu1 %vm1610_vm10, %v6530_v25  ;;  %v1178_v61 = vmax.f32 %v1170_v57, %v1176_v53  ;;  %v1214_v17 = vmax.f32 %v1206_v58, %v1212_v51  ;;  %v1241_v57 = vadd.f32 %v1239_v10, %v1237_v15  ;;  %v1244_v53 = vmul.f32 %v4961_v12, %v6553_v36  ;;  %v7043_v15 = vpop.f32.mrb[14].mxu0 }
 0x303   : >> { %v1272_v58 = vmul.f32 %v4961_v12, %v6559_v39  ;;  %v1217_v55 = vmax.f32 %v1215_v2, 0.0  ;;  %v1277_v10 = vmul.f32 %v4963_v18, %v6555_v37  ;;  %v1342_v0 = vmul.f32 %v4967_v5, %v6559_v39 }
 0x304   : >> { %v1180_v22 = vadd.f32 %v1178_v61, %v6563_v41  ;;  %v1216_v3 = vadd.f32 %v1214_v17, %v6561_v40  ;;  %v1246_v8 = vadd.f32 %v1244_v53, %v1242_v11  ;;  %v1247_v61 = vadd.f32 %v1245_v56, %v1243_v9  ;;  %v4966_v9 = vld [vmem:[#allocation2 + $0x29] ss:$0 sm:$0xff] }
 0x305   : >> { %5573 = vmatmul.mubr.msk.f32.gmra.mrb[32].mxu1 %vm1610_vm10, %v6535_v26  ;;  %v1278_v11 = vmul.f32 %v4963_v18, %v6559_v39  ;;  %v1280_v53 = vmul.f32 %v4964_v52, %v6557_v38 }
 0x306   : >> { %5583 = vmatprep.mubr.msk.f32.mxu1 %vm6379_vm11, %v7546_v4  ;;  %v1182_v49 = vmax.f32 %v1180_v22, 0.0  ;;  %v1218_v51 = vmax.f32 %v1216_v3, 0.0  ;;  %v7047_v22 = vpop.f32.mrb[15].mxu0  ;;  %v1248_v12 = vmax.f32 %v1240_v47, %v1246_v8  ;;  %v1249_v21 = vmax.f32 %v1241_v57, %v1247_v61 }
 0x307   : >> { %v1306_v3 = vmul.f32 %v4964_v52, %v6555_v37  ;;  %v1307_v47 = vmul.f32 %v4964_v52, %v6559_v39  ;;  %v1282_v18 = vadd.f32 %v1280_v53, %v1278_v11  ;;  %v1308_v8 = vmul.f32 %v4966_v9, %v6553_v36 }
 0x308   : >> { %v7040_v59 = vpack.c.bf16 %v1183_v50, %v1182_v49  ;;  %v6125_v17 = vpack.c.bf16 %v1218_v51, %v1217_v55  ;;  %v1276_v49 = vadd.f32 %v1274_v27, %v1272_v58  ;;  %v1279_v50 = vmul.f32 %v4964_v52, %v6553_v36  ;;  %v4969_v27 = vld [vmem:[#allocation2 + $0x2b] ss:$0 sm:$0xff] }
 0x309   : >> { %v1250_v56 = vadd.f32 %v1248_v12, %v6563_v41  ;;  %v1251_v2 = vadd.f32 %v1249_v21, %v6561_v40  ;;  %v1309_v58 = vmul.f32 %v4966_v9, %v6557_v38  ;;  %v1312_v55 = vmul.f32 %v4966_v9, %v6555_v37 }
 0x30a   : >> { %6122 = vmatprep.subr.bf16.mxu0 %v7040_v59  ;;  %v1281_v57 = vadd.f32 %v1279_v50, %v1277_v10  ;;  %v1313_v51 = vmul.f32 %v4966_v9, %v6559_v39  ;;  %v1284_v21 = vmax.f32 %v1276_v49, %v1282_v18  ;;  %v1310_v4 = vadd.f32 %v1308_v8, %v1306_v3  ;;  %v4970_v9 = vld [vmem:[#allocation2 + $0x2c] ss:$0 sm:$0xff] }
 0x30b   : >> { %6124 = vmatpush3.bf16.msra.mxu0 %v7040_v59  ;;  %v1252_v61 = vmax.f32 %v1250_v56, 0.0  ;;  %v1253_v1 = vmax.f32 %v1251_v2, 0.0  ;;  %v1311_v52 = vadd.f32 %v1309_v58, %v1307_v47  ;;  %v1314_v11 = vmul.f32 %v4967_v5, %v6553_v36 }
 0x30c   : >> { %6126 = vmatprep.subr.bf16.mxu0 %v6125_v17  ;;  %v1283_v12 = vmax.f32 %v1275_v13, %v1281_v57  ;;  %v1315_v50 = vmul.f32 %v4967_v5, %v6557_v38  ;;  %v1341_v53 = vmul.f32 %v4967_v5, %v6555_v37  ;;  %v1286_v2 = vadd.f32 %v1284_v21, %v6561_v40 }
 0x30d   : >> { %v7062_v10 = vpack.c.bf16 %v1253_v1, %v1252_v61  ;;  %v1343_v13 = vmul.f32 %v4969_v27, %v6553_v36  ;;  %v1316_v49 = vadd.f32 %v1314_v11, %v1312_v55  ;;  %v1344_v47 = vmul.f32 %v4969_v27, %v6557_v38  ;;  %v4972_v61 = vld [vmem:[#allocation2 + $0x2d] ss:$0 sm:$0xff] }
 0x30e   : >> { %v1285_v56 = vadd.f32 %v1283_v12, %v6563_v41  ;;  %v1317_v3 = vadd.f32 %v1315_v50, %v1313_v51  ;;  %v1347_v57 = vmul.f32 %v4969_v27, %v6555_v37  ;;  %v1288_v8 = vmax.f32 %v1286_v2, 0.0 }
 0x30f   : >> { %6128 = vmatpush3.bf16.msra.mxu0 %v6125_v17  ;;  %v1345_v58 = vadd.f32 %v1343_v13, %v1341_v53  ;;  %v1348_v5 = vmul.f32 %v4969_v27, %v6559_v39  ;;  %v1318_v1 = vmax.f32 %v1310_v4, %v1316_v49  ;;  %v1346_v55 = vadd.f32 %v1344_v47, %v1342_v0 }
 0x310   : >> { %6130 = vmatprep.subr.bf16.mxu0 %v6125_v17  ;;  %v1287_v18 = vmax.f32 %v1285_v56, 0.0  ;;  %v1319_v12 = vmax.f32 %v1311_v52, %v1317_v3  ;;  %v1349_v51 = vmul.f32 %v4970_v9, %v6553_v36  ;;  %v1376_v11 = vmul.f32 %v4970_v9, %v6555_v37  ;;  %v4973_v52 = vld [vmem:[#allocation2 + $0x2e] ss:$0 sm:$0xff] }
 0x311   : >> { %v1377_v50 = vmul.f32 %v4970_v9, %v6559_v39  ;;  %v1320_v27 = vadd.f32 %v1318_v1, %v6563_v41  ;;  %v1378_v0 = vmul.f32 %v4972_v61, %v6553_v36  ;;  %v1379_v2 = vmul.f32 %v4972_v61, %v6557_v38 }
 0x312   : >> { %5729 = vmatmul.mubr.msk.f32.vlgmr.msra.gmra.mrb[28].mxu0 %vm1610_vm10, %v6525_v24  ;;  %v7080_v21 = vpack.c.bf16 %v1288_v8, %v1287_v18  ;;  %v1321_v53 = vadd.f32 %v1319_v12, %v6561_v40  ;;  %v1351_v4 = vadd.f32 %v1349_v51, %v1347_v57  ;;  %v1383_v8 = vmul.f32 %v4972_v61, %v6559_v39  ;;  %v4975_v12 = vld [vmem:[#allocation2 + $0x2f] ss:$0 sm:$0xff] }
 0x313   : >> { %6132 = vmatpush3.bf16.msra.mxu0 %v6125_v17  ;;  %5731 = vmatprep.mubr.msk.f32.mxu0 %vm1610_vm10, %v6530_v25  ;;  %v1350_v17 = vmul.f32 %v4970_v9, %v6557_v38  ;;  %v1382_v9 = vmul.f32 %v4972_v61, %v6555_v37  ;;  %v1322_v13 = vmax.f32 %v1320_v27, 0.0  ;;  %v1380_v47 = vadd.f32 %v1378_v0, %v1376_v11 }
 0x314   : >> { %6134 = vmatprep.subr.bf16.mxu0 %v7062_v10  ;;  %v1323_v49 = vmax.f32 %v1321_v53, 0.0  ;;  %v1353_v3 = vmax.f32 %v1345_v58, %v1351_v4  ;;  %v1381_v18 = vadd.f32 %v1379_v2, %v1377_v50  ;;  %v1384_v1 = vmul.f32 %v4973_v52, %v6553_v36 }
 0x315   : >> { %v1352_v56 = vadd.f32 %v1350_v17, %v1348_v5  ;;  %v1385_v17 = vmul.f32 %v4973_v52, %v6557_v38  ;;  %v1411_v27 = vmul.f32 %v4973_v52, %v6555_v37  ;;  %v1412_v11 = vmul.f32 %v4973_v52, %v6559_v39 }
 0x316   : >> { %5732 = vmatmul.mubr.msk.f32.gmra.mrb[30].mxu0 %vm1610_vm10, %v6535_v26  ;;  %v6149_v5 = vpack.c.bf16 %v1323_v49, %v1322_v13  ;;  %v1355_v51 = vadd.f32 %v1353_v3, %v6563_v41  ;;  %v1386_v61 = vadd.f32 %v1384_v1, %v1382_v9  ;;  %v1413_v4 = vmul.f32 %v4975_v12, %v6553_v36  ;;  %v4978_v1 = vld [vmem:[#allocation2 + $0x31] ss:$0 sm:$0xff] }
 0x317   : >> { %6136 = vmatpush3.bf16.msra.mxu0 %v7062_v10  ;;  %5742 = vmatprep.mubr.msk.f32.mxu0 %vm1610_vm10, %v6520_v23  ;;  %v1354_v57 = vmax.f32 %v1346_v55, %v1352_v56  ;;  %v4976_v55 = vld [vmem:[#allocation2 + $0x30] ss:$0 sm:$0xff]  ;;  %v1387_v53 = vadd.f32 %v1385_v17, %v1383_v8  ;;  %v1414_v0 = vmul.f32 %v4975_v12, %v6557_v38 }
 0x318   : >> { %6146 = vmatprep.subr.bf16.mxu0 %v7080_v21  ;;  %v1357_v50 = vmax.f32 %v1355_v51, 0.0  ;;  %v1388_v2 = vmax.f32 %v1380_v47, %v1386_v61  ;;  %v1417_v13 = vmul.f32 %v4975_v12, %v6555_v37  ;;  %v1418_v49 = vmul.f32 %v4975_v12, %v6559_v39 }
 0x319   : >> { %v1356_v58 = vadd.f32 %v1354_v57, %v6561_v40  ;;  %v1389_v9 = vmax.f32 %v1381_v18, %v1387_v53  ;;  %v1415_v3 = vadd.f32 %v1413_v4, %v1411_v27  ;;  %v1416_v57 = vadd.f32 %v1414_v0, %v1412_v11  ;;  %v4979_v11 = vld [vmem:[#allocation2 + $0x32] ss:$0 sm:$0xff] }
 0x31a   : >> { %5743 = vmatmul.mubr.msk.f32.vlgmr.msra.gmra.mrb[32].mxu0 %vm1610_vm10, %v6525_v24  ;;  %v1419_v52 = vmul.f32 %v4976_v55, %v6553_v36  ;;  %v1390_v47 = vadd.f32 %v1388_v2, %v6563_v41  ;;  %v1420_v51 = vmul.f32 %v4976_v55, %v6557_v38  ;;  %v1446_v18 = vmul.f32 %v4976_v55, %v6555_v37 }
 0x31b   : >> { %6148 = vmatpush3.bf16.msra.mxu0 %v7080_v21  ;;  %5745 = vmatprep.mubr.msk.f32.mxu0 %vm1610_vm10, %v6530_v25  ;;  %v1358_v56 = vmax.f32 %v1356_v58, 0.0  ;;  %v1391_v12 = vadd.f32 %v1389_v9, %v6561_v40  ;;  %v1447_v27 = vmul.f32 %v4976_v55, %v6559_v39  ;;  %v1448_v53 = vmul.f32 %v4978_v1, %v6553_v36 }
 0x31c   : >> { %6150 = vmatprep.subr.bf16.mxu0 %v6149_v5  ;;  %v1421_v17 = vadd.f32 %v1419_v52, %v1417_v13  ;;  %v1392_v58 = vmax.f32 %v1390_v47, 0.0  ;;  %v1422_v61 = vadd.f32 %v1420_v51, %v1418_v49  ;;  %v1453_v2 = vmul.f32 %v4978_v1, %v6559_v39  ;;  %v4981_v51 = vld [vmem:[#allocation2 + $0x33] ss:$0 sm:$0xff] }
 0x31d   : >> { %v7117_v8 = vpack.c.bf16 %v1358_v56, %v1357_v50  ;;  %v1449_v50 = vmul.f32 %v4978_v1, %v6557_v38  ;;  %v1393_v4 = vmax.f32 %v1391_v12, 0.0  ;;  %v1452_v56 = vmul.f32 %v4978_v1, %v6555_v37  ;;  %v4982_v12 = vld [vmem:[#allocation2 + $0x34] ss:$0 sm:$0xff] }
 0x31e   : >> { %5746 = vmatmul.mubr.msk.f32.gmra.mrb[34].mxu0 %vm1610_vm10, %v6535_v26  ;;  %v1423_v0 = vmax.f32 %v1415_v3, %v1421_v17  ;;  %v1424_v55 = vmax.f32 %v1416_v57, %v1422_v61  ;;  %v1450_v13 = vadd.f32 %v1448_v53, %v1446_v18  ;;  %v1454_v47 = vmul.f32 %v4979_v11, %v6553_v36 }
 0x31f   : >> { %6152 = vmatpush3.bf16.msra.mxu0 %v6149_v5  ;;  %5770 = vmatprep.mubr.msk.f32.mxu0 %vm1610_vm10, %v6520_v23  ;;  %v1451_v49 = vadd.f32 %v1449_v50, %v1447_v27  ;;  %v7133_v9 = vpack.c.bf16 %v1393_v4, %v1392_v58  ;;  %v1455_v3 = vmul.f32 %v4979_v11, %v6557_v38 }
 0x320   : >> { %6160 = vmatprep.subr.bf16.mxu0 %v6149_v5  ;;  %v1425_v52 = vadd.f32 %v1423_v0, %v6563_v41  ;;  %v1426_v1 = vadd.f32 %v1424_v55, %v6561_v40  ;;  %v1481_v17 = vmul.f32 %v4979_v11, %v6555_v37  ;;  %v1456_v27 = vadd.f32 %v1454_v47, %v1452_v56 }
 0x321   : >> { %v1457_v58 = vadd.f32 %v1455_v3, %v1453_v2  ;;  %v1482_v61 = vmul.f32 %v4979_v11, %v6559_v39  ;;  %v1483_v50 = vmul.f32 %v4981_v51, %v6553_v36  ;;  %v1484_v4 = vmul.f32 %v4981_v51, %v6557_v38 }
 0x322   : >> { %5771 = vmatmul.mubr.msk.f32.vlgmr.msra.gmra.mrb[36].mxu0 %vm1610_vm10, %v6525_v24  ;;  %v1427_v18 = vmax.f32 %v1425_v52, 0.0  ;;  %v1428_v53 = vmax.f32 %v1426_v1, 0.0  ;;  %v1487_v0 = vmul.f32 %v4981_v51, %v6555_v37  ;;  %v1458_v55 = vmax.f32 %v1450_v13, %v1456_v27 }
 0x323   : >> { %6162 = vmatpush3.bf16.msra.mxu0 %v6149_v5  ;;  %5773 = vmatprep.mubr.msk.f32.mxu0 %vm1610_vm10, %v6530_v25  ;;  %v1459_v52 = vmax.f32 %v1451_v49, %v1457_v58  ;;  %v1488_v56 = vmul.f32 %v4981_v51, %v6559_v39  ;;  %v1489_v11 = vmul.f32 %v4982_v12, %v6553_v36  ;;  %v4984_v49 = vld [vmem:[#allocation2 + $0x35] ss:$0 sm:$0xff] }
 0x324   : >> { %6164 = vmatprep.subr.bf16.mxu0 %v7117_v8  ;;  %v7156_v2 = vpack.c.bf16 %v1428_v53, %v1427_v18  ;;  %v1485_v47 = vadd.f32 %v1483_v50, %v1481_v17  ;;  %v1486_v3 = vadd.f32 %v1484_v4, %v1482_v61  ;;  %v1490_v1 = vmul.f32 %v4982_v12, %v6557_v38  ;;  %v4985_v18 = vld [vmem:[#allocation2 + $0x36] ss:$0 sm:$0xff] }
 0x325   : >> { %v1460_v57 = vadd.f32 %v1458_v55, %v6563_v41  ;;  %v1461_v5 = vadd.f32 %v1459_v52, %v6561_v40  ;;  %v1491_v28 = vadd.f32 %v1489_v11, %v1487_v0  ;;  %v1516_v27 = vmul.f32 %v4982_v12, %v6555_v37 }
 0x326   : >> { %5774 = vmatmul.mubr.msk.f32.gmra.mrb[38].mxu0 %vm1610_vm10, %v6535_v26  ;;  %v1492_v51 = vadd.f32 %v1490_v1, %v1488_v56  ;;  %v1517_v50 = vmul.f32 %v4982_v12, %v6559_v39  ;;  %v1518_v0 = vmul.f32 %v4984_v49, %v6553_v36  ;;  %v1519_v55 = vmul.f32 %v4984_v49, %v6557_v38 }
 0x327   : >> { %6166 = vmatpush3.bf16.msra.mxu0 %v7117_v8  ;;  %5795 = vmatprep.mubr.msk.f32.mxu0 %vm1610_vm10, %v6520_v23  ;;  %v1462_v58 = vmax.f32 %v1460_v57, 0.0  ;;  %v1463_v61 = vmax.f32 %v1461_v5, 0.0  ;;  %v1493_v53 = vmax.f32 %v1485_v47, %v1491_v28  ;;  %v1522_v52 = vmul.f32 %v4984_v49, %v6555_v37  ;;  %v4987_v5 = vld [vmem:[#allocation2 + $0x37] ss:$0 sm:$0xff] }
 0x328   : >> { %6176 = vmatprep.subr.bf16.mxu0 %v7133_v9  ;;  %v1494_v4 = vmax.f32 %v1486_v3, %v1492_v51  ;;  %v1523_v57 = vmul.f32 %v4984_v49, %v6559_v39  ;;  %v1524_v28 = vmul.f32 %v4985_v18, %v6553_v36  ;;  %v1520_v47 = vadd.f32 %v1518_v0, %v1516_v27 }
 0x329   : >> { %v7178_v56 = vpack.c.bf16 %v1463_v61, %v1462_v58  ;;  %v1495_v11 = vadd.f32 %v1493_v53, %v6563_v41  ;;  %v1521_v3 = vadd.f32 %v1519_v55, %v1517_v50  ;;  %v1525_v51 = vmul.f32 %v4985_v18, %v6557_v38  ;;  %v7190_v53 = vld [vmem:[#allocation2 + $0x38] ss:$0 sm:$0xff] }
 0x32a   : >> { %5796 = vmatmul.mubr.msk.f32.vlgmr.msra.gmra.mrb[40].mxu0 %vm1610_vm10, %v6525_v24  ;;  %v1496_v12 = vadd.f32 %v1494_v4, %v6561_v40  ;;  %v1526_v58 = vadd.f32 %v1524_v28, %v1522_v52  ;;  %v1551_v49 = vmul.f32 %v4985_v18, %v6555_v37  ;;  %v1552_v17 = vmul.f32 %v4985_v18, %v6559_v39 }
 0x32b   : >> { %6178 = vmatpush3.bf16.msra.mxu0 %v7133_v9  ;;  %5798 = vmatprep.mubr.msk.f32.mxu0 %vm1610_vm10, %v6530_v25  ;;  %v1497_v1 = vmax.f32 %v1495_v11, 0.0  ;;  %v1553_v13 = vmul.f32 %v4987_v5, %v6553_v36  ;;  %v1554_v29 = vmul.f32 %v4987_v5, %v6557_v38  ;;  %v1527_v27 = vadd.f32 %v1525_v51, %v1523_v57 }
 0x32c   : >> { %6180 = vmatprep.subr.bf16.mxu0 %v7156_v2  ;;  %v1498_v61 = vmax.f32 %v1496_v12, 0.0  ;;  %v1528_v50 = vmax.f32 %v1520_v47, %v1526_v58  ;;  %v1557_v4 = vmul.f32 %v4987_v5, %v6555_v37  ;;  %v1558_v0 = vmul.f32 %v4987_v5, %v6559_v39 }
 0x32d   : >> { %v1555_v18 = vadd.f32 %v1553_v13, %v1551_v49  ;;  %v1556_v52 = vadd.f32 %v1554_v29, %v1552_v17  ;;  %v1529_v11 = vmax.f32 %v1521_v3, %v1527_v27  ;;  %v1559_v12 = vmul.f32 %v7190_v53, %v6553_v36 }
 0x32e   : >> { %5799 = vmatmul.mubr.msk.f32.gmra.mrb[42].mxu0 %vm1610_vm10, %v6535_v26  ;;  %v6201_v55 = vpack.c.bf16 %v1498_v61, %v1497_v1  ;;  %v1530_v28 = vadd.f32 %v1528_v50, %v6563_v41  ;;  %v1560_v57 = vmul.f32 %v7190_v53, %v6557_v38 }
 0x32f   : >> { %6182 = vmatpush3.bf16.msra.mxu0 %v7156_v2  ;;  %5823 = vmatprep.mubr.msk.f32.mxu0 %vm1610_vm10, %v6520_v23  ;;  %v1531_v5 = vadd.f32 %v1529_v11, %v6561_v40  ;;  %v1561_v51 = vadd.f32 %v1559_v12, %v1557_v4 }
 0x330   : >> { %6198 = vmatprep.subr.bf16.mxu0 %v7178_v56  ;;  %v1532_v47 = vmax.f32 %v1530_v28, 0.0  ;;  %v1562_v1 = vadd.f32 %v1560_v57, %v1558_v0 }
 0x331   : >> { %v1533_v29 = vmax.f32 %v1531_v5, 0.0  ;;  %v1563_v13 = vmax.f32 %v1555_v18, %v1561_v51 }
 0x332   : >> { %5824 = vmatmul.mubr.msk.f32.vlgmr.msra.gmra.mrb[44].mxu0 %vm1610_vm10, %v6525_v24  ;;  %v1564_v17 = vmax.f32 %v1556_v52, %v1562_v1 }
 0x333   : >> { %6200 = vmatpush3.bf16.msra.mxu0 %v7178_v56  ;;  %5826 = vmatprep.mubr.msk.f32.mxu0 %vm1610_vm10, %v6530_v25  ;;  %v7214_v3 = vpack.c.bf16 %v1533_v29, %v1532_v47  ;;  %v1565_v58 = vadd.f32 %v1563_v13, %v6563_v41 }
 0x334   : >> { %6202 = vmatprep.subr.bf16.mxu0 %v6201_v55  ;;  %v1566_v49 = vadd.f32 %v1564_v17, %v6561_v40 }
 0x335   : >> { %v1567_v61 = vmax.f32 %v1565_v58, 0.0 }
 0x336   : >> { %5827 = vmatmul.mubr.msk.f32.gmra.mrb[46].mxu0 %vm1610_vm10, %v6535_v26  ;;  %v1568_v27 = vmax.f32 %v1566_v49, 0.0 }
 0x337   : >> { %6204 = vmatpush3.bf16.msra.mxu0 %v6201_v55  ;;  %5862 = vmatprep.mubr.msk.f32.mxu0 %vm1610_vm10, %v6520_v23 }
 0x338   : >> { %6206 = vmatprep.subr.bf16.mxu0 %v6201_v55  ;;  %v7223_v50 = vpack.c.bf16 %v1568_v27, %v1567_v61 }
 0x33a   : >> { %5863 = vmatmul.mubr.msk.f32.vlgmr.msra.gmra.mrb[48].mxu0 %vm1610_vm10, %v6525_v24 }
 0x33b   : >> { %6208 = vmatpush3.bf16.msra.mxu0 %v6201_v55  ;;  %5865 = vmatprep.mubr.msk.f32.mxu0 %vm1610_vm10, %v6530_v25 }
 0x33c   : >> { %6210 = vmatprep.subr.bf16.mxu0 %v7214_v3 }
 0x33e   : >> { %5866 = vmatmul.mubr.msk.f32.gmra.mrb[50].mxu0 %vm1610_vm10, %v6535_v26 }
 0x33f   : >> { %6212 = vmatpush3.bf16.msra.mxu0 %v7214_v3  ;;  %5876 = vmatprep.mubr.msk.f32.mxu0 %vm1610_vm10, %v6520_v23 }
 0x340   : >> { %6222 = vmatprep.subr.bf16.mxu0 %v7223_v50 }
 0x342   : >> { %5877 = vmatmul.mubr.msk.f32.vlgmr.msra.gmra.mrb[52].mxu0 %vm1610_vm10, %v6525_v24 }
 0x343   : >> { %6224 = vmatpush3.bf16.msra.mxu0 %v7223_v50  ;;  %5879 = vmatprep.mubr.msk.f32.mxu0 %vm1610_vm10, %v6530_v25 }
 0x346   : >> { %5880 = vmatmul.mubr.msk.f32.gmra.mrb[54].mxu0 %vm1610_vm10, %v6535_v26 }
 0x347   : >> { %5904 = vmatprep.mubr.msk.f32.mxu0 %vm1610_vm10, %v6520_v23 }
 0x3bc   : >> { %v5529_v4 = vpop.f32.mrb[18].mxu1 }
 0x3bd   : >> { %v2140_v0 = vpop.f32.mrb[19].mxu1 }
 0x3c0   : >> { %v5532_v55 = vpop.f32.mrb[20].mxu1 }
 0x3c1   : >> { %v2150_v18 = vpop.f32.mrb[21].mxu1 }
 0x3c4   : >> { %v5543_v52 = vpop.f32.mrb[22].mxu1 }
 0x3c5   : >> { %v2249_v11 = vmax.f32 %v5529_v4, %v5543_v52  ;;  %v2229_v28 = vpop.f32.mrb[23].mxu1 }
 0x3c6   : >> { %v2248_v12 = vmax.f32 %v2140_v0, %v2229_v28 }
 0x3c8   : >> { %v5546_v57 = vpop.f32.mrb[24].mxu1 }
 0x3c9   : >> { %v2251_v5 = vmax.f32 %v5532_v55, %v5546_v57  ;;  %v2239_v47 = vpop.f32.mrb[25].mxu1 }
 0x3ca   : >> { %v2250_v51 = vmax.f32 %v2150_v18, %v2239_v47 }
 0x3cc   : >> { %v5557_v1 = vpop.f32.mrb[26].mxu1 }
 0x3cd   : >> { %v2342_v29 = vmax.f32 %v2249_v11, %v5557_v1  ;;  %v2322_v13 = vpop.f32.mrb[27].mxu1 }
 0x3ce   : >> { %v2341_v17 = vmax.f32 %v2248_v12, %v2322_v13  ;;  %v4990_v13 = vld [vmem:[#allocation2 + $0x39] ss:$0 sm:$0xff] }
 0x3d0   : >> { %v5560_v58 = vpop.f32.mrb[28].mxu1 }
 0x3d1   : >> { %v2344_v49 = vmax.f32 %v2251_v5, %v5560_v58  ;;  %v2332_v61 = vpop.f32.mrb[29].mxu1  ;;  %v1587_v58 = vmul.f32 %v7190_v53, %v6559_v39 }
 0x3d2   : >> { %v2343_v27 = vmax.f32 %v2250_v51, %v2332_v61  ;;  %v1588_v61 = vmul.f32 %v4990_v13, %v6553_v36 }
 0x3d4   : >> { %v5571_v30 = vpop.f32.mrb[30].mxu1 }
 0x3d5   : >> { %v2435_v31 = vmax.f32 %v2342_v29, %v5571_v30  ;;  %v2415_v32 = vpop.f32.mrb[31].mxu1  ;;  %v7566_v30 = vmov 0.0|0.0  }
 0x3d6   : >> { %v2434_v33 = vmax.f32 %v2341_v17, %v2415_v32  ;;  %v4991_v17 = vld [vmem:[#allocation2 + $0x3a] ss:$0 sm:$0xff] }
 0x3d7   : >> { %v2439_v4 = vadd.f32 %v2435_v31, %v6565_v42  ;;  %v5025_v31 = vld [vmem:[%s7543_s5 + $0x8] sm:$0xff] }
 0x3d8   : >> { %v2438_v0 = vadd.f32 %v2434_v33, %v6567_v43  ;;  %v5574_v52 = vpop.f32.mrb[32].mxu1  ;;  %v7567_v33 = vmov 0.0  }
 0x3d9   : >> { %v2443_v55 = vmax.f32 %v2439_v4, 0.0  ;;  %v2437_v28 = vmax.f32 %v2344_v49, %v5574_v52  ;;  %v2425_v18 = vpop.f32.mrb[33].mxu1  ;;  %v1592_v4 = vmul.f32 %v4990_v13, %v6555_v37 }
 0x3da   : >> { %v2442_v57 = vmax.f32 %v2438_v0, 0.0  ;;  %v2436_v11 = vmax.f32 %v2343_v27, %v2425_v18  ;;  %v1589_v27 = vmul.f32 %v4990_v13, %v6557_v38  ;;  %v1593_v0 = vmul.f32 %v4990_v13, %v6559_v39 }
 0x3db   : >> { %v2441_v12 = vadd.f32 %v2437_v28, %v6569_v44  ;;  %v1595_v28 = vmul.f32 %v4991_v17, %v6557_v38 }
 0x3dc   : >> { %v6040_v47 = vpack.c.bf16 %v2443_v55, %v2442_v57  ;;  %v2440_v5 = vadd.f32 %v2436_v11, %v6571_v45  ;;  %v1594_v55 = vmul.f32 %v4991_v17, %v6553_v36  ;;  %v1591_v57 = vadd.f32 %v1589_v27, %v1587_v58 }
 0x3dd   : >> { %v2445_v51 = vmax.f32 %v2441_v12, 0.0  ;;  %v1597_v12 = vadd.f32 %v1595_v28, %v1593_v0  ;;  %v7569_v0 = vmax.f32 %v7018_v20, %v7034_v7 }
 0x3de   : >> { %v2444_v1 = vmax.f32 %v2440_v5, 0.0  ;;  %6041 = vmatpush3.bf16.msra.mxu1 %v6040_v47  ;;  %v1596_v11 = vadd.f32 %v1594_v55, %v1592_v4 }
 0x3df   : >> { %6042 = vmatprep.subr.bf16.mxu1 %v7566_v30 }
 0x3e0   : >> { %v6043_v32 = vpack.c.bf16 %v2445_v51, %v2444_v1 }
 0x3e2   : >> { %6044 = vmatpush3.bf16.msra.mxu1 %v6043_v32 }
 0x3e3   : >> { %6062 = vmatprep.subr.bf16.mxu1 %v6814_v16 }
 0x3e5   : >> { %5584 = vmatmul.mubr.msk.f32.vlgmr.msra.gmra.mrb[16].mxu1 %vm1610_vm10, %v5025_v31 }
 0x3e6   : >> { %6064 = vmatpush3.bf16.msra.mxu1 %v6814_v16  ;;  %5622 = vmatprep.mubr.msk.f32.mxu1 %vm1610_vm10, %v6520_v23  ;;  %v5638_v16 = vpop.f32.mrb[16].mxu0 }
 0x3e7   : >> { %6066 = vmatprep.subr.bf16.mxu1 %v6833_v60  ;;  %v2867_v29 = vpop.f32.mrb[17].mxu0 }
 0x3e8   : >> { %v5641_v49 = vpop.f32.mrb[18].mxu0 }
 0x3e9   : >> { %v2877_v52 = vpop.f32.mrb[19].mxu0 }
 0x3ea   : >> { %6068 = vmatpush3.bf16.msra.mxu1 %v6833_v60  ;;  %v1586_v60 = vmul.f32 %v7190_v53, %v6555_v37  ;;  %v1599_v53 = vmax.f32 %v1591_v57, %v1597_v12  ;;  %v7280_v13 = vpop.f32.mrb[20].mxu0  ;;  %v7570_v12 = vmax.f32 %v7022_v6, %v7043_v15 }
 0x3eb   : >> { %6077 = vmatprep.subr.bf16.mxu1 %v7566_v30  ;;  %v7282_v17 = vpop.f32.mrb[21].mxu0 }
 0x3ec   : >> { %v1590_v18 = vadd.f32 %v1588_v61, %v1586_v60  ;;  %v1601_v51 = vadd.f32 %v1599_v53, %v6561_v40  ;;  %v7284_v60 = vpop.f32.mrb[22].mxu0  ;;  %v7568_v61 = vmax.f32 %v7014_v63, %v7030_v62  ;;  %v7571_v63 = vmax.f32 %v7028_v19, %v7047_v22  ;;  %v5043_v19 = vld [vmem:[%s7543_s5 + $0x10] sm:$0xff] }
 0x3ed   : >> { %5623 = vmatmul.mubr.msk.f32.vlgmr.msra.gmra.mrb[34].mxu1 %vm1610_vm10, %v6525_v24 }
 0x3ee   : >> { %5625 = vmatprep.mubr.msk.f32.mxu1 %vm1610_vm10, %v6530_v25  ;;  %v1598_v47 = vmax.f32 %v1590_v18, %v1596_v11  ;;  %v1603_v32 = vmax.f32 %v1601_v51, 0.0 }
 0x3f0   : >> { %v1600_v5 = vadd.f32 %v1598_v47, %v6563_v41 }
 0x3f1   : >> { %5626 = vmatmul.mubr.msk.f32.gmra.mrb[36].mxu1 %vm1610_vm10, %v6535_v26 }
 0x3f2   : >> { %5650 = vmatprep.mubr.msk.f32.mxu1 %vm6379_vm11, %v7567_v33  ;;  %v1602_v1 = vmax.f32 %v1600_v5, 0.0 }
 0x3f4   : >> { %v6225_v31 = vpack.c.bf16 %v1603_v32, %v1602_v1 }
 0x3f6   : >> { %6226 = vmatprep.subr.bf16.mxu0 %v6225_v31 }
 0x3f7   : >> { %6228 = vmatpush3.bf16.msra.mxu0 %v6225_v31 }
 0x3fa   : >> { %5905 = vmatmul.mubr.msk.f32.vlgmr.msra.gmra.mrb[56].mxu0 %vm1610_vm10, %v6525_v24 }
 0x3fb   : >> { %5907 = vmatprep.mubr.msk.f32.mxu0 %vm1610_vm10, %v6530_v25 }
 0x3fe   : >> { %5908 = vmatmul.mubr.msk.f32.gmra.mrb[58].mxu0 %vm1610_vm10, %v6535_v26 }
 0x4c0   : >> { %v5624_v58 = vpop.f32.mrb[34].mxu1 }
 0x4c1   : >> { %v2794_v27 = vmax.f32 %v7568_v61, %v5624_v58  ;;  %v2774_v4 = vpop.f32.mrb[35].mxu1 }
 0x4c2   : >> { %v2793_v55 = vmax.f32 %v7569_v0, %v2774_v4 }
 0x4c3   : >> { %v2887_v28 = vmax.f32 %v2794_v27, %v5638_v16 }
 0x4c4   : >> { %v2886_v18 = vmax.f32 %v2793_v55, %v2867_v29  ;;  %v5627_v57 = vpop.f32.mrb[36].mxu1 }
 0x4c5   : >> { %v2891_v11 = vadd.f32 %v2887_v28, %v6565_v42  ;;  %v2796_v47 = vmax.f32 %v7570_v12, %v5627_v57  ;;  %v2784_v53 = vpop.f32.mrb[37].mxu1 }
 0x4c6   : >> { %v2890_v5 = vadd.f32 %v2886_v18, %v6567_v43  ;;  %v2795_v62 = vmax.f32 %v7571_v63, %v2784_v53 }
 0x4c7   : >> { %v2895_v51 = vmax.f32 %v2891_v11, 0.0  ;;  %v2889_v1 = vmax.f32 %v2796_v47, %v5641_v49 }
 0x4c8   : >> { %v2894_v20 = vmax.f32 %v2890_v5, 0.0  ;;  %v2888_v7 = vmax.f32 %v2795_v62, %v2877_v52 }
 0x4c9   : >> { %v2893_v16 = vadd.f32 %v2889_v1, %v6569_v44 }
 0x4ca   : >> { %v6078_v29 = vpack.c.bf16 %v2895_v51, %v2894_v20  ;;  %v2892_v32 = vadd.f32 %v2888_v7, %v6571_v45 }
 0x4cb   : >> { %v2897_v31 = vmax.f32 %v2893_v16, 0.0 }
 0x4cc   : >> { %v2896_v58 = vmax.f32 %v2892_v32, 0.0  ;;  %6079 = vmatpush3.bf16.msra.mxu1 %v6078_v29 }
 0x4cd   : >> { %6080 = vmatprep.subr.bf16.mxu1 %v7566_v30 }
 0x4ce   : >> { %v6081_v6 = vpack.c.bf16 %v2897_v31, %v2896_v58 }
 0x4d0   : >> { %6082 = vmatpush3.bf16.msra.mxu1 %v6081_v6 }
 0x4d1   : >> { %6092 = vmatprep.subr.bf16.mxu1 %v6872_v14 }
 0x4d3   : >> { %5651 = vmatmul.mubr.msk.f32.vlgmr.msra.gmra.mrb[16].mxu1 %vm1610_vm10, %v5043_v19 }
 0x4d4   : >> { %6094 = vmatpush3.bf16.msra.mxu1 %v6872_v14  ;;  %5675 = vmatprep.mubr.msk.f32.mxu1 %vm1610_vm10, %v6520_v23  ;;  %v3054_v14 = vpop.f32.mrb[23].mxu0 }
 0x4d5   : >> { %6096 = vmatprep.subr.bf16.mxu1 %v6885_v48 }
 0x4d8   : >> { %6098 = vmatpush3.bf16.msra.mxu1 %v6885_v48  ;;  %v5691_v48 = vpop.f32.mrb[24].mxu0 }
 0x4d9   : >> { %6108 = vmatprep.subr.bf16.mxu1 %v6896_v54 }
 0x4db   : >> { %5676 = vmatmul.mubr.msk.f32.vlgmr.msra.gmra.mrb[38].mxu1 %vm1610_vm10, %v6525_v24 }
 0x4dc   : >> { %6110 = vmatpush3.bf16.msra.mxu1 %v6896_v54  ;;  %5678 = vmatprep.mubr.msk.f32.mxu1 %vm1610_vm10, %v6530_v25  ;;  %v3226_v54 = vpop.f32.mrb[25].mxu0 }
 0x4dd   : >> { %6112 = vmatprep.subr.bf16.mxu1 %v7040_v59 }
 0x4df   : >> { %5679 = vmatmul.mubr.msk.f32.gmra.mrb[40].mxu1 %vm1610_vm10, %v6535_v26 }
 0x4e0   : >> { %6114 = vmatpush3.bf16.msra.mxu1 %v7040_v59  ;;  %5703 = vmatprep.mubr.msk.f32.mxu1 %vm1610_vm10, %v6520_v23  ;;  %v5694_v59 = vpop.f32.mrb[26].mxu0 }
 0x4e1   : >> { %6115 = vmatprep.subr.bf16.mxu1 %v7566_v30  ;;  %v3236_v15 = vpop.f32.mrb[27].mxu0 }
 0x4e2   : >> { %v7334_v22 = vpop.f32.mrb[28].mxu0 }
 0x4e3   : >> { %5704 = vmatmul.mubr.msk.f32.vlgmr.msra.gmra.mrb[42].mxu1 %vm1610_vm10, %v6525_v24  ;;  %v7336_v49 = vpop.f32.mrb[29].mxu0 }
 0x4e4   : >> { %5706 = vmatprep.mubr.msk.f32.mxu1 %vm1610_vm10, %v6530_v25  ;;  %v7338_v52 = vpop.f32.mrb[30].mxu0 }
 0x4e5   : >> { %v7340_v61 = vpop.f32.mrb[31].mxu0 }
 0x4e6   : >> { %v5744_v27 = vpop.f32.mrb[32].mxu0 }
 0x4e7   : >> { %5707 = vmatmul.mubr.msk.f32.gmra.mrb[44].mxu1 %vm1610_vm10, %v6535_v26  ;;  %v3605_v4 = vmax.f32 %v7334_v22, %v5744_v27  ;;  %v3585_v0 = vpop.f32.mrb[33].mxu0 }
 0x4e8   : >> { %5717 = vmatprep.mubr.msk.f32.mxu1 %vm6379_vm11, %v7567_v33  ;;  %v3604_v55 = vmax.f32 %v7336_v49, %v3585_v0  ;;  %v7344_v28 = vpop.f32.mrb[34].mxu0 }
 0x4e9   : >> { %v3607_v18 = vmax.f32 %v7338_v52, %v7344_v28  ;;  %v7348_v57 = vpop.f32.mrb[35].mxu0 }
 0x4ea   : >> { %v3606_v11 = vmax.f32 %v7340_v61, %v7348_v57  ;;  %v5079_v61 = vld [vmem:[%s7543_s5 + $0x20] sm:$0xff] }
 0x5ae   : >> { %v5677_v12 = vpop.f32.mrb[38].mxu1 }
 0x5af   : >> { %v3153_v47 = vmax.f32 %v7280_v13, %v5677_v12  ;;  %v3133_v53 = vpop.f32.mrb[39].mxu1 }
 0x5b0   : >> { %v3152_v5 = vmax.f32 %v7282_v17, %v3133_v53 }
 0x5b1   : >> { %v3246_v63 = vmax.f32 %v3153_v47, %v5691_v48  ;;  %v5061_v47 = vld [vmem:[%s7543_s5 + $0x18] sm:$0xff] }
 0x5b2   : >> { %v3245_v62 = vmax.f32 %v3152_v5, %v3226_v54  ;;  %v5680_v51 = vpop.f32.mrb[40].mxu1 }
 0x5b3   : >> { %v3155_v1 = vmax.f32 %v7284_v60, %v5680_v51  ;;  %v3143_v20 = vpop.f32.mrb[41].mxu1 }
 0x5b4   : >> { %v3154_v7 = vmax.f32 %v3054_v14, %v3143_v20 }
 0x5b5   : >> { %v3248_v16 = vmax.f32 %v3155_v1, %v5694_v59 }
 0x5b6   : >> { %v3247_v29 = vmax.f32 %v3154_v7, %v3236_v15  ;;  %v5705_v32 = vpop.f32.mrb[42].mxu1 }
 0x5b7   : >> { %v3339_v31 = vmax.f32 %v3246_v63, %v5705_v32  ;;  %v3319_v58 = vpop.f32.mrb[43].mxu1 }
 0x5b8   : >> { %v3338_v6 = vmax.f32 %v3245_v62, %v3319_v58 }
 0x5b9   : >> { %v3343_v19 = vadd.f32 %v3339_v31, %v6565_v42 }
 0x5ba   : >> { %v3342_v13 = vadd.f32 %v3338_v6, %v6567_v43  ;;  %v5708_v22 = vpop.f32.mrb[44].mxu1 }
 0x5bb   : >> { %v3347_v49 = vmax.f32 %v3343_v19, 0.0  ;;  %v3341_v17 = vmax.f32 %v3248_v16, %v5708_v22  ;;  %v3329_v48 = vpop.f32.mrb[45].mxu1 }
 0x5bc   : >> { %v3346_v54 = vmax.f32 %v3342_v13, 0.0  ;;  %v3340_v27 = vmax.f32 %v3247_v29, %v3329_v48 }
 0x5bd   : >> { %v3345_v60 = vadd.f32 %v3341_v17, %v6569_v44 }
 0x5be   : >> { %v6116_v0 = vpack.c.bf16 %v3347_v49, %v3346_v54  ;;  %v3344_v14 = vadd.f32 %v3340_v27, %v6571_v45 }
 0x5bf   : >> { %v3349_v59 = vmax.f32 %v3345_v60, 0.0 }
 0x5c0   : >> { %v3348_v15 = vmax.f32 %v3344_v14, 0.0  ;;  %6117 = vmatpush3.bf16.msra.mxu1 %v6116_v0 }
 0x5c1   : >> { %6118 = vmatprep.subr.bf16.mxu1 %v7566_v30 }
 0x5c2   : >> { %v6119_v12 = vpack.c.bf16 %v3349_v59, %v3348_v15 }
 0x5c4   : >> { %6120 = vmatpush3.bf16.msra.mxu1 %v6119_v12 }
 0x5c5   : >> { %6138 = vmatprep.subr.bf16.mxu1 %v7062_v10 }
 0x5c7   : >> { %5718 = vmatmul.mubr.msk.f32.vlgmr.msra.gmra.mrb[16].mxu1 %vm1610_vm10, %v5061_v47 }
 0x5c8   : >> { %6140 = vmatpush3.bf16.msra.mxu1 %v7062_v10  ;;  %5756 = vmatprep.mubr.msk.f32.mxu1 %vm1610_vm10, %v6520_v23  ;;  %v5772_v10 = vpop.f32.mrb[36].mxu0 }
 0x5c9   : >> { %6142 = vmatprep.subr.bf16.mxu1 %v7080_v21  ;;  %v3771_v53 = vpop.f32.mrb[37].mxu0 }
 0x5ca   : >> { %v5775_v5 = vpop.f32.mrb[38].mxu0 }
 0x5cb   : >> { %v3781_v63 = vpop.f32.mrb[39].mxu0 }
 0x5cc   : >> { %6144 = vmatpush3.bf16.msra.mxu1 %v7080_v21  ;;  %v7379_v62 = vpop.f32.mrb[40].mxu0 }
 0x5cd   : >> { %6153 = vmatprep.subr.bf16.mxu1 %v7566_v30  ;;  %v7381_v21 = vpop.f32.mrb[41].mxu0 }
 0x5ce   : >> { %v7383_v51 = vpop.f32.mrb[42].mxu0 }
 0x5cf   : >> { %5757 = vmatmul.mubr.msk.f32.vlgmr.msra.gmra.mrb[46].mxu1 %vm1610_vm10, %v6525_v24 }
 0x5d0   : >> { %5759 = vmatprep.mubr.msk.f32.mxu1 %vm1610_vm10, %v6530_v25 }
 0x5d3   : >> { %5760 = vmatmul.mubr.msk.f32.gmra.mrb[48].mxu1 %vm1610_vm10, %v6535_v26 }
 0x5d4   : >> { %5784 = vmatprep.mubr.msk.f32.mxu1 %vm6379_vm11, %v7567_v33 }
 0x6a2   : >> { %v5758_v1 = vpop.f32.mrb[46].mxu1 }
 0x6a3   : >> { %v3698_v20 = vmax.f32 %v3605_v4, %v5758_v1  ;;  %v3678_v7 = vpop.f32.mrb[47].mxu1 }
 0x6a4   : >> { %v3697_v16 = vmax.f32 %v3604_v55, %v3678_v7 }
 0x6a5   : >> { %v3791_v29 = vmax.f32 %v3698_v20, %v5772_v10 }
 0x6a6   : >> { %v3790_v32 = vmax.f32 %v3697_v16, %v3771_v53  ;;  %v5761_v31 = vpop.f32.mrb[48].mxu1 }
 0x6a7   : >> { %v3795_v58 = vadd.f32 %v3791_v29, %v6565_v42  ;;  %v3700_v6 = vmax.f32 %v3607_v18, %v5761_v31  ;;  %v3688_v19 = vpop.f32.mrb[49].mxu1 }
 0x6a8   : >> { %v3794_v13 = vadd.f32 %v3790_v32, %v6567_v43  ;;  %v3699_v22 = vmax.f32 %v3606_v11, %v3688_v19 }
 0x6a9   : >> { %v3799_v49 = vmax.f32 %v3795_v58, 0.0  ;;  %v3793_v4 = vmax.f32 %v3700_v6, %v5775_v5 }
 0x6aa   : >> { %v3798_v17 = vmax.f32 %v3794_v13, 0.0  ;;  %v3792_v55 = vmax.f32 %v3699_v22, %v3781_v63 }
 0x6ab   : >> { %v3797_v48 = vadd.f32 %v3793_v4, %v6569_v44 }
 0x6ac   : >> { %v6154_v54 = vpack.c.bf16 %v3799_v49, %v3798_v17  ;;  %v3796_v27 = vadd.f32 %v3792_v55, %v6571_v45 }
 0x6ad   : >> { %v3801_v60 = vmax.f32 %v3797_v48, 0.0 }
 0x6ae   : >> { %v3800_v0 = vmax.f32 %v3796_v27, 0.0  ;;  %6155 = vmatpush3.bf16.msra.mxu1 %v6154_v54 }
 0x6af   : >> { %6156 = vmatprep.subr.bf16.mxu1 %v7566_v30 }
 0x6b0   : >> { %v6157_v52 = vpack.c.bf16 %v3801_v60, %v3800_v0 }
 0x6b2   : >> { %6158 = vmatpush3.bf16.msra.mxu1 %v6157_v52 }
 0x6b3   : >> { %6168 = vmatprep.subr.bf16.mxu1 %v7117_v8 }
 0x6b5   : >> { %5785 = vmatmul.mubr.msk.f32.vlgmr.msra.gmra.mrb[16].mxu1 %vm1610_vm10, %v5079_v61 }
 0x6b6   : >> { %6170 = vmatpush3.bf16.msra.mxu1 %v7117_v8  ;;  %5809 = vmatprep.mubr.msk.f32.mxu1 %vm1610_vm10, %v6520_v23  ;;  %v3958_v8 = vpop.f32.mrb[43].mxu0 }
 0x6b7   : >> { %6172 = vmatprep.subr.bf16.mxu1 %v7133_v9 }
 0x6ba   : >> { %6174 = vmatpush3.bf16.msra.mxu1 %v7133_v9  ;;  %v5825_v9 = vpop.f32.mrb[44].mxu0 }
 0x6bb   : >> { %6184 = vmatprep.subr.bf16.mxu1 %v7156_v2 }
 0x6bd   : >> { %5810 = vmatmul.mubr.msk.f32.vlgmr.msra.gmra.mrb[50].mxu1 %vm1610_vm10, %v6525_v24 }
 0x6be   : >> { %6186 = vmatpush3.bf16.msra.mxu1 %v7156_v2  ;;  %5812 = vmatprep.mubr.msk.f32.mxu1 %vm1610_vm10, %v6530_v25  ;;  %v4130_v2 = vpop.f32.mrb[45].mxu0 }
 0x6bf   : >> { %6188 = vmatprep.subr.bf16.mxu1 %v7178_v56 }
 0x6c1   : >> { %5813 = vmatmul.mubr.msk.f32.gmra.mrb[52].mxu1 %vm1610_vm10, %v6535_v26 }
 0x6c2   : >> { %6190 = vmatpush3.bf16.msra.mxu1 %v7178_v56  ;;  %5837 = vmatprep.mubr.msk.f32.mxu1 %vm1610_vm10, %v6520_v23  ;;  %v5828_v56 = vpop.f32.mrb[46].mxu0 }
 0x6c3   : >> { %6191 = vmatprep.subr.bf16.mxu1 %v7566_v30  ;;  %v4140_v28 = vpop.f32.mrb[47].mxu0 }
 0x6c4   : >> { %v7427_v18 = vpop.f32.mrb[48].mxu0 }
 0x6c5   : >> { %5838 = vmatmul.mubr.msk.f32.vlgmr.msra.gmra.mrb[54].mxu1 %vm1610_vm10, %v6525_v24  ;;  %v7429_v57 = vpop.f32.mrb[49].mxu0 }
 0x6c6   : >> { %5840 = vmatprep.mubr.msk.f32.mxu1 %vm1610_vm10, %v6530_v25  ;;  %v7431_v11 = vpop.f32.mrb[50].mxu0 }
 0x6c7   : >> { %v7433_v14 = vpop.f32.mrb[51].mxu0 }
 0x6c8   : >> { %v5878_v59 = vpop.f32.mrb[52].mxu0 }
 0x6c9   : >> { %5841 = vmatmul.mubr.msk.f32.gmra.mrb[56].mxu1 %vm1610_vm10, %v6535_v26  ;;  %v4509_v15 = vmax.f32 %v7427_v18, %v5878_v59  ;;  %v4489_v12 = vpop.f32.mrb[53].mxu0 }
 0x6ca   : >> { %5851 = vmatprep.mubr.msk.f32.mxu1 %vm6379_vm11, %v7567_v33  ;;  %v4508_v47 = vmax.f32 %v7429_v57, %v4489_v12  ;;  %v5881_v10 = vpop.f32.mrb[54].mxu0 }
 0x6cb   : >> { %v4511_v53 = vmax.f32 %v7431_v11, %v5881_v10  ;;  %v7438_v5 = vpop.f32.mrb[55].mxu0 }
 0x6cc   : >> { %v4510_v63 = vmax.f32 %v7433_v14, %v7438_v5 }
 0x790   : >> { %v5811_v1 = vpop.f32.mrb[50].mxu1 }
 0x791   : >> { %v4057_v20 = vmax.f32 %v7379_v62, %v5811_v1  ;;  %v4037_v7 = vpop.f32.mrb[51].mxu1 }
 0x792   : >> { %v4056_v16 = vmax.f32 %v7381_v21, %v4037_v7 }
 0x793   : >> { %v4150_v29 = vmax.f32 %v4057_v20, %v5825_v9 }
 0x794   : >> { %v4149_v32 = vmax.f32 %v4056_v16, %v4130_v2  ;;  %v5814_v31 = vpop.f32.mrb[52].mxu1 }
 0x795   : >> { %v4059_v58 = vmax.f32 %v7383_v51, %v5814_v31  ;;  %v4047_v6 = vpop.f32.mrb[53].mxu1 }
 0x796   : >> { %v4058_v19 = vmax.f32 %v3958_v8, %v4047_v6 }
 0x797   : >> { %v4152_v13 = vmax.f32 %v4059_v58, %v5828_v56 }
 0x798   : >> { %v4151_v22 = vmax.f32 %v4058_v19, %v4140_v28  ;;  %v5839_v49 = vpop.f32.mrb[54].mxu1  ;;  %v5097_v28 = vld [vmem:[%s7543_s5 + $0x28] sm:$0xff] }
 0x799   : >> { %v4243_v4 = vmax.f32 %v4150_v29, %v5839_v49  ;;  %v4223_v17 = vpop.f32.mrb[55].mxu1 }
 0x79a   : >> { %v4242_v55 = vmax.f32 %v4149_v32, %v4223_v17 }
 0x79b   : >> { %v4247_v48 = vadd.f32 %v4243_v4, %v6565_v42 }
 0x79c   : >> { %v4246_v62 = vadd.f32 %v4242_v55, %v6567_v43  ;;  %v5842_v54 = vpop.f32.mrb[56].mxu1 }
 0x79d   : >> { %v4251_v27 = vmax.f32 %v4247_v48, 0.0  ;;  %v4245_v21 = vmax.f32 %v4152_v13, %v5842_v54  ;;  %v4233_v60 = vpop.f32.mrb[57].mxu1 }
 0x79e   : >> { %v4250_v0 = vmax.f32 %v4246_v62, 0.0  ;;  %v4244_v52 = vmax.f32 %v4151_v22, %v4233_v60 }
 0x79f   : >> { %v4249_v51 = vadd.f32 %v4245_v21, %v6569_v44 }
 0x7a0   : >> { %v6192_v61 = vpack.c.bf16 %v4251_v27, %v4250_v0  ;;  %v4248_v8 = vadd.f32 %v4244_v52, %v6571_v45 }
 0x7a1   : >> { %v4253_v9 = vmax.f32 %v4249_v51, 0.0 }
 0x7a2   : >> { %v4252_v2 = vmax.f32 %v4248_v8, 0.0  ;;  %6193 = vmatpush3.bf16.msra.mxu1 %v6192_v61 }
 0x7a3   : >> { %6194 = vmatprep.subr.bf16.mxu1 %v7566_v30 }
 0x7a4   : >> { %v6195_v56 = vpack.c.bf16 %v4253_v9, %v4252_v2 }
 0x7a6   : >> { %6196 = vmatpush3.bf16.msra.mxu1 %v6195_v56 }
 0x7a7   : >> { %6214 = vmatprep.subr.bf16.mxu1 %v7214_v3 }
 0x7a9   : >> { %5852 = vmatmul.mubr.msk.f32.vlgmr.msra.gmra.mrb[16].mxu1 %vm1610_vm10, %v5097_v28 }
 0x7aa   : >> { %6216 = vmatpush3.bf16.msra.mxu1 %v7214_v3  ;;  %5890 = vmatprep.mubr.msk.f32.mxu1 %vm1610_vm10, %v6520_v23  ;;  %v5906_v3 = vpop.f32.mrb[56].mxu0 }
 0x7ab   : >> { %6218 = vmatprep.subr.bf16.mxu1 %v7223_v50  ;;  %v4675_v18 = vpop.f32.mrb[57].mxu0 }
 0x7ac   : >> { %v5909_v57 = vpop.f32.mrb[58].mxu0 }
 0x7ad   : >> { %v4685_v11 = vpop.f32.mrb[59].mxu0 }
 0x7ae   : >> { %6220 = vmatpush3.bf16.msra.mxu1 %v7223_v50 }
 0x7af   : >> { %6229 = vmatprep.subr.bf16.mxu1 %v7566_v30 }
 0x7b1   : >> { %5891 = vmatmul.mubr.msk.f32.vlgmr.msra.gmra.mrb[58].mxu1 %vm1610_vm10, %v6525_v24 }
 0x7b2   : >> { %5893 = vmatprep.mubr.msk.f32.mxu1 %vm1610_vm10, %v6530_v25 }
 0x7b5   : >> { %5894 = vmatmul.mubr.msk.f32.gmra.mrb[60].mxu1 %vm1610_vm10, %v6535_v26 }
 0x7b6   : >> { %5918 = vmatprep.mubr.msk.f32.mxu1 %vm6379_vm11, %v7567_v33 }
 0x884   : >> { %v5892_v14 = vpop.f32.mrb[58].mxu1 }
 0x885   : >> { %v4602_v50 = vmax.f32 %v4509_v15, %v5892_v14  ;;  %v4582_v59 = vpop.f32.mrb[59].mxu1 }
 0x886   : >> { %v4601_v12 = vmax.f32 %v4508_v47, %v4582_v59 }
 0x887   : >> { %v4695_v10 = vmax.f32 %v4602_v50, %v5906_v3 }
 0x888   : >> { %v4694_v5 = vmax.f32 %v4601_v12, %v4675_v18  ;;  %v5895_v1 = vpop.f32.mrb[60].mxu1 }
 0x889   : >> { %v4699_v20 = vadd.f32 %v4695_v10, %v6565_v42  ;;  %v4604_v7 = vmax.f32 %v4511_v53, %v5895_v1  ;;  %v4592_v16 = vpop.f32.mrb[61].mxu1 }
 0x88a   : >> { %v4698_v29 = vadd.f32 %v4694_v5, %v6567_v43  ;;  %v4603_v32 = vmax.f32 %v4510_v63, %v4592_v16  ;;  %v5115_v63 = vld [vmem:[%s7543_s5 + $0x30] sm:$0xff] }
 0x88b   : >> { %v4703_v33 = vmax.f32 %v4699_v20, 0.0  ;;  %v4697_v31 = vmax.f32 %v4604_v7, %v5909_v57 }
 0x88c   : >> { %v4702_v58 = vmax.f32 %v4698_v29, 0.0  ;;  %v4696_v6 = vmax.f32 %v4603_v32, %v4685_v11 }
 0x88d   : >> { %v4701_v15 = vadd.f32 %v4697_v31, %v6569_v44 }
 0x88e   : >> { %v6230_v19 = vpack.c.bf16 %v4703_v33, %v4702_v58  ;;  %v4700_v47 = vadd.f32 %v4696_v6, %v6571_v45 }
 0x88f   : >> { %v4705_v13 = vmax.f32 %v4701_v15, 0.0 }
 0x890   : >> { %v4704_v22 = vmax.f32 %v4700_v47, 0.0  ;;  %6231 = vmatpush3.bf16.msra.mxu1 %v6230_v19 }
 0x891   : >> { %6232 = vmatprep.subr.bf16.mxu1 %v7566_v30 }
 0x892   : >> { %v6233_v53 = vpack.c.bf16 %v4705_v13, %v4704_v22 }
 0x894   : >> { %6234 = vmatpush3.bf16.msra.mxu1 %v6233_v53 }
 0x897   : >> { %5919 = vmatmul.mubr.msk.f32.vlgmr.msra.gmra.mrb[16].mxu1 %vm1610_vm10, %v5115_v63 }
 0x967   : > { %385 = sbr.rel (!%p383_p11) target bundleno = 174 (0xae), region = 99 }
 0x96a   : >> { %v4777_v49 = vpop.f32.mrb[16].mxu1 }
 0x96b   : >> { %v6235_v4 = vadd.f32 %v4777_v49, %v6573_v46  ;;  %v5920_v17 = vpop.f32.mrb[17].mxu1 }
 0x96d   : >> { %4784 = vst [vmem:[%s4783_s16] sm:$0xff] %v6235_v4 }
 0x96e   : > { %6317 = shalt.err (!%p6314_p4)
}
 0x96f   : > { %s6318_s20 = scalar_lea.hbm %s7489_s24, 256  ;;  %s6322_s14 = scalar_lea.hbm %s7545_s7, 512 }
 0x970   : > { %p6319_p7 = scmp.ne.s32.totalorder %s7489_s24, %s6318_s20  ;;  %p6323_p10 = scmp.lt.u32.totalorder %s7489_s24, %s7545_s7 }
 0x971   : > { %p6324_p11 = scmp.lt.u32.totalorder %s6322_s14, %s6318_s20  ;;  %p6326_p13 = scmp.lt.u32.totalorder %s6318_s20, %s7489_s24 }
 0x972   : > { %p6320_p8 = pnand %p6319_p7, %p6465_p5 }
 0x973   : > { %p6325_p12 = por %p6324_p11, %p6323_p10 }
 0x974   : > { %p6321_p9 = pneg %p6320_p8 }
 0x975   : > { %p6327_p0 = por %p6326_p13, %p6325_p12 }
 0x977   : > { %p6328_p1 = pnand %p6327_p0, %p6321_p9 }
 0x979   : > { %6331 = shalt.err (!%p6328_p1)
}
 0x97a   : > { %s6382_s17 = smov 128   ;;  %s6383_s18 = smov 8  }
 0x97b   : > { %6248 = dma.vmem_to_hbm [thread:$0]  (%p6465_p5), %s7493_s30, 256, %s7489_s24, %s7497_s22, %s6382_s17, %s6382_s17, %s6383_s18  }
 0x97c PF: > { %p6254_p2 = scmp.ge.s32.totalorder %s6370_s29, 2  ;;  %s4814_s23 = sand.u32 1, %s6358_s26  }
 0x97d   : > { %s4815_s25 = scalar_lea.sflag [#allocation6], %s4814_s23 }
 0x97e   : > { %p6251_p3 = pnand %p6254_p2, %p6469_p6 }
 0x980   : > { %6353 = dma.done.wait (!%p6251_p3), %s4815_s25, 256  }
 0x981   : > { %6355 = vsyncadd (!%p6251_p3), %s4815_s25, 4294967040  ;;  %p19_p4 = scmp.ge.s32.totalorder %s6452_s8, 4   ;;  %s7572_s26 = smov %s6362_s27 }
 0x982   : > { %s7573_s27 = smov %s6366_s28  ;;  %s7574_s28 = smov %s6463_s11 }
 0x983   : > { %s7575_s29 = smov %s6452_s8  ;;  %21 = sbr.rel (!%p19_p4) target bundleno = 6 (0x6), region = 110 }
 0x98a   :  { %4820 = vsyncpa [#allocation6], 1 }
 0x98b   :  { %4822 = vsyncpa [#allocation6 + $0x1], 1 }

</bundles_post_ra>
